<compile_context>
chip_gen: v6e
topology: v6e:2x2x1
jax: 0.10.0
libtpu: 0.0.40
codegen_flags: <defaults>
</compile_context>

<pallas_src>
import jax
import jax.numpy as jnp
from jax.experimental import pallas as pl
from jax.experimental.pallas import tpu as pltpu


# ---------------------------------------------------------------------------
# Static slab layouts (row offsets are multiples of 8 so every in-kernel slice
# starts sublane-aligned).  All shapes are fixed by the LeNet architecture.
# ---------------------------------------------------------------------------
def _slab_layout(blocks):
    """blocks: {name: (rows, cols)} -> ({name: (row_off, rows, cols)}, total_rows)."""
    out, off = {}, 0
    for name, (r, c) in blocks.items():
        out[name] = (off, r, c)
        off += -(-r // 8) * 8
    return out, off


_W_WIDTH = 168
_W_BLOCKS, _W_ROWS = _slab_layout({
    "t1": (160, 168),            # conv1 banded im2row RHS
    "t2": (420, 160),            # conv2 banded im2row RHS
    "ca1": (168, 84), "cb1": (168, 84),   # pool1 even/odd column selectors
    "ra1": (14, 28), "rb1": (14, 28),     # pool1 even/odd row selectors
    "ca2": (160, 80), "cb2": (160, 80),   # pool2 column selectors
    "ra2": (5, 10), "rb2": (5, 10),       # pool2 row selectors
    "w1": (400, 120),            # fc1 (flatten-folded), five (80,120) blocks
    "w2": (120, 84),             # fc2 (in, out)
    "w3": (84, 10),              # fc3 (in, out)
})

_B_WIDTH = 168
_B_BLOCKS, _B_ROWS = _slab_layout({
    "b1c": (1, 168),             # conv1 bias expanded per output column
    "b2c": (1, 160),             # conv2 bias expanded per output column
    "b1f": (1, 120),
    "b2f": (1, 84),
    "b3f": (1, 10),
})


# ---------------------------------------------------------------------------
# Fused kernel.  Per-image layouts:
#   conv strips : S[y, oc*OW + x]   (output row on sublanes, (oc, x) on lanes)
#   pooled maps : P[y, ic*PW + x]
# ---------------------------------------------------------------------------
def _lenet_kernel(x_ref, w_ref, b_ref, out_ref,
                  lhs1_s, lhs2_s, p1_s, p2t_s, p2_s):
    bf16, f32 = jnp.bfloat16, jnp.float32
    tb = x_ref.shape[0]                       # images in this batch tile (small)

    def mxu(a, b):
        return jnp.dot(a, b, preferred_element_type=f32)

    def wblk(name):                           # load at use site (no hoisting)
        off, r, c = _W_BLOCKS[name]
        return w_ref[off:off + r, :c]

    def bias(name):
        off, r, c = _B_BLOCKS[name]
        return b_ref[off:off + r, :c]

    for b in range(tb):
        # ---- conv1 (1->6, 5x5) as ONE im2row matmul: stage the 5 shifted row
        #      windows along lanes, then (28,160) @ (160,168) on the MXU.
        for i in range(5):
            lhs1_s[:, 32 * i:32 * (i + 1)] = x_ref[b, 0, i:i + 28, :].astype(bf16)
        s1 = jnp.maximum(mxu(lhs1_s[...], wblk("t1")) + bias("b1c"), 0.0)   # (28,168)

        # ---- 2x2/2 max-pool via exact 0/1 selector matmuls (bf16 in, f32 out)
        s1b = s1.astype(bf16)
        cc1 = jnp.maximum(mxu(s1b, wblk("ca1")), mxu(s1b, wblk("cb1")))     # (28,84)
        cc1b = cc1.astype(bf16)
        p1_s[...] = jnp.maximum(mxu(wblk("ra1"), cc1b),
                                mxu(wblk("rb1"), cc1b))                     # (14,84)

        # ---- conv2 (6->16, 5x5): im2row staging of the pooled strip, then
        #      ONE matmul (10,420) @ (420,160).
        for i in range(5):
            lhs2_s[:, 84 * i:84 * (i + 1)] = p1_s[i:i + 10, :].astype(bf16)
        s2 = jnp.maximum(mxu(lhs2_s[...], wblk("t2")) + bias("b2c"), 0.0)   # (10,160)

        # ---- 2x2/2 max-pool -> p2[y, oc*5 + x]
        s2b = s2.astype(bf16)
        cc2 = jnp.maximum(mxu(s2b, wblk("ca2")), mxu(s2b, wblk("cb2")))     # (10,80)
        cc2b = cc2.astype(bf16)
        p2t_s[...] = jnp.maximum(mxu(wblk("ra2"), cc2b),
                                 mxu(wblk("rb2"), cc2b))                    # (5,80)

        # ---- stage as (5, TB, 80) so fc1 reads clean (TB, 80) blocks.
        for y in range(5):
            p2_s[y, b:b + 1, :] = p2t_s[y:y + 1, :]

    # ---- fc1: the NCHW flatten is folded into the pre-permuted weight
    #      blocks; the MXU sees M = TB rows per block.
    w1_off, _, _ = _W_BLOCKS["w1"]
    h1 = bias("b1f")                                                        # (1,120)
    for y in range(5):
        w1y = w_ref[w1_off + 80 * y:w1_off + 80 * (y + 1), :120]            # (80,120)
        h1 = h1 + mxu(p2_s[y].astype(bf16), w1y)
    h1 = jnp.maximum(h1, 0.0)                                               # (TB,120)

    # ---- fc2 / fc3 (the reference module applies ReLU after fc3 too)
    h2 = jnp.maximum(mxu(h1.astype(bf16), wblk("w2")) + bias("b2f"), 0.0)   # (TB,84)
    h3 = jnp.maximum(mxu(h2.astype(bf16), wblk("w3")) + bias("b3f"), 0.0)   # (TB,10)
    out_ref[...] = h3


# ---------------------------------------------------------------------------
# One-time weight re-layout (run at init, never in the forward path).
# ---------------------------------------------------------------------------
def _conv_band_weights(w, in_w, out_w):
    """T[i, ic*in_w + u, oc*out_w + x] = w[oc, ic, i, u-x] for 0 <= u-x < KW."""
    oc, ic, kh, kw = w.shape
    u = jnp.arange(in_w)[:, None]
    x = jnp.arange(out_w)[None, :]
    sh = jnp.stack([(u == x + j) for j in range(kw)], 0).astype(jnp.float32)
    t = jnp.einsum("ocij,jux->icuox", w.astype(jnp.float32), sh)
    return t.reshape(kh, ic * in_w, oc * out_w)


def _pool_col_selectors(cols_in):
    c = jnp.arange(cols_in)[:, None]
    k = jnp.arange(cols_in // 2)[None, :]
    return ((c == 2 * k).astype(jnp.float32),
            (c == 2 * k + 1).astype(jnp.float32))


def _pool_row_selectors(rows_in):
    q = jnp.arange(rows_in // 2)[:, None]
    r = jnp.arange(rows_in)[None, :]
    return ((r == 2 * q).astype(jnp.float32),
            (r == 2 * q + 1).astype(jnp.float32))


def prepare_params(p):
    """PyTorch-shaped LeNet params -> two packed, MXU-friendly operand slabs."""
    f32, bf16 = jnp.float32, jnp.bfloat16

    t1 = _conv_band_weights(p["conv1_w"], 32, 28).reshape(160, 168)
    t2 = _conv_band_weights(p["conv2_w"], 14, 10).reshape(420, 160)
    ca1, cb1 = _pool_col_selectors(6 * 28)
    ra1, rb1 = _pool_row_selectors(28)
    ca2, cb2 = _pool_col_selectors(16 * 10)
    ra2, rb2 = _pool_row_selectors(10)
    # fc1 with the NCHW flatten folded in: row = y*80 + oc*5 + x.
    w1 = jnp.transpose(p["fc1_w"].astype(f32).reshape(120, 16, 5, 5),
                       (2, 1, 3, 0)).reshape(400, 120)
    w2 = p["fc2_w"].astype(f32).T
    w3 = p["fc3_w"].astype(f32).T

    wvals = {"t1": t1, "t2": t2, "ca1": ca1, "cb1": cb1, "ra1": ra1, "rb1": rb1,
             "ca2": ca2, "cb2": cb2, "ra2": ra2, "rb2": rb2,
             "w1": w1, "w2": w2, "w3": w3}
    wslab = jnp.zeros((_W_ROWS, _W_WIDTH), bf16)
    for name, arr in wvals.items():
        off, r, c = _W_BLOCKS[name]
        assert arr.shape == (r, c), (name, arr.shape, (r, c))
        wslab = wslab.at[off:off + r, :c].set(arr.astype(bf16))

    bvals = {"b1c": jnp.repeat(p["conv1_b"].astype(f32), 28)[None, :],
             "b2c": jnp.repeat(p["conv2_b"].astype(f32), 10)[None, :],
             "b1f": p["fc1_b"].astype(f32)[None, :],
             "b2f": p["fc2_b"].astype(f32)[None, :],
             "b3f": p["fc3_b"].astype(f32)[None, :]}
    bslab = jnp.zeros((_B_ROWS, _B_WIDTH), f32)
    for name, arr in bvals.items():
        off, r, c = _B_BLOCKS[name]
        assert arr.shape == (r, c), (name, arr.shape, (r, c))
        bslab = bslab.at[off:off + r, :c].set(arr)

    return {"wslab": wslab, "bslab": bslab}


# ---------------------------------------------------------------------------
# Forward: one pallas_call, VMEM-resident, "parallel" grid over batch tiles.
# ---------------------------------------------------------------------------
def lenet_forward(x, kp, *, tile_b=None):
    """x: (B, 1, 32, 32) float32 NCHW; kp: dict from prepare_params()."""
    B = x.shape[0]
    tb = B if tile_b is None else tile_b
    assert B % tb == 0 and (tb == B or tb % 8 == 0), "tile_b must divide B (and be a multiple of 8 if < B)"
    grid = (B // tb,)

    return pl.pallas_call(
        _lenet_kernel,
        out_shape=jax.ShapeDtypeStruct((B, 10), jnp.float32),
        grid=grid,
        in_specs=[
            pl.BlockSpec((tb, 1, 32, 32), lambda g: (g, 0, 0, 0)),
            pl.BlockSpec((_W_ROWS, _W_WIDTH), lambda g: (0, 0)),   # weight slab
            pl.BlockSpec((_B_ROWS, _B_WIDTH), lambda g: (0, 0)),   # bias slab
        ],
        out_specs=pl.BlockSpec((tb, 10), lambda g: (g, 0)),
        scratch_shapes=[
            pltpu.VMEM((28, 160), jnp.bfloat16),   # conv1 im2row staging
            pltpu.VMEM((10, 420), jnp.bfloat16),   # conv2 im2row staging
            pltpu.VMEM((14, 84), jnp.float32),     # pooled conv1 strip
            pltpu.VMEM((5, 80), jnp.float32),      # pooled conv2 strip (one image)
            pltpu.VMEM((5, tb, 80), jnp.float32),  # pooled conv2, y-major over the tile
        ],
        compiler_params=pltpu.CompilerParams(
            dimension_semantics=("parallel",)),
    )(x, kp["wslab"], kp["bslab"])


# ---------------------------------------------------------------------------
# PyTorch-shaped init and a pure-JAX (XLA) reference for validation.
# ---------------------------------------------------------------------------
def init_params(key):
    ks = jax.random.split(key, 10)

    def u(k, shape, fan_in):
        bound = 1.0 / jnp.sqrt(fan_in)
        return jax.random.uniform(k, shape, jnp.float32, -bound, bound)

    return {
        "conv1_w": u(ks[0], (6, 1, 5, 5), 1 * 5 * 5),
        "conv1_b": u(ks[1], (6,), 1 * 5 * 5),
        "conv2_w": u(ks[2], (16, 6, 5, 5), 6 * 5 * 5),
        "conv2_b": u(ks[3], (16,), 6 * 5 * 5),
        "fc1_w": u(ks[4], (120, 16 * 5 * 5), 16 * 5 * 5),
        "fc1_b": u(ks[5], (120,), 16 * 5 * 5),
        "fc2_w": u(ks[6], (84, 120), 120),
        "fc2_b": u(ks[7], (84,), 120),
        "fc3_w": u(ks[8], (10, 84), 84),
        "fc3_b": u(ks[9], (10,), 84),
    }


def lenet_reference(x, p):
    def conv(y, w, b):
        dn = jax.lax.conv_dimension_numbers(y.shape, w.shape, ("NCHW", "OIHW", "NCHW"))
        y = jax.lax.conv_general_dilated(y, w, (1, 1), "VALID", dimension_numbers=dn)
        return jax.nn.relu(y + b[None, :, None, None])

    def pool(y):
        return jax.lax.reduce_window(y, -jnp.inf, jax.lax.max,
                                     (1, 1, 2, 2), (1, 1, 2, 2), "VALID")

    y = pool(conv(x, p["conv1_w"], p["conv1_b"]))
    y = pool(conv(y, p["conv2_w"], p["conv2_b"]))
    y = y.reshape(y.shape[0], -1)
    y = jax.nn.relu(y @ p["fc1_w"].T + p["fc1_b"])
    y = jax.nn.relu(y @ p["fc2_w"].T + p["fc2_b"])
    y = jax.nn.relu(y @ p["fc3_w"].T + p["fc3_b"])
    return y


if __name__ == "__main__":
    key = jax.random.PRNGKey(0)
    k_x, k_p = jax.random.split(key)
    # LeNet's 16*5*5 flatten fixes the input at 1x32x32; batch = 2.
    x = jax.random.normal(k_x, (2, 1, 32, 32), dtype=jnp.float32)
    params = init_params(k_p)
    kparams = prepare_params(params)          # one-time weight re-layout / packing

    out = jax.block_until_ready(jax.jit(lenet_forward)(x, kparams))
    assert out.shape == (2, 10) and out.dtype == jnp.float32

    ref = jax.block_until_ready(jax.jit(lenet_reference)(x, params))
    # Tolerance accounts for bf16 MXU operands with f32 accumulation.
    assert jnp.allclose(out, ref, atol=3e-2, rtol=3e-2), (
        f"mismatch vs reference, max abs err {jnp.max(jnp.abs(out - ref))}")
    print("KERNEL_OK")
</pallas_src>

<mosaic_0001>
module attributes {stable_mosaic.version = 11 : i64} {
  func.func @_lenet_kernel(%arg0: i32, %arg1: memref<2x1x32x32xf32, #tpu.memory_space<vmem>>, %arg2: memref<1896x168xbf16, #tpu.memory_space<vmem>>, %arg3: memref<40x168xf32, #tpu.memory_space<vmem>>, %arg4: memref<2x10xf32, #tpu.memory_space<vmem>>, %arg5: memref<28x160xbf16, #tpu.memory_space<vmem>>, %arg6: memref<10x420xbf16, #tpu.memory_space<vmem>>, %arg7: memref<14x84xf32, #tpu.memory_space<vmem>>, %arg8: memref<5x80xf32, #tpu.memory_space<vmem>>, %arg9: memref<5x2x80xf32, #tpu.memory_space<vmem>>) attributes {dimension_semantics = [#tpu.dimension_semantics<parallel>], iteration_bounds = array<i64: 1>, scalar_prefetch = 0 : i64, scratch_operands = 5 : i64, tpu.core_type = #tpu.core_type<tc>, window_params = [{transform_indices = @transform_0, window_bounds = array<i64: 2, 1, 32, 32>}, {pipeline_mode = #tpu.pipeline_mode<synchronous>, transform_indices = @transform_1, window_bounds = array<i64: 1896, 168>}, {pipeline_mode = #tpu.pipeline_mode<synchronous>, transform_indices = @transform_2, window_bounds = array<i64: 40, 168>}, {transform_indices = @transform_3, window_bounds = array<i64: 2, 10>}]} {
    %c0 = arith.constant 0 : index
    %c0_0 = arith.constant 0 : index
    %c0_1 = arith.constant 0 : index
    %c0_2 = arith.constant 0 : index
    %0 = vector.load %arg1[%c0, %c0_0, %c0_1, %c0_2] : memref<2x1x32x32xf32, #tpu.memory_space<vmem>>, vector<1x1x28x32xf32>
    %1 = vector.shape_cast %0 : vector<1x1x28x32xf32> to vector<28x32xf32>
    %2 = arith.truncf %1 : vector<28x32xf32> to vector<28x32xbf16>
    %c0_3 = arith.constant 0 : index
    %c0_4 = arith.constant 0 : index
    %3 = vector.load %arg5[%c0_3, %c0_4] : memref<28x160xbf16, #tpu.memory_space<vmem>>, vector<28x32xbf16>
    tpu.vector_store %arg5[%c0_3, %c0_4], %2 {strides = array<i32>} : memref<28x160xbf16, #tpu.memory_space<vmem>>, vector<28x32xbf16>,
    %c0_5 = arith.constant 0 : index
    %c0_6 = arith.constant 0 : index
    %c1 = arith.constant 1 : index
    %c0_7 = arith.constant 0 : index
    %4 = vector.load %arg1[%c0_5, %c0_6, %c1, %c0_7] : memref<2x1x32x32xf32, #tpu.memory_space<vmem>>, vector<1x1x28x32xf32>
    %5 = vector.shape_cast %4 : vector<1x1x28x32xf32> to vector<28x32xf32>
    %6 = arith.truncf %5 : vector<28x32xf32> to vector<28x32xbf16>
    %c0_8 = arith.constant 0 : index
    %c32 = arith.constant 32 : index
    %7 = vector.load %arg5[%c0_8, %c32] : memref<28x160xbf16, #tpu.memory_space<vmem>>, vector<28x32xbf16>
    tpu.vector_store %arg5[%c0_8, %c32], %6 {strides = array<i32>} : memref<28x160xbf16, #tpu.memory_space<vmem>>, vector<28x32xbf16>,
    %c0_9 = arith.constant 0 : index
    %c0_10 = arith.constant 0 : index
    %c2 = arith.constant 2 : index
    %c0_11 = arith.constant 0 : index
    %8 = vector.load %arg1[%c0_9, %c0_10, %c2, %c0_11] : memref<2x1x32x32xf32, #tpu.memory_space<vmem>>, vector<1x1x28x32xf32>
    %9 = vector.shape_cast %8 : vector<1x1x28x32xf32> to vector<28x32xf32>
    %10 = arith.truncf %9 : vector<28x32xf32> to vector<28x32xbf16>
    %c0_12 = arith.constant 0 : index
    %c64 = arith.constant 64 : index
    %11 = vector.load %arg5[%c0_12, %c64] : memref<28x160xbf16, #tpu.memory_space<vmem>>, vector<28x32xbf16>
    tpu.vector_store %arg5[%c0_12, %c64], %10 {strides = array<i32>} : memref<28x160xbf16, #tpu.memory_space<vmem>>, vector<28x32xbf16>,
    %c0_13 = arith.constant 0 : index
    %c0_14 = arith.constant 0 : index
    %c3 = arith.constant 3 : index
    %c0_15 = arith.constant 0 : index
    %12 = vector.load %arg1[%c0_13, %c0_14, %c3, %c0_15] : memref<2x1x32x32xf32, #tpu.memory_space<vmem>>, vector<1x1x28x32xf32>
    %13 = vector.shape_cast %12 : vector<1x1x28x32xf32> to vector<28x32xf32>
    %14 = arith.truncf %13 : vector<28x32xf32> to vector<28x32xbf16>
    %c0_16 = arith.constant 0 : index
    %c96 = arith.constant 96 : index
    %15 = vector.load %arg5[%c0_16, %c96] : memref<28x160xbf16, #tpu.memory_space<vmem>>, vector<28x32xbf16>
    tpu.vector_store %arg5[%c0_16, %c96], %14 {strides = array<i32>} : memref<28x160xbf16, #tpu.memory_space<vmem>>, vector<28x32xbf16>,
    %c0_17 = arith.constant 0 : index
    %c0_18 = arith.constant 0 : index
    %c4 = arith.constant 4 : index
    %c0_19 = arith.constant 0 : index
    %16 = vector.load %arg1[%c0_17, %c0_18, %c4, %c0_19] : memref<2x1x32x32xf32, #tpu.memory_space<vmem>>, vector<1x1x28x32xf32>
    %17 = vector.shape_cast %16 : vector<1x1x28x32xf32> to vector<28x32xf32>
    %18 = arith.truncf %17 : vector<28x32xf32> to vector<28x32xbf16>
    %c0_20 = arith.constant 0 : index
    %c128 = arith.constant 128 : index
    %19 = vector.load %arg5[%c0_20, %c128] : memref<28x160xbf16, #tpu.memory_space<vmem>>, vector<28x32xbf16>
    tpu.vector_store %arg5[%c0_20, %c128], %18 {strides = array<i32>} : memref<28x160xbf16, #tpu.memory_space<vmem>>, vector<28x32xbf16>,
    %c0_21 = arith.constant 0 : index
    %c0_22 = arith.constant 0 : index
    %20 = vector.load %arg5[%c0_21, %c0_22] : memref<28x160xbf16, #tpu.memory_space<vmem>>, vector<28x160xbf16>
    %c0_23 = arith.constant 0 : index
    %c0_24 = arith.constant 0 : index
    %21 = vector.load %arg2[%c0_23, %c0_24] : memref<1896x168xbf16, #tpu.memory_space<vmem>>, vector<160x168xbf16>
    %cst = arith.constant dense<0.000000e+00> : vector<28x168xf32>
    %22 = tpu.matmul %20, %21, %cst {dimension_numbers = #tpu.dot_dimension_numbers<[1], [0], [0], [1], [0, 0, 1, 1], [], []>} : vector<28x160xbf16>, vector<160x168xbf16>, vector<28x168xf32> -> vector<28x168xf32>
    %c0_25 = arith.constant 0 : index
    %c0_26 = arith.constant 0 : index
    %23 = vector.load %arg3[%c0_25, %c0_26] : memref<40x168xf32, #tpu.memory_space<vmem>>, vector<1x168xf32>
    %24 = vector.broadcast %23 : vector<1x168xf32> to vector<28x168xf32>
    %25 = arith.addf %22, %24 : vector<28x168xf32>
    %cst_27 = arith.constant 0.000000e+00 : f32
    %26 = vector.broadcast %cst_27 : f32 to vector<28x168xf32>
    %27 = arith.maximumf %25, %26 : vector<28x168xf32>
    %28 = arith.truncf %27 : vector<28x168xf32> to vector<28x168xbf16>
    %c584 = arith.constant 584 : index
    %c0_28 = arith.constant 0 : index
    %29 = vector.load %arg2[%c584, %c0_28] : memref<1896x168xbf16, #tpu.memory_space<vmem>>, vector<168x84xbf16>
    %cst_29 = arith.constant dense<0.000000e+00> : vector<28x84xf32>
    %30 = tpu.matmul %28, %29, %cst_29 {dimension_numbers = #tpu.dot_dimension_numbers<[1], [0], [0], [1], [0, 0, 1, 1], [], []>} : vector<28x168xbf16>, vector<168x84xbf16>, vector<28x84xf32> -> vector<28x84xf32>
    %c752 = arith.constant 752 : index
    %c0_30 = arith.constant 0 : index
    %31 = vector.load %arg2[%c752, %c0_30] : memref<1896x168xbf16, #tpu.memory_space<vmem>>, vector<168x84xbf16>
    %cst_31 = arith.constant dense<0.000000e+00> : vector<28x84xf32>
    %32 = tpu.matmul %28, %31, %cst_31 {dimension_numbers = #tpu.dot_dimension_numbers<[1], [0], [0], [1], [0, 0, 1, 1], [], []>} : vector<28x168xbf16>, vector<168x84xbf16>, vector<28x84xf32> -> vector<28x84xf32>
    %33 = arith.maximumf %30, %32 : vector<28x84xf32>
    %34 = arith.truncf %33 : vector<28x84xf32> to vector<28x84xbf16>
    %c920 = arith.constant 920 : index
    %c0_32 = arith.constant 0 : index
    %35 = vector.load %arg2[%c920, %c0_32] : memref<1896x168xbf16, #tpu.memory_space<vmem>>, vector<14x28xbf16>
    %cst_33 = arith.constant dense<0.000000e+00> : vector<14x84xf32>
    %36 = tpu.matmul %35, %34, %cst_33 {dimension_numbers = #tpu.dot_dimension_numbers<[1], [0], [0], [1], [0, 0, 1, 1], [], []>} : vector<14x28xbf16>, vector<28x84xbf16>, vector<14x84xf32> -> vector<14x84xf32>
    %c936 = arith.constant 936 : index
    %c0_34 = arith.constant 0 : index
    %37 = vector.load %arg2[%c936, %c0_34] : memref<1896x168xbf16, #tpu.memory_space<vmem>>, vector<14x28xbf16>
    %cst_35 = arith.constant dense<0.000000e+00> : vector<14x84xf32>
    %38 = tpu.matmul %37, %34, %cst_35 {dimension_numbers = #tpu.dot_dimension_numbers<[1], [0], [0], [1], [0, 0, 1, 1], [], []>} : vector<14x28xbf16>, vector<28x84xbf16>, vector<14x84xf32> -> vector<14x84xf32>
    %39 = arith.maximumf %36, %38 : vector<14x84xf32>
    %c0_36 = arith.constant 0 : index
    %c0_37 = arith.constant 0 : index
    %40 = vector.load %arg7[%c0_36, %c0_37] : memref<14x84xf32, #tpu.memory_space<vmem>>, vector<14x84xf32>
    tpu.vector_store %arg7[%c0_36, %c0_37], %39 {strides = array<i32>} : memref<14x84xf32, #tpu.memory_space<vmem>>, vector<14x84xf32>,
    %c0_38 = arith.constant 0 : index
    %c0_39 = arith.constant 0 : index
    %41 = vector.load %arg7[%c0_38, %c0_39] : memref<14x84xf32, #tpu.memory_space<vmem>>, vector<10x84xf32>
    %42 = arith.truncf %41 : vector<10x84xf32> to vector<10x84xbf16>
    %c0_40 = arith.constant 0 : index
    %c0_41 = arith.constant 0 : index
    %43 = vector.load %arg6[%c0_40, %c0_41] : memref<10x420xbf16, #tpu.memory_space<vmem>>, vector<10x84xbf16>
    tpu.vector_store %arg6[%c0_40, %c0_41], %42 {strides = array<i32>} : memref<10x420xbf16, #tpu.memory_space<vmem>>, vector<10x84xbf16>,
    %c1_42 = arith.constant 1 : index
    %c0_43 = arith.constant 0 : index
    %44 = vector.load %arg7[%c1_42, %c0_43] : memref<14x84xf32, #tpu.memory_space<vmem>>, vector<10x84xf32>
    %45 = arith.truncf %44 : vector<10x84xf32> to vector<10x84xbf16>
    %c0_44 = arith.constant 0 : index
    %c84 = arith.constant 84 : index
    %46 = vector.load %arg6[%c0_44, %c84] : memref<10x420xbf16, #tpu.memory_space<vmem>>, vector<10x84xbf16>
    tpu.vector_store %arg6[%c0_44, %c84], %45 {strides = array<i32>} : memref<10x420xbf16, #tpu.memory_space<vmem>>, vector<10x84xbf16>,
    %c2_45 = arith.constant 2 : index
    %c0_46 = arith.constant 0 : index
    %47 = vector.load %arg7[%c2_45, %c0_46] : memref<14x84xf32, #tpu.memory_space<vmem>>, vector<10x84xf32>
    %48 = arith.truncf %47 : vector<10x84xf32> to vector<10x84xbf16>
    %c0_47 = arith.constant 0 : index
    %c168 = arith.constant 168 : index
    %49 = vector.load %arg6[%c0_47, %c168] : memref<10x420xbf16, #tpu.memory_space<vmem>>, vector<10x84xbf16>
    tpu.vector_store %arg6[%c0_47, %c168], %48 {strides = array<i32>} : memref<10x420xbf16, #tpu.memory_space<vmem>>, vector<10x84xbf16>,
    %c3_48 = arith.constant 3 : index
    %c0_49 = arith.constant 0 : index
    %50 = vector.load %arg7[%c3_48, %c0_49] : memref<14x84xf32, #tpu.memory_space<vmem>>, vector<10x84xf32>
    %51 = arith.truncf %50 : vector<10x84xf32> to vector<10x84xbf16>
    %c0_50 = arith.constant 0 : index
    %c252 = arith.constant 252 : index
    %52 = vector.load %arg6[%c0_50, %c252] : memref<10x420xbf16, #tpu.memory_space<vmem>>, vector<10x84xbf16>
    tpu.vector_store %arg6[%c0_50, %c252], %51 {strides = array<i32>} : memref<10x420xbf16, #tpu.memory_space<vmem>>, vector<10x84xbf16>,
    %c4_51 = arith.constant 4 : index
    %c0_52 = arith.constant 0 : index
    %53 = vector.load %arg7[%c4_51, %c0_52] : memref<14x84xf32, #tpu.memory_space<vmem>>, vector<10x84xf32>
    %54 = arith.truncf %53 : vector<10x84xf32> to vector<10x84xbf16>
    %c0_53 = arith.constant 0 : index
    %c336 = arith.constant 336 : index
    %55 = vector.load %arg6[%c0_53, %c336] : memref<10x420xbf16, #tpu.memory_space<vmem>>, vector<10x84xbf16>
    tpu.vector_store %arg6[%c0_53, %c336], %54 {strides = array<i32>} : memref<10x420xbf16, #tpu.memory_space<vmem>>, vector<10x84xbf16>,
    %c0_54 = arith.constant 0 : index
    %c0_55 = arith.constant 0 : index
    %56 = vector.load %arg6[%c0_54, %c0_55] : memref<10x420xbf16, #tpu.memory_space<vmem>>, vector<10x420xbf16>
    %c160 = arith.constant 160 : index
    %c0_56 = arith.constant 0 : index
    %57 = vector.load %arg2[%c160, %c0_56] : memref<1896x168xbf16, #tpu.memory_space<vmem>>, vector<420x160xbf16>
    %cst_57 = arith.constant dense<0.000000e+00> : vector<10x160xf32>
    %58 = tpu.matmul %56, %57, %cst_57 {dimension_numbers = #tpu.dot_dimension_numbers<[1], [0], [0], [1], [0, 0, 1, 1], [], []>} : vector<10x420xbf16>, vector<420x160xbf16>, vector<10x160xf32> -> vector<10x160xf32>
    %c8 = arith.constant 8 : index
    %c0_58 = arith.constant 0 : index
    %59 = vector.load %arg3[%c8, %c0_58] : memref<40x168xf32, #tpu.memory_space<vmem>>, vector<1x160xf32>
    %60 = vector.broadcast %59 : vector<1x160xf32> to vector<10x160xf32>
    %61 = arith.addf %58, %60 : vector<10x160xf32>
    %cst_59 = arith.constant 0.000000e+00 : f32
    %62 = vector.broadcast %cst_59 : f32 to vector<10x160xf32>
    %63 = arith.maximumf %61, %62 : vector<10x160xf32>
    %64 = arith.truncf %63 : vector<10x160xf32> to vector<10x160xbf16>
    %c952 = arith.constant 952 : index
    %c0_60 = arith.constant 0 : index
    %65 = vector.load %arg2[%c952, %c0_60] : memref<1896x168xbf16, #tpu.memory_space<vmem>>, vector<160x80xbf16>
    %cst_61 = arith.constant dense<0.000000e+00> : vector<10x80xf32>
    %66 = tpu.matmul %64, %65, %cst_61 {dimension_numbers = #tpu.dot_dimension_numbers<[1], [0], [0], [1], [0, 0, 1, 1], [], []>} : vector<10x160xbf16>, vector<160x80xbf16>, vector<10x80xf32> -> vector<10x80xf32>
    %c1112 = arith.constant 1112 : index
    %c0_62 = arith.constant 0 : index
    %67 = vector.load %arg2[%c1112, %c0_62] : memref<1896x168xbf16, #tpu.memory_space<vmem>>, vector<160x80xbf16>
    %cst_63 = arith.constant dense<0.000000e+00> : vector<10x80xf32>
    %68 = tpu.matmul %64, %67, %cst_63 {dimension_numbers = #tpu.dot_dimension_numbers<[1], [0], [0], [1], [0, 0, 1, 1], [], []>} : vector<10x160xbf16>, vector<160x80xbf16>, vector<10x80xf32> -> vector<10x80xf32>
    %69 = arith.maximumf %66, %68 : vector<10x80xf32>
    %70 = arith.truncf %69 : vector<10x80xf32> to vector<10x80xbf16>
    %c1272 = arith.constant 1272 : index
    %c0_64 = arith.constant 0 : index
    %71 = vector.load %arg2[%c1272, %c0_64] : memref<1896x168xbf16, #tpu.memory_space<vmem>>, vector<5x10xbf16>
    %cst_65 = arith.constant dense<0.000000e+00> : vector<5x80xf32>
    %72 = tpu.matmul %71, %70, %cst_65 {dimension_numbers = #tpu.dot_dimension_numbers<[1], [0], [0], [1], [0, 0, 1, 1], [], []>} : vector<5x10xbf16>, vector<10x80xbf16>, vector<5x80xf32> -> vector<5x80xf32>
    %c1280 = arith.constant 1280 : index
    %c0_66 = arith.constant 0 : index
    %73 = vector.load %arg2[%c1280, %c0_66] : memref<1896x168xbf16, #tpu.memory_space<vmem>>, vector<5x10xbf16>
    %cst_67 = arith.constant dense<0.000000e+00> : vector<5x80xf32>
    %74 = tpu.matmul %73, %70, %cst_67 {dimension_numbers = #tpu.dot_dimension_numbers<[1], [0], [0], [1], [0, 0, 1, 1], [], []>} : vector<5x10xbf16>, vector<10x80xbf16>, vector<5x80xf32> -> vector<5x80xf32>
    %75 = arith.maximumf %72, %74 : vector<5x80xf32>
    %c0_68 = arith.constant 0 : index
    %c0_69 = arith.constant 0 : index
    %76 = vector.load %arg8[%c0_68, %c0_69] : memref<5x80xf32, #tpu.memory_space<vmem>>, vector<5x80xf32>
    tpu.vector_store %arg8[%c0_68, %c0_69], %75 {strides = array<i32>} : memref<5x80xf32, #tpu.memory_space<vmem>>, vector<5x80xf32>,
    %c0_70 = arith.constant 0 : index
    %c0_71 = arith.constant 0 : index
    %77 = vector.load %arg8[%c0_70, %c0_71] : memref<5x80xf32, #tpu.memory_space<vmem>>, vector<1x80xf32>
    %c0_72 = arith.constant 0 : index
    %c0_73 = arith.constant 0 : index
    %c0_74 = arith.constant 0 : index
    %78 = vector.load %arg9[%c0_72, %c0_73, %c0_74] : memref<5x2x80xf32, #tpu.memory_space<vmem>>, vector<1x1x80xf32>
    %79 = vector.shape_cast %78 : vector<1x1x80xf32> to vector<1x80xf32>
    %80 = vector.shape_cast %77 : vector<1x80xf32> to vector<1x1x80xf32>
    tpu.vector_store %arg9[%c0_72, %c0_73, %c0_74], %80 {strides = array<i32>} : memref<5x2x80xf32, #tpu.memory_space<vmem>>, vector<1x1x80xf32>,
    %c1_75 = arith.constant 1 : index
    %c0_76 = arith.constant 0 : index
    %81 = vector.load %arg8[%c1_75, %c0_76] : memref<5x80xf32, #tpu.memory_space<vmem>>, vector<1x80xf32>
    %c1_77 = arith.constant 1 : index
    %c0_78 = arith.constant 0 : index
    %c0_79 = arith.constant 0 : index
    %82 = vector.load %arg9[%c1_77, %c0_78, %c0_79] : memref<5x2x80xf32, #tpu.memory_space<vmem>>, vector<1x1x80xf32>
    %83 = vector.shape_cast %82 : vector<1x1x80xf32> to vector<1x80xf32>
    %84 = vector.shape_cast %81 : vector<1x80xf32> to vector<1x1x80xf32>
    tpu.vector_store %arg9[%c1_77, %c0_78, %c0_79], %84 {strides = array<i32>} : memref<5x2x80xf32, #tpu.memory_space<vmem>>, vector<1x1x80xf32>,
    %c2_80 = arith.constant 2 : index
    %c0_81 = arith.constant 0 : index
    %85 = vector.load %arg8[%c2_80, %c0_81] : memref<5x80xf32, #tpu.memory_space<vmem>>, vector<1x80xf32>
    %c2_82 = arith.constant 2 : index
    %c0_83 = arith.constant 0 : index
    %c0_84 = arith.constant 0 : index
    %86 = vector.load %arg9[%c2_82, %c0_83, %c0_84] : memref<5x2x80xf32, #tpu.memory_space<vmem>>, vector<1x1x80xf32>
    %87 = vector.shape_cast %86 : vector<1x1x80xf32> to vector<1x80xf32>
    %88 = vector.shape_cast %85 : vector<1x80xf32> to vector<1x1x80xf32>
    tpu.vector_store %arg9[%c2_82, %c0_83, %c0_84], %88 {strides = array<i32>} : memref<5x2x80xf32, #tpu.memory_space<vmem>>, vector<1x1x80xf32>,
    %c3_85 = arith.constant 3 : index
    %c0_86 = arith.constant 0 : index
    %89 = vector.load %arg8[%c3_85, %c0_86] : memref<5x80xf32, #tpu.memory_space<vmem>>, vector<1x80xf32>
    %c3_87 = arith.constant 3 : index
    %c0_88 = arith.constant 0 : index
    %c0_89 = arith.constant 0 : index
    %90 = vector.load %arg9[%c3_87, %c0_88, %c0_89] : memref<5x2x80xf32, #tpu.memory_space<vmem>>, vector<1x1x80xf32>
    %91 = vector.shape_cast %90 : vector<1x1x80xf32> to vector<1x80xf32>
    %92 = vector.shape_cast %89 : vector<1x80xf32> to vector<1x1x80xf32>
    tpu.vector_store %arg9[%c3_87, %c0_88, %c0_89], %92 {strides = array<i32>} : memref<5x2x80xf32, #tpu.memory_space<vmem>>, vector<1x1x80xf32>,
    %c4_90 = arith.constant 4 : index
    %c0_91 = arith.constant 0 : index
    %93 = vector.load %arg8[%c4_90, %c0_91] : memref<5x80xf32, #tpu.memory_space<vmem>>, vector<1x80xf32>
    %c4_92 = arith.constant 4 : index
    %c0_93 = arith.constant 0 : index
    %c0_94 = arith.constant 0 : index
    %94 = vector.load %arg9[%c4_92, %c0_93, %c0_94] : memref<5x2x80xf32, #tpu.memory_space<vmem>>, vector<1x1x80xf32>
    %95 = vector.shape_cast %94 : vector<1x1x80xf32> to vector<1x80xf32>
    %96 = vector.shape_cast %93 : vector<1x80xf32> to vector<1x1x80xf32>
    tpu.vector_store %arg9[%c4_92, %c0_93, %c0_94], %96 {strides = array<i32>} : memref<5x2x80xf32, #tpu.memory_space<vmem>>, vector<1x1x80xf32>,
    %c1_95 = arith.constant 1 : index
    %c0_96 = arith.constant 0 : index
    %c0_97 = arith.constant 0 : index
    %c0_98 = arith.constant 0 : index
    %97 = vector.load %arg1[%c1_95, %c0_96, %c0_97, %c0_98] : memref<2x1x32x32xf32, #tpu.memory_space<vmem>>, vector<1x1x28x32xf32>
    %98 = vector.shape_cast %97 : vector<1x1x28x32xf32> to vector<28x32xf32>
    %99 = arith.truncf %98 : vector<28x32xf32> to vector<28x32xbf16>
    %c0_99 = arith.constant 0 : index
    %c0_100 = arith.constant 0 : index
    %100 = vector.load %arg5[%c0_99, %c0_100] : memref<28x160xbf16, #tpu.memory_space<vmem>>, vector<28x32xbf16>
    tpu.vector_store %arg5[%c0_99, %c0_100], %99 {strides = array<i32>} : memref<28x160xbf16, #tpu.memory_space<vmem>>, vector<28x32xbf16>,
    %c1_101 = arith.constant 1 : index
    %c0_102 = arith.constant 0 : index
    %c1_103 = arith.constant 1 : index
    %c0_104 = arith.constant 0 : index
    %101 = vector.load %arg1[%c1_101, %c0_102, %c1_103, %c0_104] : memref<2x1x32x32xf32, #tpu.memory_space<vmem>>, vector<1x1x28x32xf32>
    %102 = vector.shape_cast %101 : vector<1x1x28x32xf32> to vector<28x32xf32>
    %103 = arith.truncf %102 : vector<28x32xf32> to vector<28x32xbf16>
    %c0_105 = arith.constant 0 : index
    %c32_106 = arith.constant 32 : index
    %104 = vector.load %arg5[%c0_105, %c32_106] : memref<28x160xbf16, #tpu.memory_space<vmem>>, vector<28x32xbf16>
    tpu.vector_store %arg5[%c0_105, %c32_106], %103 {strides = array<i32>} : memref<28x160xbf16, #tpu.memory_space<vmem>>, vector<28x32xbf16>,
    %c1_107 = arith.constant 1 : index
    %c0_108 = arith.constant 0 : index
    %c2_109 = arith.constant 2 : index
    %c0_110 = arith.constant 0 : index
    %105 = vector.load %arg1[%c1_107, %c0_108, %c2_109, %c0_110] : memref<2x1x32x32xf32, #tpu.memory_space<vmem>>, vector<1x1x28x32xf32>
    %106 = vector.shape_cast %105 : vector<1x1x28x32xf32> to vector<28x32xf32>
    %107 = arith.truncf %106 : vector<28x32xf32> to vector<28x32xbf16>
    %c0_111 = arith.constant 0 : index
    %c64_112 = arith.constant 64 : index
    %108 = vector.load %arg5[%c0_111, %c64_112] : memref<28x160xbf16, #tpu.memory_space<vmem>>, vector<28x32xbf16>
    tpu.vector_store %arg5[%c0_111, %c64_112], %107 {strides = array<i32>} : memref<28x160xbf16, #tpu.memory_space<vmem>>, vector<28x32xbf16>,
    %c1_113 = arith.constant 1 : index
    %c0_114 = arith.constant 0 : index
    %c3_115 = arith.constant 3 : index
    %c0_116 = arith.constant 0 : index
    %109 = vector.load %arg1[%c1_113, %c0_114, %c3_115, %c0_116] : memref<2x1x32x32xf32, #tpu.memory_space<vmem>>, vector<1x1x28x32xf32>
    %110 = vector.shape_cast %109 : vector<1x1x28x32xf32> to vector<28x32xf32>
    %111 = arith.truncf %110 : vector<28x32xf32> to vector<28x32xbf16>
    %c0_117 = arith.constant 0 : index
    %c96_118 = arith.constant 96 : index
    %112 = vector.load %arg5[%c0_117, %c96_118] : memref<28x160xbf16, #tpu.memory_space<vmem>>, vector<28x32xbf16>
    tpu.vector_store %arg5[%c0_117, %c96_118], %111 {strides = array<i32>} : memref<28x160xbf16, #tpu.memory_space<vmem>>, vector<28x32xbf16>,
    %c1_119 = arith.constant 1 : index
    %c0_120 = arith.constant 0 : index
    %c4_121 = arith.constant 4 : index
    %c0_122 = arith.constant 0 : index
    %113 = vector.load %arg1[%c1_119, %c0_120, %c4_121, %c0_122] : memref<2x1x32x32xf32, #tpu.memory_space<vmem>>, vector<1x1x28x32xf32>
    %114 = vector.shape_cast %113 : vector<1x1x28x32xf32> to vector<28x32xf32>
    %115 = arith.truncf %114 : vector<28x32xf32> to vector<28x32xbf16>
    %c0_123 = arith.constant 0 : index
    %c128_124 = arith.constant 128 : index
    %116 = vector.load %arg5[%c0_123, %c128_124] : memref<28x160xbf16, #tpu.memory_space<vmem>>, vector<28x32xbf16>
    tpu.vector_store %arg5[%c0_123, %c128_124], %115 {strides = array<i32>} : memref<28x160xbf16, #tpu.memory_space<vmem>>, vector<28x32xbf16>,
    %c0_125 = arith.constant 0 : index
    %c0_126 = arith.constant 0 : index
    %117 = vector.load %arg5[%c0_125, %c0_126] : memref<28x160xbf16, #tpu.memory_space<vmem>>, vector<28x160xbf16>
    %c0_127 = arith.constant 0 : index
    %c0_128 = arith.constant 0 : index
    %118 = vector.load %arg2[%c0_127, %c0_128] : memref<1896x168xbf16, #tpu.memory_space<vmem>>, vector<160x168xbf16>
    %cst_129 = arith.constant dense<0.000000e+00> : vector<28x168xf32>
    %119 = tpu.matmul %117, %118, %cst_129 {dimension_numbers = #tpu.dot_dimension_numbers<[1], [0], [0], [1], [0, 0, 1, 1], [], []>} : vector<28x160xbf16>, vector<160x168xbf16>, vector<28x168xf32> -> vector<28x168xf32>
    %c0_130 = arith.constant 0 : index
    %c0_131 = arith.constant 0 : index
    %120 = vector.load %arg3[%c0_130, %c0_131] : memref<40x168xf32, #tpu.memory_space<vmem>>, vector<1x168xf32>
    %121 = vector.broadcast %120 : vector<1x168xf32> to vector<28x168xf32>
    %122 = arith.addf %119, %121 : vector<28x168xf32>
    %cst_132 = arith.constant 0.000000e+00 : f32
    %123 = vector.broadcast %cst_132 : f32 to vector<28x168xf32>
    %124 = arith.maximumf %122, %123 : vector<28x168xf32>
    %125 = arith.truncf %124 : vector<28x168xf32> to vector<28x168xbf16>
    %c584_133 = arith.constant 584 : index
    %c0_134 = arith.constant 0 : index
    %126 = vector.load %arg2[%c584_133, %c0_134] : memref<1896x168xbf16, #tpu.memory_space<vmem>>, vector<168x84xbf16>
    %cst_135 = arith.constant dense<0.000000e+00> : vector<28x84xf32>
    %127 = tpu.matmul %125, %126, %cst_135 {dimension_numbers = #tpu.dot_dimension_numbers<[1], [0], [0], [1], [0, 0, 1, 1], [], []>} : vector<28x168xbf16>, vector<168x84xbf16>, vector<28x84xf32> -> vector<28x84xf32>
    %c752_136 = arith.constant 752 : index
    %c0_137 = arith.constant 0 : index
    %128 = vector.load %arg2[%c752_136, %c0_137] : memref<1896x168xbf16, #tpu.memory_space<vmem>>, vector<168x84xbf16>
    %cst_138 = arith.constant dense<0.000000e+00> : vector<28x84xf32>
    %129 = tpu.matmul %125, %128, %cst_138 {dimension_numbers = #tpu.dot_dimension_numbers<[1], [0], [0], [1], [0, 0, 1, 1], [], []>} : vector<28x168xbf16>, vector<168x84xbf16>, vector<28x84xf32> -> vector<28x84xf32>
    %130 = arith.maximumf %127, %129 : vector<28x84xf32>
    %131 = arith.truncf %130 : vector<28x84xf32> to vector<28x84xbf16>
    %c920_139 = arith.constant 920 : index
    %c0_140 = arith.constant 0 : index
    %132 = vector.load %arg2[%c920_139, %c0_140] : memref<1896x168xbf16, #tpu.memory_space<vmem>>, vector<14x28xbf16>
    %cst_141 = arith.constant dense<0.000000e+00> : vector<14x84xf32>
    %133 = tpu.matmul %132, %131, %cst_141 {dimension_numbers = #tpu.dot_dimension_numbers<[1], [0], [0], [1], [0, 0, 1, 1], [], []>} : vector<14x28xbf16>, vector<28x84xbf16>, vector<14x84xf32> -> vector<14x84xf32>
    %c936_142 = arith.constant 936 : index
    %c0_143 = arith.constant 0 : index
    %134 = vector.load %arg2[%c936_142, %c0_143] : memref<1896x168xbf16, #tpu.memory_space<vmem>>, vector<14x28xbf16>
    %cst_144 = arith.constant dense<0.000000e+00> : vector<14x84xf32>
    %135 = tpu.matmul %134, %131, %cst_144 {dimension_numbers = #tpu.dot_dimension_numbers<[1], [0], [0], [1], [0, 0, 1, 1], [], []>} : vector<14x28xbf16>, vector<28x84xbf16>, vector<14x84xf32> -> vector<14x84xf32>
    %136 = arith.maximumf %133, %135 : vector<14x84xf32>
    %c0_145 = arith.constant 0 : index
    %c0_146 = arith.constant 0 : index
    %137 = vector.load %arg7[%c0_145, %c0_146] : memref<14x84xf32, #tpu.memory_space<vmem>>, vector<14x84xf32>
    tpu.vector_store %arg7[%c0_145, %c0_146], %136 {strides = array<i32>} : memref<14x84xf32, #tpu.memory_space<vmem>>, vector<14x84xf32>,
    %c0_147 = arith.constant 0 : index
    %c0_148 = arith.constant 0 : index
    %138 = vector.load %arg7[%c0_147, %c0_148] : memref<14x84xf32, #tpu.memory_space<vmem>>, vector<10x84xf32>
    %139 = arith.truncf %138 : vector<10x84xf32> to vector<10x84xbf16>
    %c0_149 = arith.constant 0 : index
    %c0_150 = arith.constant 0 : index
    %140 = vector.load %arg6[%c0_149, %c0_150] : memref<10x420xbf16, #tpu.memory_space<vmem>>, vector<10x84xbf16>
    tpu.vector_store %arg6[%c0_149, %c0_150], %139 {strides = array<i32>} : memref<10x420xbf16, #tpu.memory_space<vmem>>, vector<10x84xbf16>,
    %c1_151 = arith.constant 1 : index
    %c0_152 = arith.constant 0 : index
    %141 = vector.load %arg7[%c1_151, %c0_152] : memref<14x84xf32, #tpu.memory_space<vmem>>, vector<10x84xf32>
    %142 = arith.truncf %141 : vector<10x84xf32> to vector<10x84xbf16>
    %c0_153 = arith.constant 0 : index
    %c84_154 = arith.constant 84 : index
    %143 = vector.load %arg6[%c0_153, %c84_154] : memref<10x420xbf16, #tpu.memory_space<vmem>>, vector<10x84xbf16>
    tpu.vector_store %arg6[%c0_153, %c84_154], %142 {strides = array<i32>} : memref<10x420xbf16, #tpu.memory_space<vmem>>, vector<10x84xbf16>,
    %c2_155 = arith.constant 2 : index
    %c0_156 = arith.constant 0 : index
    %144 = vector.load %arg7[%c2_155, %c0_156] : memref<14x84xf32, #tpu.memory_space<vmem>>, vector<10x84xf32>
    %145 = arith.truncf %144 : vector<10x84xf32> to vector<10x84xbf16>
    %c0_157 = arith.constant 0 : index
    %c168_158 = arith.constant 168 : index
    %146 = vector.load %arg6[%c0_157, %c168_158] : memref<10x420xbf16, #tpu.memory_space<vmem>>, vector<10x84xbf16>
    tpu.vector_store %arg6[%c0_157, %c168_158], %145 {strides = array<i32>} : memref<10x420xbf16, #tpu.memory_space<vmem>>, vector<10x84xbf16>,
    %c3_159 = arith.constant 3 : index
    %c0_160 = arith.constant 0 : index
    %147 = vector.load %arg7[%c3_159, %c0_160] : memref<14x84xf32, #tpu.memory_space<vmem>>, vector<10x84xf32>
    %148 = arith.truncf %147 : vector<10x84xf32> to vector<10x84xbf16>
    %c0_161 = arith.constant 0 : index
    %c252_162 = arith.constant 252 : index
    %149 = vector.load %arg6[%c0_161, %c252_162] : memref<10x420xbf16, #tpu.memory_space<vmem>>, vector<10x84xbf16>
    tpu.vector_store %arg6[%c0_161, %c252_162], %148 {strides = array<i32>} : memref<10x420xbf16, #tpu.memory_space<vmem>>, vector<10x84xbf16>,
    %c4_163 = arith.constant 4 : index
    %c0_164 = arith.constant 0 : index
    %150 = vector.load %arg7[%c4_163, %c0_164] : memref<14x84xf32, #tpu.memory_space<vmem>>, vector<10x84xf32>
    %151 = arith.truncf %150 : vector<10x84xf32> to vector<10x84xbf16>
    %c0_165 = arith.constant 0 : index
    %c336_166 = arith.constant 336 : index
    %152 = vector.load %arg6[%c0_165, %c336_166] : memref<10x420xbf16, #tpu.memory_space<vmem>>, vector<10x84xbf16>
    tpu.vector_store %arg6[%c0_165, %c336_166], %151 {strides = array<i32>} : memref<10x420xbf16, #tpu.memory_space<vmem>>, vector<10x84xbf16>,
    %c0_167 = arith.constant 0 : index
    %c0_168 = arith.constant 0 : index
    %153 = vector.load %arg6[%c0_167, %c0_168] : memref<10x420xbf16, #tpu.memory_space<vmem>>, vector<10x420xbf16>
    %c160_169 = arith.constant 160 : index
    %c0_170 = arith.constant 0 : index
    %154 = vector.load %arg2[%c160_169, %c0_170] : memref<1896x168xbf16, #tpu.memory_space<vmem>>, vector<420x160xbf16>
    %cst_171 = arith.constant dense<0.000000e+00> : vector<10x160xf32>
    %155 = tpu.matmul %153, %154, %cst_171 {dimension_numbers = #tpu.dot_dimension_numbers<[1], [0], [0], [1], [0, 0, 1, 1], [], []>} : vector<10x420xbf16>, vector<420x160xbf16>, vector<10x160xf32> -> vector<10x160xf32>
    %c8_172 = arith.constant 8 : index
    %c0_173 = arith.constant 0 : index
    %156 = vector.load %arg3[%c8_172, %c0_173] : memref<40x168xf32, #tpu.memory_space<vmem>>, vector<1x160xf32>
    %157 = vector.broadcast %156 : vector<1x160xf32> to vector<10x160xf32>
    %158 = arith.addf %155, %157 : vector<10x160xf32>
    %cst_174 = arith.constant 0.000000e+00 : f32
    %159 = vector.broadcast %cst_174 : f32 to vector<10x160xf32>
    %160 = arith.maximumf %158, %159 : vector<10x160xf32>
    %161 = arith.truncf %160 : vector<10x160xf32> to vector<10x160xbf16>
    %c952_175 = arith.constant 952 : index
    %c0_176 = arith.constant 0 : index
    %162 = vector.load %arg2[%c952_175, %c0_176] : memref<1896x168xbf16, #tpu.memory_space<vmem>>, vector<160x80xbf16>
    %cst_177 = arith.constant dense<0.000000e+00> : vector<10x80xf32>
    %163 = tpu.matmul %161, %162, %cst_177 {dimension_numbers = #tpu.dot_dimension_numbers<[1], [0], [0], [1], [0, 0, 1, 1], [], []>} : vector<10x160xbf16>, vector<160x80xbf16>, vector<10x80xf32> -> vector<10x80xf32>
    %c1112_178 = arith.constant 1112 : index
    %c0_179 = arith.constant 0 : index
    %164 = vector.load %arg2[%c1112_178, %c0_179] : memref<1896x168xbf16, #tpu.memory_space<vmem>>, vector<160x80xbf16>
    %cst_180 = arith.constant dense<0.000000e+00> : vector<10x80xf32>
    %165 = tpu.matmul %161, %164, %cst_180 {dimension_numbers = #tpu.dot_dimension_numbers<[1], [0], [0], [1], [0, 0, 1, 1], [], []>} : vector<10x160xbf16>, vector<160x80xbf16>, vector<10x80xf32> -> vector<10x80xf32>
    %166 = arith.maximumf %163, %165 : vector<10x80xf32>
    %167 = arith.truncf %166 : vector<10x80xf32> to vector<10x80xbf16>
    %c1272_181 = arith.constant 1272 : index
    %c0_182 = arith.constant 0 : index
    %168 = vector.load %arg2[%c1272_181, %c0_182] : memref<1896x168xbf16, #tpu.memory_space<vmem>>, vector<5x10xbf16>
    %cst_183 = arith.constant dense<0.000000e+00> : vector<5x80xf32>
    %169 = tpu.matmul %168, %167, %cst_183 {dimension_numbers = #tpu.dot_dimension_numbers<[1], [0], [0], [1], [0, 0, 1, 1], [], []>} : vector<5x10xbf16>, vector<10x80xbf16>, vector<5x80xf32> -> vector<5x80xf32>
    %c1280_184 = arith.constant 1280 : index
    %c0_185 = arith.constant 0 : index
    %170 = vector.load %arg2[%c1280_184, %c0_185] : memref<1896x168xbf16, #tpu.memory_space<vmem>>, vector<5x10xbf16>
    %cst_186 = arith.constant dense<0.000000e+00> : vector<5x80xf32>
    %171 = tpu.matmul %170, %167, %cst_186 {dimension_numbers = #tpu.dot_dimension_numbers<[1], [0], [0], [1], [0, 0, 1, 1], [], []>} : vector<5x10xbf16>, vector<10x80xbf16>, vector<5x80xf32> -> vector<5x80xf32>
    %172 = arith.maximumf %169, %171 : vector<5x80xf32>
    %c0_187 = arith.constant 0 : index
    %c0_188 = arith.constant 0 : index
    %173 = vector.load %arg8[%c0_187, %c0_188] : memref<5x80xf32, #tpu.memory_space<vmem>>, vector<5x80xf32>
    tpu.vector_store %arg8[%c0_187, %c0_188], %172 {strides = array<i32>} : memref<5x80xf32, #tpu.memory_space<vmem>>, vector<5x80xf32>,
    %c0_189 = arith.constant 0 : index
    %c0_190 = arith.constant 0 : index
    %174 = vector.load %arg8[%c0_189, %c0_190] : memref<5x80xf32, #tpu.memory_space<vmem>>, vector<1x80xf32>
    %c0_191 = arith.constant 0 : index
    %c1_192 = arith.constant 1 : index
    %c0_193 = arith.constant 0 : index
    %175 = vector.load %arg9[%c0_191, %c1_192, %c0_193] : memref<5x2x80xf32, #tpu.memory_space<vmem>>, vector<1x1x80xf32>
    %176 = vector.shape_cast %175 : vector<1x1x80xf32> to vector<1x80xf32>
    %177 = vector.shape_cast %174 : vector<1x80xf32> to vector<1x1x80xf32>
    tpu.vector_store %arg9[%c0_191, %c1_192, %c0_193], %177 {strides = array<i32>} : memref<5x2x80xf32, #tpu.memory_space<vmem>>, vector<1x1x80xf32>,
    %c1_194 = arith.constant 1 : index
    %c0_195 = arith.constant 0 : index
    %178 = vector.load %arg8[%c1_194, %c0_195] : memref<5x80xf32, #tpu.memory_space<vmem>>, vector<1x80xf32>
    %c1_196 = arith.constant 1 : index
    %c1_197 = arith.constant 1 : index
    %c0_198 = arith.constant 0 : index
    %179 = vector.load %arg9[%c1_196, %c1_197, %c0_198] : memref<5x2x80xf32, #tpu.memory_space<vmem>>, vector<1x1x80xf32>
    %180 = vector.shape_cast %179 : vector<1x1x80xf32> to vector<1x80xf32>
    %181 = vector.shape_cast %178 : vector<1x80xf32> to vector<1x1x80xf32>
    tpu.vector_store %arg9[%c1_196, %c1_197, %c0_198], %181 {strides = array<i32>} : memref<5x2x80xf32, #tpu.memory_space<vmem>>, vector<1x1x80xf32>,
    %c2_199 = arith.constant 2 : index
    %c0_200 = arith.constant 0 : index
    %182 = vector.load %arg8[%c2_199, %c0_200] : memref<5x80xf32, #tpu.memory_space<vmem>>, vector<1x80xf32>
    %c2_201 = arith.constant 2 : index
    %c1_202 = arith.constant 1 : index
    %c0_203 = arith.constant 0 : index
    %183 = vector.load %arg9[%c2_201, %c1_202, %c0_203] : memref<5x2x80xf32, #tpu.memory_space<vmem>>, vector<1x1x80xf32>
    %184 = vector.shape_cast %183 : vector<1x1x80xf32> to vector<1x80xf32>
    %185 = vector.shape_cast %182 : vector<1x80xf32> to vector<1x1x80xf32>
    tpu.vector_store %arg9[%c2_201, %c1_202, %c0_203], %185 {strides = array<i32>} : memref<5x2x80xf32, #tpu.memory_space<vmem>>, vector<1x1x80xf32>,
    %c3_204 = arith.constant 3 : index
    %c0_205 = arith.constant 0 : index
    %186 = vector.load %arg8[%c3_204, %c0_205] : memref<5x80xf32, #tpu.memory_space<vmem>>, vector<1x80xf32>
    %c3_206 = arith.constant 3 : index
    %c1_207 = arith.constant 1 : index
    %c0_208 = arith.constant 0 : index
    %187 = vector.load %arg9[%c3_206, %c1_207, %c0_208] : memref<5x2x80xf32, #tpu.memory_space<vmem>>, vector<1x1x80xf32>
    %188 = vector.shape_cast %187 : vector<1x1x80xf32> to vector<1x80xf32>
    %189 = vector.shape_cast %186 : vector<1x80xf32> to vector<1x1x80xf32>
    tpu.vector_store %arg9[%c3_206, %c1_207, %c0_208], %189 {strides = array<i32>} : memref<5x2x80xf32, #tpu.memory_space<vmem>>, vector<1x1x80xf32>,
    %c4_209 = arith.constant 4 : index
    %c0_210 = arith.constant 0 : index
    %190 = vector.load %arg8[%c4_209, %c0_210] : memref<5x80xf32, #tpu.memory_space<vmem>>, vector<1x80xf32>
    %c4_211 = arith.constant 4 : index
    %c1_212 = arith.constant 1 : index
    %c0_213 = arith.constant 0 : index
    %191 = vector.load %arg9[%c4_211, %c1_212, %c0_213] : memref<5x2x80xf32, #tpu.memory_space<vmem>>, vector<1x1x80xf32>
    %192 = vector.shape_cast %191 : vector<1x1x80xf32> to vector<1x80xf32>
    %193 = vector.shape_cast %190 : vector<1x80xf32> to vector<1x1x80xf32>
    tpu.vector_store %arg9[%c4_211, %c1_212, %c0_213], %193 {strides = array<i32>} : memref<5x2x80xf32, #tpu.memory_space<vmem>>, vector<1x1x80xf32>,
    %c16 = arith.constant 16 : index
    %c0_214 = arith.constant 0 : index
    %194 = vector.load %arg3[%c16, %c0_214] : memref<40x168xf32, #tpu.memory_space<vmem>>, vector<1x120xf32>
    %c1288 = arith.constant 1288 : index
    %c0_215 = arith.constant 0 : index
    %195 = vector.load %arg2[%c1288, %c0_215] : memref<1896x168xbf16, #tpu.memory_space<vmem>>, vector<80x120xbf16>
    %c0_216 = arith.constant 0 : index
    %c0_217 = arith.constant 0 : index
    %c0_218 = arith.constant 0 : index
    %196 = vector.load %arg9[%c0_216, %c0_217, %c0_218] : memref<5x2x80xf32, #tpu.memory_space<vmem>>, vector<1x2x80xf32>
    %197 = vector.shape_cast %196 : vector<1x2x80xf32> to vector<2x80xf32>
    %198 = arith.truncf %197 : vector<2x80xf32> to vector<2x80xbf16>
    %cst_219 = arith.constant dense<0.000000e+00> : vector<2x120xf32>
    %199 = tpu.matmul %198, %195, %cst_219 {dimension_numbers = #tpu.dot_dimension_numbers<[1], [0], [0], [1], [0, 0, 1, 1], [], []>} : vector<2x80xbf16>, vector<80x120xbf16>, vector<2x120xf32> -> vector<2x120xf32>
    %200 = vector.broadcast %194 : vector<1x120xf32> to vector<2x120xf32>
    %201 = arith.addf %200, %199 : vector<2x120xf32>
    %c1368 = arith.constant 1368 : index
    %c0_220 = arith.constant 0 : index
    %202 = vector.load %arg2[%c1368, %c0_220] : memref<1896x168xbf16, #tpu.memory_space<vmem>>, vector<80x120xbf16>
    %c1_221 = arith.constant 1 : index
    %c0_222 = arith.constant 0 : index
    %c0_223 = arith.constant 0 : index
    %203 = vector.load %arg9[%c1_221, %c0_222, %c0_223] : memref<5x2x80xf32, #tpu.memory_space<vmem>>, vector<1x2x80xf32>
    %204 = vector.shape_cast %203 : vector<1x2x80xf32> to vector<2x80xf32>
    %205 = arith.truncf %204 : vector<2x80xf32> to vector<2x80xbf16>
    %cst_224 = arith.constant dense<0.000000e+00> : vector<2x120xf32>
    %206 = tpu.matmul %205, %202, %cst_224 {dimension_numbers = #tpu.dot_dimension_numbers<[1], [0], [0], [1], [0, 0, 1, 1], [], []>} : vector<2x80xbf16>, vector<80x120xbf16>, vector<2x120xf32> -> vector<2x120xf32>
    %207 = arith.addf %201, %206 : vector<2x120xf32>
    %c1448 = arith.constant 1448 : index
    %c0_225 = arith.constant 0 : index
    %208 = vector.load %arg2[%c1448, %c0_225] : memref<1896x168xbf16, #tpu.memory_space<vmem>>, vector<80x120xbf16>
    %c2_226 = arith.constant 2 : index
    %c0_227 = arith.constant 0 : index
    %c0_228 = arith.constant 0 : index
    %209 = vector.load %arg9[%c2_226, %c0_227, %c0_228] : memref<5x2x80xf32, #tpu.memory_space<vmem>>, vector<1x2x80xf32>
    %210 = vector.shape_cast %209 : vector<1x2x80xf32> to vector<2x80xf32>
    %211 = arith.truncf %210 : vector<2x80xf32> to vector<2x80xbf16>
    %cst_229 = arith.constant dense<0.000000e+00> : vector<2x120xf32>
    %212 = tpu.matmul %211, %208, %cst_229 {dimension_numbers = #tpu.dot_dimension_numbers<[1], [0], [0], [1], [0, 0, 1, 1], [], []>} : vector<2x80xbf16>, vector<80x120xbf16>, vector<2x120xf32> -> vector<2x120xf32>
    %213 = arith.addf %207, %212 : vector<2x120xf32>
    %c1528 = arith.constant 1528 : index
    %c0_230 = arith.constant 0 : index
    %214 = vector.load %arg2[%c1528, %c0_230] : memref<1896x168xbf16, #tpu.memory_space<vmem>>, vector<80x120xbf16>
    %c3_231 = arith.constant 3 : index
    %c0_232 = arith.constant 0 : index
    %c0_233 = arith.constant 0 : index
    %215 = vector.load %arg9[%c3_231, %c0_232, %c0_233] : memref<5x2x80xf32, #tpu.memory_space<vmem>>, vector<1x2x80xf32>
    %216 = vector.shape_cast %215 : vector<1x2x80xf32> to vector<2x80xf32>
    %217 = arith.truncf %216 : vector<2x80xf32> to vector<2x80xbf16>
    %cst_234 = arith.constant dense<0.000000e+00> : vector<2x120xf32>
    %218 = tpu.matmul %217, %214, %cst_234 {dimension_numbers = #tpu.dot_dimension_numbers<[1], [0], [0], [1], [0, 0, 1, 1], [], []>} : vector<2x80xbf16>, vector<80x120xbf16>, vector<2x120xf32> -> vector<2x120xf32>
    %219 = arith.addf %213, %218 : vector<2x120xf32>
    %c1608 = arith.constant 1608 : index
    %c0_235 = arith.constant 0 : index
    %220 = vector.load %arg2[%c1608, %c0_235] : memref<1896x168xbf16, #tpu.memory_space<vmem>>, vector<80x120xbf16>
    %c4_236 = arith.constant 4 : index
    %c0_237 = arith.constant 0 : index
    %c0_238 = arith.constant 0 : index
    %221 = vector.load %arg9[%c4_236, %c0_237, %c0_238] : memref<5x2x80xf32, #tpu.memory_space<vmem>>, vector<1x2x80xf32>
    %222 = vector.shape_cast %221 : vector<1x2x80xf32> to vector<2x80xf32>
    %223 = arith.truncf %222 : vector<2x80xf32> to vector<2x80xbf16>
    %cst_239 = arith.constant dense<0.000000e+00> : vector<2x120xf32>
    %224 = tpu.matmul %223, %220, %cst_239 {dimension_numbers = #tpu.dot_dimension_numbers<[1], [0], [0], [1], [0, 0, 1, 1], [], []>} : vector<2x80xbf16>, vector<80x120xbf16>, vector<2x120xf32> -> vector<2x120xf32>
    %225 = arith.addf %219, %224 : vector<2x120xf32>
    %cst_240 = arith.constant 0.000000e+00 : f32
    %226 = vector.broadcast %cst_240 : f32 to vector<2x120xf32>
    %227 = arith.maximumf %225, %226 : vector<2x120xf32>
    %228 = arith.truncf %227 : vector<2x120xf32> to vector<2x120xbf16>
    %c1688 = arith.constant 1688 : index
    %c0_241 = arith.constant 0 : index
    %229 = vector.load %arg2[%c1688, %c0_241] : memref<1896x168xbf16, #tpu.memory_space<vmem>>, vector<120x84xbf16>
    %cst_242 = arith.constant dense<0.000000e+00> : vector<2x84xf32>
    %230 = tpu.matmul %228, %229, %cst_242 {dimension_numbers = #tpu.dot_dimension_numbers<[1], [0], [0], [1], [0, 0, 1, 1], [], []>} : vector<2x120xbf16>, vector<120x84xbf16>, vector<2x84xf32> -> vector<2x84xf32>
    %c24 = arith.constant 24 : index
    %c0_243 = arith.constant 0 : index
    %231 = vector.load %arg3[%c24, %c0_243] : memref<40x168xf32, #tpu.memory_space<vmem>>, vector<1x84xf32>
    %232 = vector.broadcast %231 : vector<1x84xf32> to vector<2x84xf32>
    %233 = arith.addf %230, %232 : vector<2x84xf32>
    %cst_244 = arith.constant 0.000000e+00 : f32
    %234 = vector.broadcast %cst_244 : f32 to vector<2x84xf32>
    %235 = arith.maximumf %233, %234 : vector<2x84xf32>
    %236 = arith.truncf %235 : vector<2x84xf32> to vector<2x84xbf16>
    %c1808 = arith.constant 1808 : index
    %c0_245 = arith.constant 0 : index
    %237 = vector.load %arg2[%c1808, %c0_245] : memref<1896x168xbf16, #tpu.memory_space<vmem>>, vector<84x10xbf16>
    %cst_246 = arith.constant dense<0.000000e+00> : vector<2x10xf32>
    %238 = tpu.matmul %236, %237, %cst_246 {dimension_numbers = #tpu.dot_dimension_numbers<[1], [0], [0], [1], [0, 0, 1, 1], [], []>} : vector<2x84xbf16>, vector<84x10xbf16>, vector<2x10xf32> -> vector<2x10xf32>
    %c32_247 = arith.constant 32 : index
    %c0_248 = arith.constant 0 : index
    %239 = vector.load %arg3[%c32_247, %c0_248] : memref<40x168xf32, #tpu.memory_space<vmem>>, vector<1x10xf32>
    %240 = vector.broadcast %239 : vector<1x10xf32> to vector<2x10xf32>
    %241 = arith.addf %238, %240 : vector<2x10xf32>
    %cst_249 = arith.constant 0.000000e+00 : f32
    %242 = vector.broadcast %cst_249 : f32 to vector<2x10xf32>
    %243 = arith.maximumf %241, %242 : vector<2x10xf32>
    %c0_250 = arith.constant 0 : index
    %c0_251 = arith.constant 0 : index
    %244 = vector.load %arg4[%c0_250, %c0_251] : memref<2x10xf32, #tpu.memory_space<vmem>>, vector<2x10xf32>
    tpu.vector_store %arg4[%c0_250, %c0_251], %243 {strides = array<i32>} : memref<2x10xf32, #tpu.memory_space<vmem>>, vector<2x10xf32>,
    return
  }
  func.func @transform_0(%arg0: i32) -> (i32, i32, i32, i32) {
    %c0_i32 = arith.constant 0 : i32
    %c0_i32_0 = arith.constant 0 : i32
    %c0_i32_1 = arith.constant 0 : i32
    %c0_i32_2 = arith.constant 0 : i32
    return %arg0, %c0_i32, %c0_i32_0, %c0_i32_1 : i32, i32, i32, i32
  }
  func.func @transform_1(%arg0: i32) -> (i32, i32) {
    %c0_i32 = arith.constant 0 : i32
    %c0_i32_0 = arith.constant 0 : i32
    %c0_i32_1 = arith.constant 0 : i32
    return %c0_i32, %c0_i32_0 : i32, i32
  }
  func.func @transform_2(%arg0: i32) -> (i32, i32) {
    %c0_i32 = arith.constant 0 : i32
    %c0_i32_0 = arith.constant 0 : i32
    %c0_i32_1 = arith.constant 0 : i32
    return %c0_i32, %c0_i32_0 : i32, i32
  }
  func.func @transform_3(%arg0: i32) -> (i32, i32) {
    %c0_i32 = arith.constant 0 : i32
    %c0_i32_0 = arith.constant 0 : i32
    return %arg0, %c0_i32 : i32, i32
  }
}

</mosaic_0001>

<bundles_post_ra>
// kernel: lenet_forward.1
= control target key start
LH: loop header
LB: loop body
LE: loop exit
PB: predicated region body
PF: predicated region fallthrough
CT: control target
= control target key end

     0   :  { %s5118_s20 = smov 64   ;;  %s5119_s21 = smov 32   ;;  %vm36_vm0 = vcmask 257024   ;;  %vm40_vm1 = vcmask 254976   ;;  %v5121_v53 = vmov 0   ;;  %vm70_vm2 = vcmask 519424   ;;  %s6526_s0 = inlined_call_operand.vmem [shape: f32[2,1,32,32], index: 0, kind: input, shape index: {}]   ;;  %s6527_s1 = inlined_call_operand.vmem [shape: bf16[1896,168], index: 1, kind: input, shape index: {}]   ;;  %s6528_s2 = inlined_call_operand.vmem [shape: f32[40,168], index: 2, kind: input, shape index: {}]   ;;  %s6529_s3 = inlined_call_operand.hbm [shape: f32[2,10], index: 3, kind: output, shape index: {}]  }
   0x1   :  { %v76_v0 = vld [vmem:[%s6526_s0 + $0x2] sm:$0xff]  ;;  %v77_v2 = vld [vmem:[%s6526_s0 + $0xa] sm:$0xff]  ;;  %v4737_v10 = vld [vmem:[%s6527_s1 + $0x74] ss:$8 sps:$4 sm:$0xff]   ;;  %s5120_s13 = smov 96   ;;  %489 = vmatprep.subr.bf16.mxu1 %v5121_v53  ;;  %vm6543_vm3 = vcmask 781824  }
   0x2   :  { %v42_v1 = vld [vmem:[%s6526_s0 + $0x1] sm:$0xff]  ;;  %v4446_v3 = vpack.c.bf16 %v76_v0, %v76_v0  ;;  %v43_v5 = vld [vmem:[%s6526_s0 + $0x9] sm:$0xff]  ;;  %v4447_v6 = vpack.c.bf16 %v77_v2, %v77_v2  ;;  %v45_v15 = vld [vmem:[%s6526_s0 + $0x19] sm:$0xf]  ;;  %329 = vmatprep.subr.bf16.mxu0 %v4737_v10  ;;  %vm6542_vm4 = vcmask 1044224   ;;  %vm6541_vm5 = vcmask 517376  }
   0x3   :  { %v4442_v4 = vpack.c.bf16 %v42_v1, %v42_v1  ;;  %v4443_v7 = vpack.c.bf16 %v43_v5, %v43_v5  ;;  %v111_v8 = vld [vmem:[%s6526_s0 + $0xb] sm:$0xff]  ;;  %v110_v9 = vld [vmem:[%s6526_s0 + $0x3] sm:$0xff]  ;;  %v4743_v18 = vld [vmem:[%s6527_s1 + $0x54] ss:$8 sps:$4 sm:$0xff]   ;;  %v4445_v19 = vpack.c.bf16 %v45_v15, %v45_v15  ;;  %vm6539_vm6 = vcmask 779776  }
   0x4   :  { %92 = vrot.lane.b32.xlu1 %v4446_v3, %s5118_s20  ;;  %v4739_v11 = vld [vmem:[%s6527_s1 + $0x70] ss:$8 sps:$4 sm:$0xff]   ;;  %v4740_v12 = vld [vmem:[%s6527_s1 + $0x64] ss:$8 sps:$4 sm:$0xff]   ;;  %v4451_v13 = vpack.c.bf16 %v111_v8, %v111_v8  ;;  %v4450_v14 = vpack.c.bf16 %v110_v9, %v110_v9  ;;  %v4742_v17 = vld [vmem:[%s6527_s1 + $0x60] ss:$8 sps:$4 sm:$0xff]  }
   0x5   :  { %58 = vrot.lane.b32.xlu0 %v4442_v4, %s5119_s21  ;;  %v44_v16 = vld [vmem:[%s6526_s0 + $0x11] sm:$0xff]  ;;  %330 = vmatpush1.bf16.msra.mxu0 %v4739_v11  ;;  %v79_v21 = vld [vmem:[%s6526_s0 + $0x1a] sm:$0xf]  ;;  %v16_v23 = vld [vmem:[%s6526_s0] sm:$0xff]  ;;  %vm322_vm7 = vcmask 261120   ;;  %vm6538_vm8 = vcmask 1042176  }
   0x6   :  { %331 = vmatprep.subr.bf16.mxu0 %v4740_v12  ;;  %v4444_v20 = vpack.c.bf16 %v44_v16, %v44_v16  ;;  %v78_v22 = vld [vmem:[%s6526_s0 + $0x12] sm:$0xff]  ;;  %v4438_v25 = vpack.c.bf16 %v16_v23, %v16_v23  ;;  %v4746_v26 = vld [vmem:[%s6527_s1 + $0x44] ss:$8 sps:$4 sm:$0xff]   ;;  %v4449_v28 = vpack.c.bf16 %v79_v21, %v79_v21  ;;  %v113_v32 = vld [vmem:[%s6526_s0 + $0x1b] sm:$0xf] }
   0x7   :  { %v4745_v24 = vld [vmem:[%s6527_s1 + $0x50] ss:$8 sps:$4 sm:$0xff]   ;;  %v17_v27 = vld [vmem:[%s6526_s0 + $0x8] sm:$0xff]  ;;  %v4448_v29 = vpack.c.bf16 %v78_v22, %v78_v22  ;;  %v4749_v38 = vld [vmem:[%s6527_s1 + $0x34] ss:$8 sps:$4 sm:$0xff]   ;;  %v4453_v40 = vpack.c.bf16 %v113_v32, %v113_v32 }
   0x8   :  { %94 = vrot.lane.b32.xlu1 %v4447_v6, %s5118_s20  ;;  %37 = vst.msk [vmem:[#allocation2] sm:$0xf] %vm36_vm0, %v4438_v25  ;;  %v4439_v30 = vpack.c.bf16 %v17_v27, %v17_v27  ;;  %v145_v31 = vld [vmem:[%s6526_s0 + $0xc] sm:$0xff]  ;;  %v144_v35 = vld [vmem:[%s6526_s0 + $0x4] sm:$0xff]  ;;  %v147_v39 = vld [vmem:[%s6526_s0 + $0x1c] sm:$0xf] }
   0x9   :  { %60 = vrot.lane.b32.xlu0 %v4443_v7, %s5119_s21  ;;  %332 = vmatpush1.bf16.msra.mxu0 %v4742_v17  ;;  %v112_v33 = vld [vmem:[%s6526_s0 + $0x13] sm:$0xff]  ;;  %v4455_v34 = vpack.c.bf16 %v145_v31, %v145_v31  ;;  %v4748_v36 = vld [vmem:[%s6527_s1 + $0x40] ss:$8 sps:$4 sm:$0xff]   ;;  %v4454_v37 = vpack.c.bf16 %v144_v35, %v144_v35  ;;  %v4457_v42 = vpack.c.bf16 %v147_v39, %v147_v39  ;;  %v4752_v51 = vld [vmem:[%s6527_s1 + $0x24] ss:$8 sps:$4 sm:$0xff]  }
   0xa   :  { %333 = vmatprep.subr.bf16.mxu0 %v4743_v18  ;;  %38 = vst.msk [vmem:[#allocation2 + $0x8] sm:$0xf] %vm36_vm0, %v4439_v30  ;;  %v4452_v41 = vpack.c.bf16 %v112_v33, %v112_v33  ;;  %v19_v43 = vld [vmem:[%s6526_s0 + $0x18] sm:$0xf]  ;;  %v18_v44 = vld [vmem:[%s6526_s0 + $0x10] sm:$0xff]  ;;  %v176_v48 = vld [vmem:[%s6527_s1 + $0x20] sm:$0xff] }
   0xb   :  { %165 = vst.msk [vmem:[#allocation2 + $0xc] sm:$0xf] %vm36_vm0, %v4455_v34  ;;  %164 = vst.msk [vmem:[#allocation2 + $0x4] sm:$0xf] %vm36_vm0, %v4454_v37  ;;  %v4441_v45 = vpack.c.bf16 %v19_v43, %v19_v43  ;;  %v4440_v46 = vpack.c.bf16 %v18_v44, %v18_v44  ;;  %v4751_v47 = vld [vmem:[%s6527_s1 + $0x30] ss:$8 sps:$4 sm:$0xff]  }
   0xc   :  { %128 = vrot.lane.b32.xlu1 %v4451_v13, %s5120_s13  ;;  %167 = vst.msk [vmem:[#allocation2 + $0x1c] sm:$0x3] %vm40_vm1, %v4457_v42  ;;  %v146_v49 = vld [vmem:[%s6526_s0 + $0x14] sm:$0xff]  ;;  %v177_v50 = vld [vmem:[%s6527_s1 + $0x28] sm:$0xff]  ;;  %v172_v60 = vld [vmem:[%s6527_s1] sm:$0xff] }
   0xd   :  { %126 = vrot.lane.b32.xlu0 %v4450_v14, %s5120_s13  ;;  %334 = vmatpush1.bf16.msra.mxu0 %v4745_v24  ;;  %41 = vst.msk [vmem:[#allocation2 + $0x18] sm:$0x3] %vm40_vm1, %v4441_v45  ;;  %v4456_v52 = vpack.c.bf16 %v146_v49, %v146_v49  ;;  %v4762_v54 = vld [vmem:[%s6527_s1 + $0x2b8] ss:$8 sps:$4 sm:$0xff]   ;;  %v174_v55 = vld [vmem:[%s6527_s1 + $0x10] sm:$0xff]  ;;  %v4058_v57 = vcombine.low %v176_v48, %v177_v50  ;;  %v173_v61 = vld [vmem:[%s6527_s1 + $0x8] sm:$0xff] }
   0xe   :  { %335 = vmatprep.subr.bf16.mxu0 %v4746_v26  ;;  %39 = vst.msk [vmem:[#allocation2 + $0x10] sm:$0xf] %vm36_vm0, %v4440_v46  ;;  %v175_v56 = vld [vmem:[%s6527_s1 + $0x18] sm:$0xff]  ;;  %490 = vmatpush1.bf16.msra.mxu1 %v4762_v54  ;;  %v4764_v58 = vld [vmem:[%s6527_s1 + $0x2a8] ss:$8 sps:$4 sm:$0xff]   ;;  %v4054_v3 = vcombine.low %v172_v60, %v173_v61  ;;  %v188_v6 = vld [vmem:[%s6527_s1 + $0x80] sm:$0xff] }
   0xf   :  { %166 = vst.msk [vmem:[#allocation2 + $0x14] sm:$0xf] %vm36_vm0, %v4456_v52  ;;  %v4754_v59 = vld [vmem:[%s6527_s1 + $0x14] ss:$8 sps:$4 sm:$0xff]   ;;  %491 = vmatprep.subr.bf16.mxu1 %v5121_v53  ;;  %v4056_v62 = vcombine.low %v174_v55, %v175_v56  ;;  %v4766_v63 = vld [vmem:[%s6527_s1 + $0x298] ss:$8 sps:$4 sm:$0xff]  }
  0x10   :  { %64 = vrot.lane.b32.xlu1 %v4445_v19, %s5119_s21  ;;  %v4756_v0 = vld [vmem:[%s6527_s1 + $0x4] ss:$8 sps:$4 sm:$0xff]   ;;  %v190_v1 = vld [vmem:[%s6527_s1 + $0x90] sm:$0xff]  ;;  %v191_v2 = vld [vmem:[%s6527_s1 + $0x98] sm:$0xff] }
  0x11   :  { %62 = vrot.lane.b32.xlu0 %v4444_v20, %s5119_s21  ;;  %336 = vmatpush1.bf16.msra.mxu0 %v4748_v36  ;;  %v4768_v4 = vld [vmem:[%s6527_s1 + $0x288] ss:$8 sps:$4 sm:$0xff]   ;;  %v4758_v5 = vld [vmem:[%s6527_s1 + $0x94] ss:$8 sps:$4 sm:$0xff]   ;;  %v4072_v8 = vcombine.low %v190_v1, %v191_v2  ;;  %v4770_v9 = vld [vmem:[%s6527_s1 + $0x278] ss:$8 sps:$4 sm:$0xff]  }
  0x12   :  { %337 = vmatprep.subr.bf16.mxu0 %v4749_v38  ;;  %492 = vmatpush1.bf16.msra.mxu1 %v4764_v58  ;;  %v189_v7 = vld [vmem:[%s6527_s1 + $0x88] sm:$0xff]  ;;  %v4774_v13 = vld [vmem:[%s6527_s1 + $0x258] ss:$8 sps:$4 sm:$0xff]   ;;  %v4203_v42 = vld [vmem:[%s6526_s0 + $0x30] sm:$0xff] }
  0x13   :  { %493 = vmatprep.subr.bf16.mxu1 %v5121_v53  ;;  %v4760_v10 = vld [vmem:[%s6527_s1 + $0x84] ss:$8 sps:$4 sm:$0xff]   ;;  %v4772_v11 = vld [vmem:[%s6527_s1 + $0x268] ss:$8 sps:$4 sm:$0xff]   ;;  %v4070_v12 = vcombine.low %v188_v6, %v189_v7  ;;  %v4204_v39 = vld [vmem:[%s6526_s0 + $0x38] sm:$0xf]  ;;  %v4470_v48 = vpack.c.bf16 %v4203_v42, %v4203_v42 }
  0x14   :  { %98 = vrot.lane.b32.xlu1 %v4449_v28, %s5118_s20  ;;  %v4776_v14 = vld [vmem:[%s6527_s1 + $0x248] ss:$8 sps:$4 sm:$0xff]   ;;  %v4201_v22 = vld [vmem:[%s6526_s0 + $0x20] sm:$0xff]  ;;  %v4235_v43 = vld [vmem:[%s6526_s0 + $0x34] sm:$0xff]  ;;  %v4471_v46 = vpack.c.bf16 %v4204_v39, %v4204_v39 }
  0x15   :  { %96 = vrot.lane.b32.xlu0 %v4448_v29, %s5118_s20  ;;  %338 = vmatpush1.bf16.msra.mxu0 %v4751_v47  ;;  %v4202_v19 = vld [vmem:[%s6526_s0 + $0x28] sm:$0xff]  ;;  %v4468_v29 = vpack.c.bf16 %v4201_v22, %v4201_v22  ;;  %v4765_v38 = vld [vmem:[%s6527_s1 + $0x350] ss:$8 sps:$4 sm:$0xff]   ;;  %v4486_v49 = vpack.c.bf16 %v4235_v43, %v4235_v43 }
  0x16   :  { %339 = vmatprep.subr.bf16.mxu0 %v4752_v51  ;;  %494 = vmatpush1.bf16.msra.mxu1 %v4766_v63  ;;  %v4234_v20 = vld [vmem:[%s6526_s0 + $0x2c] sm:$0xff]  ;;  %v4233_v23 = vld [vmem:[%s6526_s0 + $0x24] sm:$0xff]  ;;  %v4469_v27 = vpack.c.bf16 %v4202_v19, %v4202_v19 }
  0x17   :  { %495 = vmatprep.subr.bf16.mxu1 %v5121_v53  ;;  %v4485_v28 = vpack.c.bf16 %v4234_v20, %v4234_v20  ;;  %v4484_v30 = vpack.c.bf16 %v4233_v23, %v4233_v23  ;;  %v4763_v31 = vld [vmem:[%s6527_s1 + $0x360] ss:$8 sps:$4 sm:$0xff]   ;;  %v4769_v50 = vld [vmem:[%s6527_s1 + $0x330] ss:$8 sps:$4 sm:$0xff]  }
  0x18   :  { %132 = vrot.lane.b32.xlu1 %v4453_v40, %s5120_s13  ;;  %v4236_v40 = vld [vmem:[%s6526_s0 + $0x3c] sm:$0xf]  ;;  %v4767_v45 = vld [vmem:[%s6527_s1 + $0x340] ss:$8 sps:$4 sm:$0xff]  }
  0x19   :  { %130 = vrot.lane.b32.xlu0 %v4452_v41, %s5120_s13  ;;  %340 = vmatpush1.bf16.msra.mxu0 %v4058_v57  ;;  %v4487_v47 = vpack.c.bf16 %v4236_v40, %v4236_v40  ;;  %v4771_v56 = vld [vmem:[%s6527_s1 + $0x320] ss:$8 sps:$4 sm:$0xff]   ;;  %v4773_v57 = vld [vmem:[%s6527_s1 + $0x310] ss:$8 sps:$4 sm:$0xff]  }
  0x1a   :  { %341 = vmatprep.subr.bf16.mxu0 %v4754_v59  ;;  %496 = vmatpush1.bf16.msra.mxu1 %v4768_v4 }
  0x1b   :  { %497 = vmatprep.subr.bf16.mxu1 %v5121_v53 }
  0x1d   :  { %342 = vmatpush1.bf16.msra.mxu0 %v4056_v62 }
  0x1e   :  { %343 = vmatprep.subr.bf16.mxu0 %v4756_v0  ;;  %498 = vmatpush1.bf16.msra.mxu1 %v4770_v9 }
  0x1f   :  { %499 = vmatprep.subr.bf16.mxu1 %v5121_v53 }
  0x21   :  { %344 = vmatpush1.bf16.msra.mxu0 %v4054_v3 }
  0x22   :  { %357 = vmatprep.subr.bf16.mxu0 %v4758_v5  ;;  %500 = vmatpush1.bf16.msra.mxu1 %v4772_v11 }
  0x23   :  { %501 = vmatprep.subr.bf16.mxu1 %v5121_v53 }
  0x25   :  { %358 = vmatpush2.bf16.msra.mxu0 %v4072_v8 }
  0x26   :  { %359 = vmatprep.subr.bf16.mxu0 %v4760_v10  ;;  %502 = vmatpush1.bf16.msra.mxu1 %v4774_v13 }
  0x27   :  { %503 = vmatprep.subr.bf16.mxu1 %v5121_v53 }
  0x29   :  { %360 = vmatpush2.bf16.msra.mxu0 %v4070_v12 }
  0x2a   :  { %625 = vmatprep.subr.bf16.mxu0 %v5121_v53  ;;  %504 = vmatpush1.bf16.msra.mxu1 %v4776_v14 }
  0x2b   :  { %515 = vmatprep.subr.bf16.mxu1 %v5121_v53 }
  0x76   :  { %v93_v15 = vpop.permute.xlu1 %92 }
  0x77   :  { %v59_v16 = vpop.permute.xlu0 %58 }
  0x78   :  { %71 = vst.msk [vmem:[#allocation2] sm:$0xf] %vm70_vm2, %v59_v16 }
  0x79   :  { %105 = vst.msk [vmem:[#allocation2] sm:$0xf] %vm6543_vm3, %v93_v15 }
  0x7a   :  { %v95_v17 = vpop.permute.xlu1 %94 }
  0x7b   :  { %v61_v18 = vpop.permute.xlu0 %60 }
  0x7c   :  { %72 = vst.msk [vmem:[#allocation2 + $0x8] sm:$0xf] %vm70_vm2, %v61_v18 }
  0x7d   :  { %106 = vst.msk [vmem:[#allocation2 + $0x8] sm:$0xf] %vm6543_vm3, %v95_v17 }
  0x7e   :  { %v129_v21 = vpop.permute.xlu1 %128 }
  0x7f   :  { %v127_v24 = vpop.permute.xlu0 %126  ;;  %140 = vst.msk [vmem:[#allocation2 + $0x8] sm:$0xf] %vm6542_vm4, %v129_v21 }
  0x80   :  { %139 = vst.msk [vmem:[#allocation2] sm:$0xf] %vm6542_vm4, %v127_v24 }
  0x82   :  { %v65_v25 = vpop.permute.xlu1 %64 }
  0x83   :  { %v63_v26 = vpop.permute.xlu0 %62  ;;  %75 = vst.msk [vmem:[#allocation2 + $0x18] sm:$0x3] %vm6541_vm5, %v65_v25 }
  0x84   :  { %73 = vst.msk [vmem:[#allocation2 + $0x10] sm:$0xf] %vm70_vm2, %v63_v26 }
  0x86   :  { %v169_v32 = vld [vmem:[#allocation2 + $0x8] sm:$0xff]  ;;  %v99_v34 = vpop.permute.xlu1 %98 }
  0x87   :  { %v168_v33 = vld [vmem:[#allocation2] sm:$0xff]  ;;  %v97_v35 = vpop.permute.xlu0 %96  ;;  %1744 = vst.msk [vmem:[#allocation2 + $0x8] sm:$0xf] %vm36_vm0, %v4469_v27  ;;  %1864 = vst.msk [vmem:[#allocation2 + $0xc] sm:$0xf] %vm36_vm0, %v4485_v28 }
  0x88   :  { %1743 = vst.msk [vmem:[#allocation2] sm:$0xf] %vm36_vm0, %v4468_v29  ;;  %1863 = vst.msk [vmem:[#allocation2 + $0x4] sm:$0xf] %vm36_vm0, %v4484_v30  ;;  %v4051_v36 = vcombine.high %v168_v33, %v169_v32  ;;  %v4050_v37 = vcombine.low %v168_v33, %v169_v32 }
  0x89   :  { %109 = vst.msk [vmem:[#allocation2 + $0x18] sm:$0x3] %vm6539_vm6, %v99_v34 }
  0x8a   :  { %107 = vst.msk [vmem:[#allocation2 + $0x10] sm:$0xf] %vm6543_vm3, %v97_v35  ;;  %4074 = vmatprep.mubr.msk.bf16.mxu0 %vm322_vm7, %v4051_v36  ;;  %v133_v41 = vpop.permute.xlu1 %132 }
  0x8b   :  { %v131_v44 = vpop.permute.xlu0 %130  ;;  %362 = vmatmul.mubr.bf16.vlgmr.msra.gmra.mxu0 %v4050_v37  ;;  %143 = vst.msk [vmem:[#allocation2 + $0x18] sm:$0x3] %vm6538_vm8, %v133_v41 }
  0x8c   :  { %141 = vst.msk [vmem:[#allocation2 + $0x10] sm:$0xf] %vm6542_vm4, %v131_v44  ;;  %626 = vmatpush1.bf16.msra.mxu0 %v4763_v31 }
  0x8d   :  { %627 = vmatprep.subr.bf16.mxu0 %v5121_v53 }
  0x90   :  { %628 = vmatpush1.bf16.msra.mxu0 %v4765_v38 }
  0x91   :  { %629 = vmatprep.subr.bf16.mxu0 %v5121_v53 }
  0x92   :  { %v171_v51 = vld [vmem:[#allocation2 + $0x18] sm:$0x33] }
  0x93   :  { %v170_v52 = vld [vmem:[#allocation2 + $0x10] sm:$0xff]  ;;  %1746 = vst.msk [vmem:[#allocation2 + $0x18] sm:$0x3] %vm40_vm1, %v4471_v46  ;;  %1866 = vst.msk [vmem:[#allocation2 + $0x1c] sm:$0x3] %vm40_vm1, %v4487_v47 }
  0x94   :  { %1745 = vst.msk [vmem:[#allocation2 + $0x10] sm:$0xf] %vm36_vm0, %v4470_v48  ;;  %1865 = vst.msk [vmem:[#allocation2 + $0x14] sm:$0xf] %vm36_vm0, %v4486_v49  ;;  %v4053_v54 = vcombine.high %v170_v52, %v171_v51  ;;  %v4052_v55 = vcombine.low %v170_v52, %v171_v51  ;;  %630 = vmatpush1.bf16.msra.mxu0 %v4767_v45 }
  0x95   :  { %631 = vmatprep.subr.bf16.mxu0 %v5121_v53 }
  0x96   :  { %4075 = vmatprep.mubr.msk.bf16.mxu0 %vm322_vm7, %v4053_v54 }
  0x97   :  { %372 = vmatmul.mubr.bf16.gmra.mxu0 %v4052_v55 }
  0x98   :  { %632 = vmatpush1.bf16.msra.mxu0 %v4769_v50 }
  0x99   :  { %633 = vmatprep.subr.bf16.mxu0 %v5121_v53 }
  0x9c   :  { %634 = vmatpush1.bf16.msra.mxu0 %v4771_v56 }
  0x9d   :  { %8 = vsyncpa [#allocation8], 0  ;;  %635 = vmatprep.subr.bf16.mxu0 %v5121_v53  ;;  %v4775_v58 = vld [vmem:[%s6527_s1 + $0x300] ss:$8 sps:$4 sm:$0xff]   ;;  %v4777_v59 = vld [vmem:[%s6527_s1 + $0x2f0] ss:$8 sps:$4 sm:$0xff]   ;;  %v194_v4 = vlaneseq }
  0x9e   :  { %v4778_v60 = vld [vmem:[%s6527_s1 + $0x2e8] ss:$0 sps:$4 sm:$0xff]   ;;  %v4779_v61 = vld [vmem:[%s6527_s1 + $0x390] ss:$0 sps:$4 sm:$0xff]   ;;  %vm6537_vm9 = vcmask 1043456   ;;  %vm6536_vm10 = vcmask 326656  }
  0x9f   :  { %v487_v62 = vsel %vm6537_vm9, %v4778_v60, 0  ;;  %v623_v63 = vsel %vm6537_vm9, %v4779_v61, 0  ;;  %v4780_v0 = vld [vmem:[%s6527_s1 + $0x2d8] ss:$8 sps:$4 sm:$0xff]   ;;  %v4782_v2 = vld [vmem:[%s6527_s1 + $0x2c8] ss:$8 sps:$4 sm:$0xff]  }
  0xa0   :  { %636 = vmatpush1.bf16.msra.mxu0 %v4773_v57  ;;  %516 = vmatpush2.bf16.msra.mxu1 %v487_v62  ;;  %v4781_v1 = vld [vmem:[%s6527_s1 + $0x380] ss:$8 sps:$4 sm:$0xff]   ;;  %v4783_v3 = vld [vmem:[%s6527_s1 + $0x370] ss:$8 sps:$4 sm:$0xff]   ;;  %v195_v5 = vshrl.u32 %v194_v4, 7  ;;  %v5122_v39 = vmov 0.0  }
  0xa1   :  { %637 = vmatprep.subr.bf16.mxu0 %v5121_v53  ;;  %517 = vmatprep.subr.bf16.mxu1 %v5121_v53  ;;  %v192_v8 = vld [vmem:[%s6528_s2] ss:$8 sm:$0x3]  ;;  %vm5123_vm11 = vmmov 0   ;;  %vm6535_vm12 = vcmask 1045504   ;;  %vm6534_vm13 = vcmask 228352  }
  0xa2   :  { %v5440_v6 = vsub.s32 1, %v195_v5  ;;  %v5442_v7 = vsub.s32 0, %v195_v5  ;;  %v4791_v4 = vld [vmem:[%s6527_s1 + $0x104] ss:$8 sps:$4 sm:$0xff]   ;;  %v4789_v5 = vld [vmem:[%s6527_s1 + $0x100] ss:$8 sps:$4 sm:$0xff]  }
  0xa3   :  { %vm6540_vm14 = vcmask 687104   ;;  %vm6533_vm15 = vcmask 685056   ;;  %vm6530_vm0 = vcmask 683008   ;;  %vm6532_vm1 = vcmask 679936   ;;  %s5124_s14 = smov 84   ;;  %s5125_s27 = smov 124  }
  0xa4   :  { %638 = vmatpush1.bf16.msra.mxu0 %v4775_v58  ;;  %518 = vmatpush2.bf16.msra.mxu1 %v4780_v0  ;;  %v201_v10 = vrot.slane %v192_v8, %v5440_v6  ;;  %v197_v11 = vrot.slane %v192_v8, %v5442_v7  ;;  %v4784_v0 = vld [vmem:[%s6527_s1 + $0x398] ss:$8 sps:$4 sm:$0x7f]   ;;  %v4794_v8 = vld [vmem:[%s6527_s1 + $0xf4] ss:$8 sps:$4 sm:$0xff]   ;;  %s5126_s7 = smov 40  }
  0xa5   :  { %639 = vmatprep.subr.bf16.mxu0 %v5121_v53  ;;  %519 = vmatprep.subr.bf16.mxu1 %v5121_v53  ;;  %s5127_s12 = smov 80   ;;  %vm875_vm9 = vcmask 1041376   ;;  %vm876_vm8 = vcmask 651268   ;;  %vm902_vm4 = vcmask 1041024  }
  0xa6   :  { %vm5659_vm6 = vmor %vm876_vm8, %vm875_vm9  ;;  %vm903_vm8 = vcmask 290820   ;;  %vm898_vm9 = vcmask 1044096  }
  0xa7   :  { %vm5675_vm3 = vmor %vm903_vm8, %vm902_vm4  ;;  %vm6545_vm4 = vcmask 293888   ;;  %vm6562_vm8 = vcmask 781824  }
  0xa8   :  { %640 = vmatpush1.bf16.msra.mxu0 %v4777_v59  ;;  %520 = vmatpush2.bf16.msra.mxu1 %v4782_v2  ;;  %v4786_v2 = vld [vmem:[%s6527_s1 + $0x110] ss:$8 sps:$4 sm:$0xff]  }
  0xa9   :  { %651 = vmatprep.subr.bf16.mxu0 %v5121_v53  ;;  %4564 = vmatprep.subr.bf16.mxu1 %v5122_v39 }
  0xac   :  { %652 = vmatpush2.bf16.msra.mxu0 %v623_v63 }
  0xad   :  { %653 = vmatprep.subr.bf16.mxu0 %v5121_v53 }
  0xb0   :  { %654 = vmatpush2.bf16.msra.mxu0 %v4781_v1  ;;  %v4785_v1 = vld [vmem:[%s6527_s1 + $0x3a8] ss:$8 sps:$4 sm:$0x7f]  }
  0xb1   :  { %655 = vmatprep.subr.bf16.mxu0 %v5121_v53 }
  0xb4   :  { %656 = vmatpush2.bf16.msra.mxu0 %v4783_v3  ;;  %v4788_v3 = vld [vmem:[%s6527_s1 + $0x114] ss:$8 sps:$4 sm:$0xff]  }
 0x14b   :  { %v363_v9 = vpop.f32.mrf.mxu0 }
 0x14c   :  { %v364_v16 = vadd.f32 %v363_v9, %v197_v11  ;;  %v4807_v9 = vld [vmem:[%s6527_s1 + $0x210] ss:$8 sps:$4 sm:$0xff]  }
 0x14d   :  { %v365_v12 = vpop.f32.mrf.mxu0 }
 0x14e   :  { %v366_v14 = vadd.f32 %v365_v12, %v201_v10  ;;  %v382_v22 = vmax.f32 %v364_v16, 0.0  ;;  %v4792_v12 = vld [vmem:[%s6527_s1 + $0xf0] ss:$8 sps:$4 sm:$0xff]   ;;  %v4795_v16 = vld [vmem:[%s6527_s1 + $0xe0] ss:$8 sps:$4 sm:$0xff]  }
 0x14f   :  { %v367_v13 = vpop.f32.mrf.mxu0 }
 0x150   :  { %v368_v15 = vadd.f32 %v367_v13, %v197_v11  ;;  %v383_v20 = vmax.f32 %v366_v14, 0.0  ;;  %v4797_v13 = vld [vmem:[%s6527_s1 + $0xe4] ss:$8 sps:$4 sm:$0xff]   ;;  %v4813_v14 = vld [vmem:[%s6527_s1 + $0x200] ss:$8 sps:$4 sm:$0xff]  }
 0x151   :  { %v369_v17 = vpop.f32.mrf.mxu0 }
 0x152   :  { %v370_v18 = vadd.f32 %v369_v17, %v201_v10  ;;  %v384_v19 = vmax.f32 %v368_v15, 0.0  ;;  %v4821_v15 = vld [vmem:[%s6527_s1 + $0x1f4] ss:$8 sps:$4 sm:$0xff]  }
 0x153   :  { %v4800_v17 = vld [vmem:[%s6527_s1 + $0xd4] ss:$8 sps:$4 sm:$0xff]  }
 0x154   :  { %v385_v21 = vmax.f32 %v370_v18, 0.0  ;;  %v390_v24 = vpack.c.bf16 %v384_v19, %v382_v22  ;;  %v4819_v18 = vld [vmem:[%s6527_s1 + $0x1f0] ss:$8 sps:$4 sm:$0xff]   ;;  %v4827_v19 = vld [vmem:[%s6527_s1 + $0x1e4] ss:$8 sps:$4 sm:$0xff]  }
 0x155   :  { %v4825_v22 = vld [vmem:[%s6527_s1 + $0x1e0] ss:$8 sps:$4 sm:$0xff]  }
 0x156   :  { %v391_v23 = vpack.c.bf16 %v385_v21, %v383_v20  ;;  %v4798_v20 = vld [vmem:[%s6527_s1 + $0xd0] ss:$8 sps:$4 sm:$0xff]   ;;  %v4803_v21 = vld [vmem:[%s6527_s1 + $0xc4] ss:$8 sps:$4 sm:$0xff]  }
 0x157   :  { %v373_v25 = vpop.f32.mrf.mxu0 }
 0x158   :  { %4087 = vmatprep.mubr.msk.bf16.mxu1 %vm6536_vm10, %v391_v23  ;;  %4100 = vmatprep.mubr.msk.bf16.mxu0 %vm6536_vm10, %v391_v23  ;;  %v374_v30 = vadd.f32 %v373_v25, %v197_v11  ;;  %v4833_v23 = vld [vmem:[%s6527_s1 + $0x1d4] ss:$8 sps:$4 sm:$0xff]  }
 0x159   :  { %v375_v26 = vpop.f32.mrf.mxu0  ;;  %522 = vmatmul.mubr.bf16.vlgmr.msra.gmra.mxu1 %v390_v24  ;;  %658 = vmatmul.mubr.bf16.vlgmr.msra.gmra.mxu0 %v390_v24  ;;  %v4801_v24 = vld [vmem:[%s6527_s1 + $0xc0] ss:$8 sps:$4 sm:$0xff]   ;;  %v4806_v25 = vld [vmem:[%s6527_s1 + $0xb4] ss:$8 sps:$4 sm:$0xff]  }
 0x15a   :  { %v376_v28 = vadd.f32 %v375_v26, %v201_v10  ;;  %v386_v36 = vmax.f32 %v374_v30, 0.0  ;;  %v4831_v26 = vld [vmem:[%s6527_s1 + $0x1d0] ss:$8 sps:$4 sm:$0xff]   ;;  %v4818_v30 = vld [vmem:[%s6527_s1 + $0x194] ss:$8 sps:$4 sm:$0xff]  }
 0x15b   :  { %v377_v27 = vpop.f32.mrf.mxu0 }
 0x15c   :  { %v378_v29 = vadd.f32 %v377_v27, %v197_v11  ;;  %v387_v34 = vmax.f32 %v376_v28, 0.0  ;;  %v4815_v11 = vld [vmem:[%s6527_s1 + $0x204] ss:$8 sps:$4 sm:$0xff]   ;;  %v4804_v27 = vld [vmem:[%s6527_s1 + $0xb0] ss:$8 sps:$4 sm:$0xff]  }
 0x15d   :  { %v379_v31 = vpop.f32.mrf.mxu0  ;;  %v4812_v28 = vld [vmem:[%s6527_s1 + $0xa4] ss:$8 sps:$4 sm:$0xff]  }
 0x15e   :  { %v380_v32 = vadd.f32 %v379_v31, %v201_v10  ;;  %v388_v33 = vmax.f32 %v378_v29, 0.0  ;;  %v4809_v10 = vld [vmem:[%s6527_s1 + $0x214] ss:$8 sps:$4 sm:$0xff]   ;;  %v4810_v29 = vld [vmem:[%s6527_s1 + $0xa0] ss:$8 sps:$4 sm:$0xff]  }
 0x15f   :  { %1314 = vmatprep.subr.bf16.mxu0 %v4809_v10  ;;  %v4816_v31 = vld [vmem:[%s6527_s1 + $0x190] ss:$8 sps:$4 sm:$0xff]   ;;  %v962_v10 = vld [vmem:[%s6527_s1 + $0x240] sm:$0x33] }
 0x160   :  { %v389_v35 = vmax.f32 %v380_v32, 0.0  ;;  %v392_v38 = vpack.c.bf16 %v388_v33, %v386_v36  ;;  %1315 = vmatpush1.bf16.msra.mxu0 %v4807_v9  ;;  %v4824_v32 = vld [vmem:[%s6527_s1 + $0x184] ss:$8 sps:$4 sm:$0xff]   ;;  %v4822_v33 = vld [vmem:[%s6527_s1 + $0x180] ss:$8 sps:$4 sm:$0xff]  }
 0x161   :  { %1316 = vmatprep.subr.bf16.mxu0 %v4815_v11  ;;  %v4854_v9 = vld [vmem:[%s6527_s1 + $0x134] ss:$8 sps:$4 sm:$0xff]  }
 0x162   :  { %v393_v37 = vpack.c.bf16 %v389_v35, %v387_v34  ;;  %v4830_v34 = vld [vmem:[%s6527_s1 + $0x174] ss:$8 sps:$4 sm:$0xff]   ;;  %v4828_v35 = vld [vmem:[%s6527_s1 + $0x170] ss:$8 sps:$4 sm:$0xff]  }
 0x164   :  { %4088 = vmatprep.mubr.msk.bf16.mxu1 %vm6536_vm10, %v393_v37  ;;  %4101 = vmatprep.mubr.msk.bf16.mxu0 %vm6536_vm10, %v393_v37 }
 0x165   :  { %530 = vmatmul.mubr.bf16.gmra.mxu1 %v392_v38  ;;  %666 = vmatmul.mubr.bf16.gmra.mxu0 %v392_v38 }
 0x166   :  { %4568 = vmatprep.mubr.msk.bf16.mxu1 %vm5123_vm11, %v5122_v39  ;;  %1317 = vmatpush1.bf16.msra.mxu0 %v4813_v14  ;;  %v4173_v14 = vcombine.low %v962_v10, %v962_v10 }
 0x167   :  { %1318 = vmatprep.subr.bf16.mxu0 %v4821_v15  ;;  %v4859_v15 = vld [vmem:[%s6527_s1 + $0x124] ss:$8 sps:$4 sm:$0xff]  }
 0x16a   :  { %1319 = vmatpush1.bf16.msra.mxu0 %v4819_v18 }
 0x16b   :  { %1320 = vmatprep.subr.bf16.mxu0 %v4827_v19  ;;  %v4857_v19 = vld [vmem:[%s6527_s1 + $0x120] ss:$8 sps:$4 sm:$0xff]  }
 0x16e   :  { %1321 = vmatpush1.bf16.msra.mxu0 %v4825_v22 }
 0x16f   :  { %1322 = vmatprep.subr.bf16.mxu0 %v4833_v23 }
 0x172   :  { %1323 = vmatpush1.bf16.msra.mxu0 %v4831_v26  ;;  %v4868_v26 = vld [vmem:[%s6527_s1 + $0x224] ss:$8 sps:$4 sm:$0xff]  }
 0x219   :  { %v523_v40 = vpop.f32.mrf.mxu1  ;;  %v659_v41 = vpop.f32.mrf.mxu0 }
 0x21a   :  { %v674_v62 = vmax.f32 %v523_v40, %v659_v41 }
 0x21b   :  { %v525_v42 = vpop.f32.mrf.mxu1  ;;  %v661_v43 = vpop.f32.mrf.mxu0 }
 0x21d   :  { %v526_v44 = vpop.f32.mrf.mxu1  ;;  %v662_v45 = vpop.f32.mrf.mxu0 }
 0x21e   :  { %v675_v60 = vmax.f32 %v526_v44, %v662_v45  ;;  %v4836_v44 = vld [vmem:[%s6527_s1 + $0x164] ss:$8 sps:$4 sm:$0xff]  }
 0x21f   :  { %v528_v46 = vpop.f32.mrf.mxu1  ;;  %v664_v47 = vpop.f32.mrf.mxu0 }
 0x220   :  { %v678_v63 = vpack.c.bf16 %v675_v60, %v674_v62  ;;  %v4834_v46 = vld [vmem:[%s6527_s1 + $0x160] ss:$8 sps:$4 sm:$0xff]  }
 0x225   :  { %v531_v48 = vpop.f32.mrf.mxu1  ;;  %v667_v49 = vpop.f32.mrf.mxu0 }
 0x226   :  { %v676_v55 = vmax.f32 %v531_v48, %v667_v49  ;;  %v4839_v48 = vld [vmem:[%s6527_s1 + $0x1c4] ss:$8 sps:$4 sm:$0xff]  }
 0x227   :  { %v533_v50 = vpop.f32.mrf.mxu1  ;;  %v669_v51 = vpop.f32.mrf.mxu0  ;;  %1324 = vmatprep.subr.bf16.mxu0 %v4839_v48 }
 0x228   :  { %v4837_v50 = vld [vmem:[%s6527_s1 + $0x1c0] ss:$8 sps:$4 sm:$0xff]   ;;  %v4842_v51 = vld [vmem:[%s6527_s1 + $0x154] ss:$8 sps:$4 sm:$0xff]  }
 0x229   :  { %v534_v52 = vpop.f32.mrf.mxu1  ;;  %v670_v54 = vpop.f32.mrf.mxu0  ;;  %1325 = vmatpush1.bf16.msra.mxu0 %v4837_v50 }
 0x22a   :  { %v677_v56 = vmax.f32 %v534_v52, %v670_v54  ;;  %v4840_v52 = vld [vmem:[%s6527_s1 + $0x150] ss:$8 sps:$4 sm:$0xff]   ;;  %v4845_v54 = vld [vmem:[%s6527_s1 + $0x1b4] ss:$8 sps:$4 sm:$0xff]  }
 0x22b   :  { %v536_v57 = vpop.f32.mrf.mxu1  ;;  %v672_v58 = vpop.f32.mrf.mxu0  ;;  %1326 = vmatprep.subr.bf16.mxu0 %v4845_v54  ;;  %v5037_v54 = vld [vmem:[%s6527_s1 + $0x428] ss:$8 sps:$4 sm:$0xff]  }
 0x22c   :  { %v679_v59 = vpack.c.bf16 %v677_v56, %v676_v55  ;;  %v4843_v55 = vld [vmem:[%s6527_s1 + $0x1b0] ss:$8 sps:$4 sm:$0xff]   ;;  %v4848_v58 = vld [vmem:[%s6527_s1 + $0x144] ss:$8 sps:$4 sm:$0xff]  }
 0x22d   :  { %1327 = vmatpush1.bf16.msra.mxu0 %v4843_v55 }
 0x22e   :  { %v693_v61 = vsel %vm6535_vm12, %v679_v59, 0  ;;  %v4846_v59 = vld [vmem:[%s6527_s1 + $0x140] ss:$8 sps:$4 sm:$0xff]  }
 0x22f   :  { %4565 = vmatpush3.bf16.msra.mxu1 %v693_v61 }
 0x230   :  { %4566 = vmatprep.subr.bf16.mxu1 %v5122_v39 }
 0x233   :  { %4567 = vmatpush3.bf16.msra.mxu1 %v678_v63 }
 0x234   :  { %4572 = vmatprep.subr.bf16.mxu1 %v5122_v39 }
 0x236   :  { %4569 = vmatmul.mubr.msk.bf16.vlgmr.msra.gmra.mxu1 %vm6534_vm13, %v4784_v0  ;;  %v4849_v0 = vld [vmem:[%s6527_s1 + $0x1a0] ss:$8 sps:$4 sm:$0xff]  }
 0x237   :  { %4573 = vmatpush3.bf16.msra.mxu1 %v693_v61  ;;  %4576 = vmatprep.mubr.msk.bf16.mxu1 %vm5123_vm11, %v5122_v39 }
 0x238   :  { %4574 = vmatprep.subr.bf16.mxu1 %v5122_v39 }
 0x23b   :  { %4575 = vmatpush3.bf16.msra.mxu1 %v678_v63 }
 0x23c   :  { %1271 = vmatprep.subr.bf16.mxu1 %v4788_v3 }
 0x23e   :  { %4577 = vmatmul.mubr.msk.bf16.vlgmr.msra.gmra.mxu1 %vm6534_vm13, %v4785_v1  ;;  %vm827_vm13 = vcmask 326660  }
 0x23f   :  { %1272 = vmatpush1.bf16.msra.mxu1 %v4786_v2 }
 0x240   :  { %1273 = vmatprep.subr.bf16.mxu1 %v4791_v4 }
 0x243   :  { %1274 = vmatpush1.bf16.msra.mxu1 %v4789_v5  ;;  %v4851_v5 = vld [vmem:[%s6527_s1 + $0x1a4] ss:$8 sps:$4 sm:$0xff]  }
 0x244   :  { %1275 = vmatprep.subr.bf16.mxu1 %v4794_v8  ;;  %v4852_v8 = vld [vmem:[%s6527_s1 + $0x130] ss:$8 sps:$4 sm:$0xff]   ;;  %1328 = vmatprep.subr.bf16.mxu0 %v4851_v5 }
 0x245   :  { %1329 = vmatpush1.bf16.msra.mxu0 %v4849_v0  ;;  %v4881_v5 = vld [vmem:[%s6527_s1 + $0x488] ss:$8 sps:$4 sm:$0xff]  }
 0x247   :  { %1276 = vmatpush1.bf16.msra.mxu1 %v4792_v12 }
 0x248   :  { %1277 = vmatprep.subr.bf16.mxu1 %v4797_v13  ;;  %v4174_v13 = vcombine.high %v962_v10, %v962_v10  ;;  %v4882_v10 = vld [vmem:[%s6527_s1 + $0x3d8] ss:$8 sps:$4 sm:$0xff]  }
 0x24b   :  { %1278 = vmatpush1.bf16.msra.mxu1 %v4795_v16 }
 0x24c   :  { %1279 = vmatprep.subr.bf16.mxu1 %v4800_v17 }
 0x24f   :  { %1280 = vmatpush1.bf16.msra.mxu1 %v4798_v20  ;;  %v4862_v20 = vld [vmem:[%s6527_s1 + $0x234] ss:$8 sps:$4 sm:$0xff]  }
 0x250   :  { %1281 = vmatprep.subr.bf16.mxu1 %v4803_v21 }
 0x253   :  { %1282 = vmatpush1.bf16.msra.mxu1 %v4801_v24 }
 0x254   :  { %1283 = vmatprep.subr.bf16.mxu1 %v4806_v25  ;;  %v4860_v25 = vld [vmem:[%s6527_s1 + $0x230] ss:$8 sps:$4 sm:$0xff]  }
 0x257   :  { %1284 = vmatpush1.bf16.msra.mxu1 %v4804_v27 }
 0x258   :  { %1285 = vmatprep.subr.bf16.mxu1 %v4812_v28 }
 0x25b   :  { %1286 = vmatpush1.bf16.msra.mxu1 %v4810_v29  ;;  %v4866_v29 = vld [vmem:[%s6527_s1 + $0x220] ss:$8 sps:$4 sm:$0xff]  }
 0x25c   :  { %1287 = vmatprep.subr.bf16.mxu1 %v4818_v30 }
 0x25f   :  { %1288 = vmatpush2.bf16.msra.mxu1 %v4816_v31 }
 0x260   :  { %1289 = vmatprep.subr.bf16.mxu1 %v4824_v32 }
 0x263   :  { %1290 = vmatpush2.bf16.msra.mxu1 %v4822_v33 }
 0x264   :  { %1291 = vmatprep.subr.bf16.mxu1 %v4830_v34 }
 0x267   :  { %1292 = vmatpush2.bf16.msra.mxu1 %v4828_v35 }
 0x268   :  { %1293 = vmatprep.subr.bf16.mxu1 %v4836_v44  ;;  %v5038_v44 = vld [vmem:[%s6527_s1 + $0x4c8] ss:$8 sps:$4 sm:$0xff]  }
 0x26b   :  { %1294 = vmatpush2.bf16.msra.mxu1 %v4834_v46 }
 0x26c   :  { %1295 = vmatprep.subr.bf16.mxu1 %v4842_v51 }
 0x26f   :  { %1296 = vmatpush2.bf16.msra.mxu1 %v4840_v52 }
 0x270   :  { %1297 = vmatprep.subr.bf16.mxu1 %v4848_v58  ;;  %v4873_v58 = vld [vmem:[%s6527_s1 + $0x4c8] ss:$8 sps:$4 sm:$0xff]  }
 0x273   :  { %1298 = vmatpush2.bf16.msra.mxu1 %v4846_v59 }
 0x274   :  { %1299 = vmatprep.subr.bf16.mxu1 %v4854_v9  ;;  %v4880_v9 = vld [vmem:[%s6527_s1 + $0x3e8] ss:$8 sps:$4 sm:$0xff]  }
 0x277   :  { %1300 = vmatpush2.bf16.msra.mxu1 %v4852_v8  ;;  %v4878_v8 = vld [vmem:[%s6527_s1 + $0x3f8] ss:$8 sps:$4 sm:$0xff]  }
 0x278   :  { %1301 = vmatprep.subr.bf16.mxu1 %v4859_v15  ;;  %v4887_v15 = vld [vmem:[%s6527_s1 + $0x458] ss:$8 sps:$4 sm:$0xff]  }
 0x27b   :  { %1302 = vmatpush2.bf16.msra.mxu1 %v4857_v19  ;;  %v4891_v19 = vld [vmem:[%s6527_s1 + $0x4d8] ss:$8 sps:$4 sm:$0xff]  }
 0x27c   :  { %1567 = vmatprep.subr.bf16.mxu1 %v5121_v53 }
 0x2f6   :  { %v729_v36 = vpop.f32.mrf.mxu1 }
 0x2f8   :  { %v4570_v37 = vpop.f32.mrf.mxu1 }
 0x2fa   :  { %v732_v38 = vpop.f32.mrf.mxu1 }
 0x2fc   :  { %v4571_v40 = vpop.f32.mrf.mxu1 }
 0x2fe   :  { %v780_v41 = vpop.f32.mrf.mxu1 }
 0x2ff   :  { %v787_v42 = vmax.f32 %v729_v36, %v780_v41 }
 0x300   :  { %v4578_v43 = vpop.f32.mrf.mxu1 }
 0x301   :  { %790 = vst.msk [vmem:[#allocation4] sm:$0xff] %vm6540_vm14, %v787_v42 }
 0x302   :  { %v783_v45 = vpop.f32.mrf.mxu1 }
 0x303   :  { %v788_v47 = vmax.f32 %v732_v38, %v783_v45 }
 0x304   :  { %v4579_v49 = vpop.f32.mrf.mxu1 }
 0x305   :  { %792 = vst.msk [vmem:[#allocation4 + $0x8] sm:$0x3f] %vm6533_vm15, %v788_v47  ;;  %vm826_vm15 = vcmask 1044128  }
 0x306   :  { %vm5649_vm10 = vmor %vm827_vm13, %vm826_vm15  ;;  %vm6548_vm13 = vcmask 1014784   ;;  %vm6544_vm15 = vcmask 1007936  }
 0x308   :  { %v793_v56 = vld [vmem:[#allocation4] sm:$0xff] }
 0x309   :  { %v4458_v57 = vpack.c.bf16 %v793_v56, %v793_v56 }
 0x30b   :  { %804 = vst.msk [vmem:[#allocation3] sm:$0xf] %vm6530_vm0, %v4458_v57  ;;  %vm6531_vm0 = vcmask 1041408  }
 0x30c   :  { %v808_v60 = vld [vmem:[#allocation4 + $0x9] sm:$0x3]  ;;  %v807_v61 = vld [vmem:[#allocation4 + $0x1] sm:$0xff]  ;;  %v853_v1 = vld [vmem:[#allocation4 + $0xb] sm:$0x3]  ;;  %v1266_v18 = vsel %vm6531_vm0, %v4173_v14, 0  ;;  %4175 = vmatprep.subr.msk.bf16.mxu0 %vm6531_vm0, %v4174_v13 }
 0x30d   :  { %v4461_v62 = vpack.c.bf16 %v808_v60, %v808_v60  ;;  %v4460_v63 = vpack.c.bf16 %v807_v61, %v807_v61  ;;  %v852_v2 = vld [vmem:[#allocation4 + $0x3] sm:$0xff]  ;;  %v4465_v11 = vpack.c.bf16 %v853_v1, %v853_v1  ;;  %v880_v23 = vld [vmem:[#allocation4 + $0xc] sm:$0x3]  ;;  %1341 = vmatpush2.bf16.msra.mxu0 %v1266_v18  ;;  %vm830_vm0 = vcmask 1041056  }
 0x30e   :  { %v794_v3 = vld [vmem:[#allocation4 + $0x8] sm:$0x3]  ;;  %v4464_v12 = vpack.c.bf16 %v852_v2, %v852_v2  ;;  %v835_v16 = vld [vmem:[#allocation4 + $0xa] sm:$0x3]  ;;  %1342 = vmatprep.subr.bf16.mxu0 %v4862_v20  ;;  %v4467_v27 = vpack.c.bf16 %v880_v23, %v880_v23  ;;  %v4875_v61 = vld [vmem:[%s6527_s1 + $0x4b8] ss:$8 sps:$4 sm:$0xff]  }
 0x30f   :  { %817 = vrot.lane.b32.xlu1 %v4461_v62, %s5124_s14  ;;  %815 = vrot.lane.b32.xlu0 %v4460_v63, %s5124_s14  ;;  %v4459_v4 = vpack.c.bf16 %v794_v3, %v794_v3  ;;  %v834_v17 = vld [vmem:[#allocation4 + $0x2] sm:$0xff]  ;;  %v4463_v21 = vpack.c.bf16 %v835_v16, %v835_v16 }
 0x310   :  { %v4462_v22 = vpack.c.bf16 %v834_v17, %v834_v17  ;;  %v879_v24 = vld [vmem:[#allocation4 + $0x4] sm:$0xff]  ;;  %v4874_v2 = vld [vmem:[%s6527_s1 + $0x418] ss:$8 sps:$4 sm:$0xff]  }
 0x311   :  { %806 = vst.msk [vmem:[#allocation3 + $0x10] sm:$0x1] %vm6532_vm1, %v4459_v4  ;;  %v4466_v28 = vpack.c.bf16 %v879_v24, %v879_v24  ;;  %1343 = vmatpush2.bf16.msra.mxu0 %v4860_v25  ;;  %vm831_vm1 = vcmask 323588   ;;  %v4872_v62 = vld [vmem:[%s6527_s1 + $0x428] ss:$8 sps:$4 sm:$0xff]  }
 0x312   :  { %1344 = vmatprep.subr.bf16.mxu0 %v4868_v26  ;;  %vm5645_vm12 = vmor %vm831_vm1, %vm830_vm0  ;;  %vm871_vm0 = vcmask 1044448   ;;  %vm872_vm1 = vcmask 654340   ;;  %v4877_v1 = vld [vmem:[%s6527_s1 + $0x4a8] ss:$8 sps:$4 sm:$0xff]   ;;  %v4879_v3 = vld [vmem:[%s6527_s1 + $0x498] ss:$8 sps:$4 sm:$0xff]  }
 0x313   :  { %862 = vrot.lane.b32.xlu1 %v4465_v11, %s5125_s27  ;;  %860 = vrot.lane.b32.xlu0 %v4464_v12, %s5125_s27  ;;  %vm5663_vm5 = vmor %vm872_vm1, %vm871_vm0  ;;  %vm899_vm0 = vcmask 293892   ;;  %vm6546_vm1 = vcmask 654336   ;;  %v4876_v4 = vld [vmem:[%s6527_s1 + $0x408] ss:$8 sps:$4 sm:$0xff]   ;;  %v4883_v11 = vld [vmem:[%s6527_s1 + $0x478] ss:$8 sps:$4 sm:$0xff]  }
 0x314   :  { %v4884_v12 = vld [vmem:[%s6527_s1 + $0x3c8] ss:$8 sps:$4 sm:$0xff]   ;;  %v4886_v14 = vld [vmem:[%s6527_s1 + $0x3b8] ss:$8 sps:$4 sm:$0xff]  }
 0x315   :  { %1345 = vmatpush2.bf16.msra.mxu0 %v4866_v29  ;;  %v4885_v13 = vld [vmem:[%s6527_s1 + $0x468] ss:$8 sps:$4 sm:$0xff]   ;;  %v4890_v18 = vld [vmem:[%s6527_s1 + $0x438] ss:$8 sps:$4 sm:$0xff]  }
 0x316   :  { %1446 = vmatprep.subr.bf16.mxu0 %v5121_v53  ;;  %v4888_v16 = vld [vmem:[%s6527_s1 + $0x448] ss:$8 sps:$4 sm:$0xff]  }
 0x317   :  { %844 = vrot.lane.b32.xlu1 %v4463_v21, %s5126_s7  ;;  %842 = vrot.lane.b32.xlu0 %v4462_v22, %s5126_s7  ;;  %v4889_v17 = vld [vmem:[%s6527_s1 + $0x4e8] ss:$8 sps:$4 sm:$0xff]  }
 0x318   :  { %v4210_v20 = vld [vmem:[%s6526_s0 + $0x29] sm:$0xff]  ;;  %v4209_v21 = vld [vmem:[%s6526_s0 + $0x21] sm:$0xff] }
 0x319   :  { %v4218_v22 = vld [vmem:[%s6526_s0 + $0x2a] sm:$0xff]  ;;  %v4473_v23 = vpack.c.bf16 %v4210_v20, %v4210_v20  ;;  %v4472_v24 = vpack.c.bf16 %v4209_v21, %v4209_v21  ;;  %v4217_v25 = vld [vmem:[%s6526_s0 + $0x22] sm:$0xff] }
 0x31a   :  { %v4477_v26 = vpack.c.bf16 %v4218_v22, %v4218_v22  ;;  %v4225_v29 = vld [vmem:[%s6526_s0 + $0x23] sm:$0xff] }
 0x31b   :  { %889 = vrot.lane.b32.xlu1 %v4467_v27, %s5127_s12  ;;  %887 = vrot.lane.b32.xlu0 %v4466_v28, %s5127_s12  ;;  %v4476_v27 = vpack.c.bf16 %v4217_v25, %v4217_v25  ;;  %v4226_v28 = vld [vmem:[%s6526_s0 + $0x2b] sm:$0xff] }
 0x31f   :  { %1765 = vrot.lane.b32.xlu1 %v4473_v23, %s5119_s21  ;;  %1763 = vrot.lane.b32.xlu0 %v4472_v24, %s5119_s21 }
 0x323   :  { %1797 = vrot.lane.b32.xlu1 %v4477_v26, %s5118_s20  ;;  %1795 = vrot.lane.b32.xlu0 %v4476_v27, %s5118_s20 }
 0x381   :  { %v818_v30 = vpop.permute.xlu1 %817  ;;  %v816_v31 = vpop.permute.xlu0 %815 }
 0x382   :  { %v820_v33 = vrot.slane %v818_v30, 4  ;;  %v819_v34 = vrot.slane %v816_v31, 4 }
 0x384   :  { %v823_v36 = vsel %vm6540_vm14, %v820_v33, %v818_v30  ;;  %v822_v37 = vsel %vm6540_vm14, %v819_v34, %v816_v31  ;;  %vm6547_vm14 = vcmask 1011008   ;;  %v4481_v30 = vpack.c.bf16 %v4226_v28, %v4226_v28  ;;  %v4212_v33 = vld [vmem:[%s6526_s0 + $0x39] sm:$0xf]  ;;  %v4211_v34 = vld [vmem:[%s6526_s0 + $0x31] sm:$0xff] }
 0x385   :  { %v863_v38 = vpop.permute.xlu1 %862  ;;  %v861_v40 = vpop.permute.xlu0 %860  ;;  %833 = vst.msk [vmem:[#allocation3 + $0x10] sm:$0x11] %vm5645_vm12, %v823_v36  ;;  %v4480_v31 = vpack.c.bf16 %v4225_v29, %v4225_v29  ;;  %v4475_v36 = vpack.c.bf16 %v4212_v33, %v4212_v33 }
 0x386   :  { %829 = vst.msk [vmem:[#allocation3] sm:$0xff] %vm5649_vm10, %v822_v37  ;;  %v865_v41 = vrot.slane %v863_v38, 4  ;;  %v864_v42 = vrot.slane %v861_v40, 4  ;;  %1829 = vrot.lane.b32.xlu1 %v4481_v30, %s5120_s13  ;;  %v4474_v37 = vpack.c.bf16 %v4211_v34, %v4211_v34 }
 0x387   :  { %1827 = vrot.lane.b32.xlu0 %v4480_v31, %s5120_s13 }
 0x388   :  { %v868_v47 = vsel %vm6548_vm13, %v865_v41, %v863_v38  ;;  %v867_v48 = vsel %vm6548_vm13, %v864_v42, %v861_v40  ;;  %v4220_v38 = vld [vmem:[%s6526_s0 + $0x3a] sm:$0xf]  ;;  %v4219_v40 = vld [vmem:[%s6526_s0 + $0x32] sm:$0xff]  ;;  %vm6568_vm13 = vmmov %vm6562_vm8 }
 0x389   :  { %v845_v45 = vpop.permute.xlu1 %844  ;;  %v843_v46 = vpop.permute.xlu0 %842  ;;  %v4479_v41 = vpack.c.bf16 %v4220_v38, %v4220_v38  ;;  %v4478_v42 = vpack.c.bf16 %v4219_v40, %v4219_v40 }
 0x38a   :  { %851 = vst.msk [vmem:[#allocation3 + $0x14] sm:$0x1] %vm6544_vm15, %v845_v45  ;;  %vm5679_vm15 = vmor %vm899_vm0, %vm898_vm9  ;;  %1769 = vrot.lane.b32.xlu1 %v4475_v36, %s5119_s21  ;;  %v4228_v45 = vld [vmem:[%s6526_s0 + $0x3b] sm:$0xf]  ;;  %vm6564_vm0 = vcmask 1044224  }
 0x38b   :  { %849 = vst.msk [vmem:[#allocation3 + $0x4] sm:$0xf] %vm6547_vm14, %v843_v46  ;;  %1767 = vrot.lane.b32.xlu0 %v4474_v37, %s5119_s21  ;;  %v4227_v46 = vld [vmem:[%s6526_s0 + $0x33] sm:$0xff]  ;;  %vm6563_vm9 = vmmov %vm6562_vm8  ;;  %vm6567_vm14 = vcmask 779776  }
 0x38c   :  { %878 = vst.msk [vmem:[#allocation3 + $0x14] sm:$0x11] %vm5659_vm6, %v868_v47  ;;  %v4483_v47 = vpack.c.bf16 %v4228_v45, %v4228_v45  ;;  %v1611_v45 = vld [vmem:[%s6527_s1 + $0x4f8] sm:$0x7] }
 0x38d   :  { %874 = vst.msk [vmem:[#allocation3 + $0x4] sm:$0xff] %vm5663_vm5, %v867_v48  ;;  %v890_v50 = vpop.permute.xlu1 %889  ;;  %v888_v51 = vpop.permute.xlu0 %887  ;;  %v4865_v60 = vld [vmem:[#allocation3] ss:$16 sps:$4 sm:$0x1f]   ;;  %v4482_v48 = vpack.c.bf16 %v4227_v46, %v4227_v46 }
 0x38e   :  { %v892_v52 = vrot.slane %v890_v50, 4  ;;  %v891_v55 = vrot.slane %v888_v51, 4  ;;  %1801 = vrot.lane.b32.xlu1 %v4479_v41, %s5118_s20  ;;  %v4894_v41 = vld [vmem:[%s6527_s1 + $0x74] ss:$8 sps:$4 sm:$0xff]   ;;  %v4892_v46 = vld [vmem:[%s6527_s1 + $0x70] ss:$8 sps:$4 sm:$0xff]  }
 0x38f   :  { %1799 = vrot.lane.b32.xlu0 %v4478_v42, %s5118_s20 }
 0x390   :  { %v895_v56 = vsel %vm6546_vm1, %v892_v52, %v890_v50  ;;  %v894_v57 = vsel %vm6546_vm1, %v891_v55, %v888_v51  ;;  %v4116_v52 = vld [vmem:[%s6528_s2 + $0x10] ss:$8 sm:$0x3]  ;;  %vm6566_vm1 = vcmask 517376  }
 0x391   :  { %905 = vst.msk [vmem:[#allocation3 + $0x18] sm:$0x11] %vm5675_vm3, %v895_v56  ;;  %v973_v56 = vrot.slane %v4116_v52, %v5440_v6 }
 0x392   :  { %901 = vst.msk [vmem:[#allocation3 + $0x8] sm:$0xff] %vm5679_vm15, %v894_v57  ;;  %1833 = vrot.lane.b32.xlu1 %v4483_v47, %s5120_s13  ;;  %v969_v57 = vrot.slane %v4116_v52, %v5442_v7  ;;  %v1660_v47 = vld [vmem:[%s6527_s1 + $0x500] sm:$0x7]  ;;  %v4900_v52 = vld [vmem:[%s6527_s1 + $0x54] ss:$8 sps:$4 sm:$0xff]  }
 0x393   :  { %1831 = vrot.lane.b32.xlu0 %v4482_v48, %s5120_s13  ;;  %v4919_v48 = vld [vmem:[#allocation2 + $0x4] ss:$8 sps:$4 sm:$0xff]  }
 0x394   :  { %v4863_v59 = vld [vmem:[#allocation3 + $0x4] ss:$16 sps:$4 sm:$0x1f]  }
 0x395   :  { %1303 = vmatprep.mubr.bf16.mxu1 %v4863_v59 }
 0x396   :  { %1304 = vmatmul.mubr.bf16.vlgmr.msra.gmra.mxu1 %v4865_v60 }
 0x397   :  { %1568 = vmatpush1.bf16.msra.mxu1 %v4873_v58 }
 0x398   :  { %1569 = vmatprep.subr.bf16.mxu1 %v5121_v53 }
 0x399   :  { %v4869_v63 = vld [vmem:[#allocation3 + $0xc] ss:$16 sps:$4 sm:$0x1f]   ;;  %v4871_v0 = vld [vmem:[#allocation3 + $0x8] ss:$16 sps:$4 sm:$0x1f]  }
 0x39a   :  { %4176 = vmatprep.mubr.msk.bf16.mxu0 %vm6545_vm4, %v4869_v63  ;;  %vm6565_vm4 = vmmov %vm6564_vm0 }
 0x39b   :  { %1570 = vmatpush1.bf16.msra.mxu1 %v4875_v61  ;;  %1347 = vmatmul.mubr.bf16.vlgmr.msra.gmra.mxu0 %v4871_v0 }
 0x39c   :  { %1571 = vmatprep.subr.bf16.mxu1 %v5121_v53  ;;  %1447 = vmatpush1.bf16.msra.mxu0 %v4872_v62 }
 0x39d   :  { %1448 = vmatprep.subr.bf16.mxu0 %v5121_v53 }
 0x39f   :  { %1572 = vmatpush1.bf16.msra.mxu1 %v4877_v1 }
 0x3a0   :  { %1573 = vmatprep.subr.bf16.mxu1 %v5121_v53  ;;  %1449 = vmatpush1.bf16.msra.mxu0 %v4874_v2 }
 0x3a1   :  { %1450 = vmatprep.subr.bf16.mxu0 %v5121_v53 }
 0x3a3   :  { %1574 = vmatpush1.bf16.msra.mxu1 %v4879_v3 }
 0x3a4   :  { %1575 = vmatprep.subr.bf16.mxu1 %v5121_v53  ;;  %1451 = vmatpush1.bf16.msra.mxu0 %v4876_v4 }
 0x3a5   :  { %1452 = vmatprep.subr.bf16.mxu0 %v5121_v53 }
 0x3a7   :  { %1576 = vmatpush1.bf16.msra.mxu1 %v4881_v5 }
 0x3a8   :  { %1577 = vmatprep.subr.bf16.mxu1 %v5121_v53  ;;  %1453 = vmatpush1.bf16.msra.mxu0 %v4878_v8 }
 0x3a9   :  { %1454 = vmatprep.subr.bf16.mxu0 %v5121_v53 }
 0x3ab   :  { %1578 = vmatpush1.bf16.msra.mxu1 %v4883_v11 }
 0x3ac   :  { %1455 = vmatpush1.bf16.msra.mxu0 %v4880_v9  ;;  %1579 = vmatprep.subr.bf16.mxu1 %v5121_v53 }
 0x3ad   :  { %1456 = vmatprep.subr.bf16.mxu0 %v5121_v53 }
 0x3af   :  { %1580 = vmatpush1.bf16.msra.mxu1 %v4885_v13 }
 0x3b0   :  { %1457 = vmatpush1.bf16.msra.mxu0 %v4882_v10  ;;  %1581 = vmatprep.subr.bf16.mxu1 %v5121_v53 }
 0x3b1   :  { %1458 = vmatprep.subr.bf16.mxu0 %v5121_v53 }
 0x3b3   :  { %1582 = vmatpush1.bf16.msra.mxu1 %v4887_v15  ;;  %v1766_v15 = vpop.permute.xlu1 %1765 }
 0x3b4   :  { %1459 = vmatpush1.bf16.msra.mxu0 %v4884_v12  ;;  %1595 = vmatprep.subr.bf16.mxu1 %v5121_v53  ;;  %1776 = vst.msk [vmem:[#allocation2 + $0x8] sm:$0xf] %vm70_vm2, %v1766_v15  ;;  %v4929_v15 = vld [vmem:[%s6527_s1 + $0x2a8] ss:$8 sps:$4 sm:$0xff]  }
 0x3b5   :  { %1460 = vmatprep.subr.bf16.mxu0 %v5121_v53 }
 0x3b7   :  { %1596 = vmatpush2.bf16.msra.mxu1 %v4889_v17  ;;  %v1798_v17 = vpop.permute.xlu1 %1797 }
 0x3b8   :  { %1461 = vmatpush1.bf16.msra.mxu0 %v4886_v14  ;;  %1597 = vmatprep.subr.bf16.mxu1 %v5121_v53  ;;  %1808 = vst.msk [vmem:[#allocation2 + $0x8] sm:$0xf] %vm6562_vm8, %v1798_v17  ;;  %vm6569_vm8 = vcmask 1042176   ;;  %v4931_v17 = vld [vmem:[%s6527_s1 + $0x298] ss:$8 sps:$4 sm:$0xff]  }
 0x3b9   :  { %1474 = vmatprep.subr.bf16.mxu0 %v5121_v53 }
 0x3bb   :  { %1598 = vmatpush2.bf16.msra.mxu1 %v4891_v19 }
 0x3bc   :  { %1475 = vmatpush2.bf16.msra.mxu0 %v4888_v16  ;;  %4586 = vmatprep.subr.bf16.mxu1 %v5122_v39  ;;  %v1764_v16 = vpop.permute.xlu0 %1763 }
 0x3bd   :  { %1476 = vmatprep.subr.bf16.mxu0 %v5121_v53  ;;  %1775 = vst.msk [vmem:[#allocation2] sm:$0xf] %vm70_vm2, %v1764_v16  ;;  %v4930_v16 = vld [vmem:[%s6527_s1 + $0x350] ss:$8 sps:$4 sm:$0xff]  }
 0x3c0   :  { %1477 = vmatpush2.bf16.msra.mxu0 %v4890_v18  ;;  %v1796_v18 = vpop.permute.xlu0 %1795 }
 0x3c1   :  { %4580 = vmatprep.subr.bf16.mxu0 %v5122_v39  ;;  %1807 = vst.msk [vmem:[#allocation2] sm:$0xf] %vm6563_vm9, %v1796_v18  ;;  %vm6570_vm9 = vmmov %vm6564_vm0  ;;  %v4932_v18 = vld [vmem:[%s6527_s1 + $0x340] ss:$8 sps:$4 sm:$0xff]  }
 0x3f8   :  { %v1830_v19 = vpop.permute.xlu1 %1829 }
 0x3f9   :  { %v1828_v20 = vpop.permute.xlu0 %1827  ;;  %1840 = vst.msk [vmem:[#allocation2 + $0x8] sm:$0xf] %vm6564_vm0, %v1830_v19  ;;  %v4933_v19 = vld [vmem:[%s6527_s1 + $0x288] ss:$8 sps:$4 sm:$0xff]   ;;  %vm6549_vm0 = vcmask 647168  }
 0x3fa   :  { %1839 = vst.msk [vmem:[#allocation2] sm:$0xf] %vm6565_vm4, %v1828_v20  ;;  %v4934_v20 = vld [vmem:[%s6527_s1 + $0x330] ss:$8 sps:$4 sm:$0xff]   ;;  %vm1705_vm4 = vcmask 651264  }
 0x3fc   :  { %v1770_v21 = vpop.permute.xlu1 %1769 }
 0x3fd   :  { %v1768_v22 = vpop.permute.xlu0 %1767  ;;  %1778 = vst.msk [vmem:[#allocation2 + $0x18] sm:$0x3] %vm6566_vm1, %v1770_v21  ;;  %v4935_v21 = vld [vmem:[%s6527_s1 + $0x278] ss:$8 sps:$4 sm:$0xff]  }
 0x3fe   :  { %1777 = vst.msk [vmem:[#allocation2 + $0x10] sm:$0xf] %vm70_vm2, %v1768_v22  ;;  %vm1616_vm2 = vcmask 1044480   ;;  %v4936_v22 = vld [vmem:[%s6527_s1 + $0x320] ss:$8 sps:$4 sm:$0xff]  }
 0x400   :  { %v1802_v23 = vpop.permute.xlu1 %1801 }
 0x401   :  { %v1800_v24 = vpop.permute.xlu0 %1799  ;;  %1810 = vst.msk [vmem:[#allocation2 + $0x18] sm:$0x3] %vm6567_vm14, %v1802_v23  ;;  %vm1612_vm14 = vcmask 80896   ;;  %v4937_v23 = vld [vmem:[%s6527_s1 + $0x268] ss:$8 sps:$4 sm:$0xff]  }
 0x402   :  { %1809 = vst.msk [vmem:[#allocation2 + $0x10] sm:$0xf] %vm6568_vm13, %v1800_v24  ;;  %v4938_v24 = vld [vmem:[%s6527_s1 + $0x310] ss:$8 sps:$4 sm:$0xff]   ;;  %vm6571_vm13 = vcmask 1043456  }
 0x403   :  { %vm6572_vm1 = vmmov %vm6571_vm13 }
 0x404   :  { %v1834_v25 = vpop.permute.xlu1 %1833 }
 0x405   :  { %v1832_v26 = vpop.permute.xlu0 %1831  ;;  %1842 = vst.msk [vmem:[#allocation2 + $0x18] sm:$0x3] %vm6569_vm8, %v1834_v25  ;;  %v4939_v25 = vld [vmem:[%s6527_s1 + $0x258] ss:$8 sps:$4 sm:$0xff]   ;;  %vm6573_vm8 = vcmask 326656  }
 0x406   :  { %1841 = vst.msk [vmem:[#allocation2 + $0x10] sm:$0xf] %vm6570_vm9, %v1832_v26  ;;  %v4940_v26 = vld [vmem:[%s6527_s1 + $0x300] ss:$8 sps:$4 sm:$0xff]   ;;  %vm6574_vm9 = vmmov %vm6573_vm8 }
 0x456   :  { %v1305_v50 = vpop.f32.mrf.mxu1 }
 0x457   :  { %v1306_v63 = vadd.f32 %v1305_v50, %v969_v57  ;;  %v4897_v50 = vld [vmem:[%s6527_s1 + $0x64] ss:$8 sps:$4 sm:$0xff]  }
 0x458   :  { %v1307_v51 = vpop.f32.mrf.mxu1 }
 0x459   :  { %v1308_v61 = vadd.f32 %v1307_v51, %v973_v56  ;;  %v4895_v51 = vld [vmem:[%s6527_s1 + $0x60] ss:$8 sps:$4 sm:$0xff]  }
 0x45a   :  { %v1309_v55 = vpop.f32.mrf.mxu1 }
 0x45b   :  { %v1348_v58 = vpop.f32.mrf.mxu0  ;;  %v1310_v62 = vadd.f32 %v1309_v55, %v969_v57  ;;  %v4898_v55 = vld [vmem:[%s6527_s1 + $0x50] ss:$8 sps:$4 sm:$0xff]   ;;  %v4901_v57 = vld [vmem:[%s6527_s1 + $0x40] ss:$8 sps:$4 sm:$0xff]  }
 0x45c   :  { %v1311_v59 = vpop.f32.mrf.mxu1  ;;  %v1349_v4 = vadd.f32 %v1348_v58, %v1306_v63  ;;  %v4906_v58 = vld [vmem:[%s6527_s1 + $0x34] ss:$8 sps:$4 sm:$0xff]   ;;  %v4910_v63 = vld [vmem:[%s6527_s1 + $0x10] ss:$8 sps:$4 sm:$0xff]  }
 0x45d   :  { %v1350_v60 = vpop.f32.mrf.mxu0  ;;  %v1312_v1 = vadd.f32 %v1311_v59, %v973_v56  ;;  %v4903_v56 = vld [vmem:[%s6527_s1 + $0x44] ss:$8 sps:$4 sm:$0xff]   ;;  %v4904_v59 = vld [vmem:[%s6527_s1 + $0x30] ss:$8 sps:$4 sm:$0xff]  }
 0x45e   :  { %v1351_v2 = vadd.f32 %v1350_v60, %v1308_v61  ;;  %v1357_v12 = vmax.f32 %v1349_v4, 0.0  ;;  %v4909_v60 = vld [vmem:[%s6527_s1 + $0x24] ss:$8 sps:$4 sm:$0xff]   ;;  %v4907_v61 = vld [vmem:[%s6527_s1 + $0x20] ss:$8 sps:$4 sm:$0xff]  }
 0x45f   :  { %v1352_v0 = vpop.f32.mrf.mxu0  ;;  %v4923_v4 = vld [vmem:[%s6527_s1 + $0x84] ss:$8 sps:$4 sm:$0xff]  }
 0x460   :  { %v1353_v3 = vadd.f32 %v1352_v0, %v1310_v62  ;;  %v1358_v10 = vmax.f32 %v1351_v2, 0.0  ;;  %v4912_v62 = vld [vmem:[%s6527_s1 + $0x14] ss:$8 sps:$4 sm:$0xff]   ;;  %v4915_v0 = vld [vmem:[%s6527_s1 + $0x4] ss:$8 sps:$4 sm:$0xff]  }
 0x461   :  { %v1354_v5 = vpop.f32.mrf.mxu0  ;;  %v4918_v2 = vld [vmem:[%s6527_s1 + $0x94] ss:$8 sps:$4 sm:$0xff]  }
 0x462   :  { %v1355_v8 = vadd.f32 %v1354_v5, %v1312_v1  ;;  %v1359_v9 = vmax.f32 %v1353_v3, 0.0  ;;  %v4913_v1 = vld [vmem:[%s6527_s1] ss:$8 sps:$4 sm:$0xff]   ;;  %v4916_v3 = vld [vmem:[%s6527_s1 + $0x90] ss:$8 sps:$4 sm:$0xff]  }
 0x463   :  { %v4921_v5 = vld [vmem:[%s6527_s1 + $0x80] ss:$8 sps:$4 sm:$0xff]  }
 0x464   :  { %v1360_v11 = vmax.f32 %v1355_v8, 0.0  ;;  %v1361_v14 = vpack.c.bf16 %v1359_v9, %v1357_v12  ;;  %v1867_v8 = vld [vmem:[#allocation2] sm:$0xff]  ;;  %v1868_v9 = vld [vmem:[#allocation2 + $0x8] sm:$0xff]  ;;  %v4926_v12 = vld [vmem:[#allocation2 + $0x10] ss:$8 sps:$4 sm:$0x3f]  }
 0x466   :  { %v1362_v13 = vpack.c.bf16 %v1360_v11, %v1358_v10  ;;  %v4924_v10 = vld [vmem:[#allocation2 + $0x14] ss:$8 sps:$4 sm:$0x3f]   ;;  %v4241_v11 = vcombine.low %v1867_v8, %v1868_v9 }
 0x468   :  { %4187 = vmatprep.mubr.msk.bf16.mxu0 %vm322_vm7, %v1362_v13  ;;  %4198 = vmatprep.mubr.msk.bf16.mxu1 %vm322_vm7, %v1362_v13  ;;  %v4927_v13 = vld [vmem:[%s6527_s1 + $0x2b8] ss:$8 sps:$4 sm:$0xff]  }
 0x469   :  { %1479 = vmatmul.mubr.bf16.vlgmr.msra.gmra.mxu0 %v1361_v14  ;;  %1600 = vmatmul.mubr.bf16.vlgmr.msra.gmra.mxu1 %v1361_v14  ;;  %v4928_v14 = vld [vmem:[%s6527_s1 + $0x360] ss:$8 sps:$4 sm:$0xff]  }
 0x46a   :  { %4582 = vmatprep.mubr.msk.bf16.mxu0 %vm5123_vm11, %v5122_v39  ;;  %4588 = vmatprep.mubr.msk.bf16.mxu1 %vm5123_vm11, %v5122_v39 }
 0x529   :  { %v1480_v27 = vpop.f32.mrf.mxu0  ;;  %v1601_v28 = vpop.f32.mrf.mxu1 }
 0x52a   :  { %v1608_v34 = vmax.f32 %v1480_v27, %v1601_v28  ;;  %v4941_v27 = vld [vmem:[%s6527_s1 + $0x248] ss:$8 sps:$4 sm:$0xff]  }
 0x52b   :  { %v1482_v29 = vpop.f32.mrf.mxu0  ;;  %v1603_v30 = vpop.f32.mrf.mxu1  ;;  %v4942_v28 = vld [vmem:[%s6527_s1 + $0x2f0] ss:$8 sps:$4 sm:$0xff]  }
 0x52c   :  { %v4943_v29 = vld [vmem:[%s6527_s1 + $0x2e8] ss:$0 sps:$4 sm:$0xff]   ;;  %v4944_v30 = vld [vmem:[%s6527_s1 + $0x390] ss:$0 sps:$4 sm:$0xff]  }
 0x52d   :  { %v1483_v31 = vpop.f32.mrf.mxu0  ;;  %v1604_v33 = vpop.f32.mrf.mxu1 }
 0x52e   :  { %v1609_v36 = vmax.f32 %v1483_v31, %v1604_v33  ;;  %v2183_v31 = vsel %vm6571_vm13, %v4943_v29, 0  ;;  %v2319_v33 = vsel %vm6572_vm1, %v4944_v30, 0  ;;  %vm6575_vm13 = vmmov %vm6573_vm8 }
 0x52f   :  { %v1485_v37 = vpop.f32.mrf.mxu0  ;;  %v1606_v38 = vpop.f32.mrf.mxu1  ;;  %vm6576_vm1 = vmmov %vm6573_vm8 }
 0x530   :  { %v1610_v40 = vpack.c.bf16 %v1609_v36, %v1608_v34  ;;  %v4945_v34 = vld [vmem:[%s6527_s1 + $0x2d8] ss:$8 sps:$4 sm:$0xff]   ;;  %v4947_v37 = vld [vmem:[%s6527_s1 + $0x2c8] ss:$8 sps:$4 sm:$0xff]  }
 0x531   :  { %v4946_v36 = vld [vmem:[%s6527_s1 + $0x380] ss:$8 sps:$4 sm:$0xff]   ;;  %v4948_v38 = vld [vmem:[%s6527_s1 + $0x370] ss:$8 sps:$4 sm:$0xff]  }
 0x532   :  { %v1618_v42 = vsel %vm1616_vm2, %v1610_v40, 0 }
 0x533   :  { %4581 = vmatpush3.bf16.msra.mxu0 %v1618_v42  ;;  %4587 = vmatpush3.bf16.msra.mxu1 %v1618_v42 }
 0x534   :  { %2027 = vmatprep.subr.bf16.mxu0 %v4894_v41  ;;  %2185 = vmatprep.subr.bf16.mxu1 %v5121_v53 }
 0x536   :  { %4583 = vmatmul.mubr.msk.bf16.vlgmr.msra.gmra.mxu0 %vm1612_vm14, %v1611_v45  ;;  %4589 = vmatmul.mubr.msk.bf16.vlgmr.msra.gmra.mxu1 %vm1612_vm14, %v1660_v47 }
 0x537   :  { %2028 = vmatpush1.bf16.msra.mxu0 %v4892_v46  ;;  %4265 = vmatprep.mubr.msk.bf16.mxu0 %vm322_vm7, %v4919_v48 }
 0x538   :  { %2029 = vmatprep.subr.bf16.mxu0 %v4897_v50  ;;  %2186 = vmatpush1.bf16.msra.mxu1 %v4927_v13 }
 0x539   :  { %2187 = vmatprep.subr.bf16.mxu1 %v5121_v53 }
 0x53b   :  { %2030 = vmatpush1.bf16.msra.mxu0 %v4895_v51 }
 0x53c   :  { %2031 = vmatprep.subr.bf16.mxu0 %v4900_v52  ;;  %2188 = vmatpush1.bf16.msra.mxu1 %v4929_v15 }
 0x53d   :  { %2189 = vmatprep.subr.bf16.mxu1 %v5121_v53 }
 0x53f   :  { %2032 = vmatpush1.bf16.msra.mxu0 %v4898_v55 }
 0x540   :  { %2033 = vmatprep.subr.bf16.mxu0 %v4903_v56  ;;  %2190 = vmatpush1.bf16.msra.mxu1 %v4931_v17 }
 0x541   :  { %2191 = vmatprep.subr.bf16.mxu1 %v5121_v53 }
 0x543   :  { %2034 = vmatpush1.bf16.msra.mxu0 %v4901_v57 }
 0x544   :  { %2035 = vmatprep.subr.bf16.mxu0 %v4906_v58  ;;  %2192 = vmatpush1.bf16.msra.mxu1 %v4933_v19 }
 0x545   :  { %2193 = vmatprep.subr.bf16.mxu1 %v5121_v53 }
 0x547   :  { %2036 = vmatpush1.bf16.msra.mxu0 %v4904_v59  ;;  %v1891_v59 = vld [vmem:[%s6528_s2] ss:$8 sm:$0x3] }
 0x548   :  { %2037 = vmatprep.subr.bf16.mxu0 %v4909_v60  ;;  %2194 = vmatpush1.bf16.msra.mxu1 %v4935_v21 }
 0x549   :  { %2195 = vmatprep.subr.bf16.mxu1 %v5121_v53 }
 0x54b   :  { %2038 = vmatpush1.bf16.msra.mxu0 %v4907_v61  ;;  %v1900_v61 = vrot.slane %v1891_v59, %v5440_v6 }
 0x54c   :  { %2039 = vmatprep.subr.bf16.mxu0 %v4912_v62  ;;  %2196 = vmatpush1.bf16.msra.mxu1 %v4937_v23  ;;  %v1896_v62 = vrot.slane %v1891_v59, %v5442_v7  ;;  %v4949_v59 = vld [vmem:[%s6527_s1 + $0x398] ss:$8 sps:$4 sm:$0x7f]  }
 0x54d   :  { %2197 = vmatprep.subr.bf16.mxu1 %v5121_v53 }
 0x54f   :  { %2040 = vmatpush1.bf16.msra.mxu0 %v4910_v63 }
 0x550   :  { %2041 = vmatprep.subr.bf16.mxu0 %v4915_v0  ;;  %2198 = vmatpush1.bf16.msra.mxu1 %v4939_v25 }
 0x551   :  { %2199 = vmatprep.subr.bf16.mxu1 %v5121_v53 }
 0x553   :  { %2042 = vmatpush1.bf16.msra.mxu0 %v4913_v1 }
 0x554   :  { %2055 = vmatprep.subr.bf16.mxu0 %v4918_v2  ;;  %2200 = vmatpush1.bf16.msra.mxu1 %v4941_v27 }
 0x555   :  { %2211 = vmatprep.subr.bf16.mxu1 %v5121_v53 }
 0x557   :  { %2056 = vmatpush2.bf16.msra.mxu0 %v4916_v3 }
 0x558   :  { %2057 = vmatprep.subr.bf16.mxu0 %v4923_v4  ;;  %2212 = vmatpush2.bf16.msra.mxu1 %v2183_v31 }
 0x559   :  { %2213 = vmatprep.subr.bf16.mxu1 %v5121_v53 }
 0x55b   :  { %2058 = vmatpush2.bf16.msra.mxu0 %v4921_v5 }
 0x55c   :  { %2321 = vmatprep.subr.bf16.mxu0 %v5121_v53  ;;  %2214 = vmatpush2.bf16.msra.mxu1 %v4945_v34 }
 0x55d   :  { %2215 = vmatprep.subr.bf16.mxu1 %v5121_v53 }
 0x55e   :  { %2060 = vmatmul.mubr.bf16.vlgmr.msra.gmra.mxu0 %v4241_v11 }
 0x55f   :  { %4266 = vmatprep.mubr.msk.bf16.mxu0 %vm322_vm7, %v4924_v10  ;;  %2322 = vmatpush1.bf16.msra.mxu0 %v4928_v14 }
 0x560   :  { %2323 = vmatprep.subr.bf16.mxu0 %v5121_v53  ;;  %2216 = vmatpush2.bf16.msra.mxu1 %v4947_v37 }
 0x561   :  { %4592 = vmatprep.subr.bf16.mxu1 %v5122_v39 }
 0x563   :  { %2324 = vmatpush1.bf16.msra.mxu0 %v4930_v16 }
 0x564   :  { %2325 = vmatprep.subr.bf16.mxu0 %v5121_v53 }
 0x566   :  { %2070 = vmatmul.mubr.bf16.gmra.mxu0 %v4926_v12 }
 0x567   :  { %2326 = vmatpush1.bf16.msra.mxu0 %v4932_v18 }
 0x568   :  { %2327 = vmatprep.subr.bf16.mxu0 %v5121_v53 }
 0x56b   :  { %2328 = vmatpush1.bf16.msra.mxu0 %v4934_v20 }
 0x56c   :  { %2329 = vmatprep.subr.bf16.mxu0 %v5121_v53 }
 0x56f   :  { %2330 = vmatpush1.bf16.msra.mxu0 %v4936_v22 }
 0x570   :  { %2331 = vmatprep.subr.bf16.mxu0 %v5121_v53 }
 0x573   :  { %2332 = vmatpush1.bf16.msra.mxu0 %v4938_v24 }
 0x574   :  { %2333 = vmatprep.subr.bf16.mxu0 %v5121_v53 }
 0x577   :  { %2334 = vmatpush1.bf16.msra.mxu0 %v4940_v26 }
 0x578   :  { %2335 = vmatprep.subr.bf16.mxu0 %v5121_v53 }
 0x57b   :  { %2336 = vmatpush1.bf16.msra.mxu0 %v4942_v28 }
 0x57c   :  { %2347 = vmatprep.subr.bf16.mxu0 %v5121_v53 }
 0x57f   :  { %2348 = vmatpush2.bf16.msra.mxu0 %v2319_v33 }
 0x580   :  { %2349 = vmatprep.subr.bf16.mxu0 %v5121_v53 }
 0x583   :  { %2350 = vmatpush2.bf16.msra.mxu0 %v4946_v36 }
 0x584   :  { %2351 = vmatprep.subr.bf16.mxu0 %v5121_v53 }
 0x587   :  { %2352 = vmatpush2.bf16.msra.mxu0 %v4948_v38 }
 0x5f6   :  { %v1654_v40 = vpop.f32.mrf.mxu0  ;;  %v1698_v41 = vpop.f32.mrf.mxu1 }
 0x5f7   :  { %v1704_v42 = vmax.f32 %v1654_v40, %v1698_v41 }
 0x5f8   :  { %v4584_v45 = vpop.f32.mrf.mxu0  ;;  %v4590_v46 = vpop.f32.mrf.mxu1 }
 0x5f9   :  { %1706 = vst.msk [vmem:[#allocation5] sm:$0x1f] %vm1705_vm4, %v1704_v42 }
 0x5fa   :  { %v1657_v47 = vpop.f32.mrf.mxu0  ;;  %v1701_v48 = vpop.f32.mrf.mxu1 }
 0x5fc   :  { %v4585_v50 = vpop.f32.mrf.mxu0  ;;  %v4591_v51 = vpop.f32.mrf.mxu1 }
 0x600   :  { %v1707_v52 = vld [vmem:[#allocation5] sm:$0x1]  ;;  %v1710_v55 = vld [vmem:[#allocation5 + $0x1] sm:$0x1]  ;;  %v1713_v56 = vld [vmem:[#allocation5 + $0x2] sm:$0x1] }
 0x601   :  { %1709 = vst.msk [vmem:[#allocation6] sm:$0x1] %vm6549_vm0, %v1707_v52  ;;  %1712 = vst.msk [vmem:[#allocation6 + $0x2] sm:$0x1] %vm6549_vm0, %v1710_v55  ;;  %v1716_v57 = vld [vmem:[#allocation5 + $0x3] sm:$0x1] }
 0x602   :  { %1715 = vst.msk [vmem:[#allocation6 + $0x4] sm:$0x1] %vm6549_vm0, %v1713_v56  ;;  %v1719_v58 = vld [vmem:[#allocation5 + $0x4] sm:$0x1]  ;;  %1718 = vst.msk [vmem:[#allocation6 + $0x6] sm:$0x1] %vm6549_vm0, %v1716_v57 }
 0x603   :  { %1721 = vst.msk [vmem:[#allocation6 + $0x8] sm:$0x1] %vm6549_vm0, %v1719_v58  ;;  %vm6590_vm0 = vcmask 1007936  }
 0x61e   :  { %v2061_v60 = vpop.f32.mrf.mxu0 }
 0x61f   :  { %v2062_v3 = vadd.f32 %v2061_v60, %v1896_v62  ;;  %v4950_v60 = vld [vmem:[%s6527_s1 + $0x3a8] ss:$8 sps:$4 sm:$0x7f]  }
 0x620   :  { %v2063_v63 = vpop.f32.mrf.mxu0 }
 0x621   :  { %v2064_v1 = vadd.f32 %v2063_v63, %v1900_v61  ;;  %v2080_v12 = vmax.f32 %v2062_v3, 0.0  ;;  %v4956_v63 = vld [vmem:[%s6527_s1 + $0x104] ss:$8 sps:$4 sm:$0xff]   ;;  %v4974_v3 = vld [vmem:[%s6527_s1 + $0x214] ss:$8 sps:$4 sm:$0xff]  }
 0x622   :  { %v2065_v0 = vpop.f32.mrf.mxu0  ;;  %2978 = vmatprep.subr.bf16.mxu0 %v4974_v3 }
 0x623   :  { %v2066_v2 = vadd.f32 %v2065_v0, %v1896_v62  ;;  %v2081_v10 = vmax.f32 %v2064_v1, 0.0  ;;  %v4954_v0 = vld [vmem:[%s6527_s1 + $0x100] ss:$8 sps:$4 sm:$0xff]   ;;  %v4959_v1 = vld [vmem:[%s6527_s1 + $0xf4] ss:$8 sps:$4 sm:$0xff]  }
 0x624   :  { %v2067_v4 = vpop.f32.mrf.mxu0 }
 0x625   :  { %v2068_v5 = vadd.f32 %v2067_v4, %v1900_v61  ;;  %v2082_v8 = vmax.f32 %v2066_v2, 0.0  ;;  %v4972_v2 = vld [vmem:[%s6527_s1 + $0x210] ss:$8 sps:$4 sm:$0xff]   ;;  %v4980_v4 = vld [vmem:[%s6527_s1 + $0x204] ss:$8 sps:$4 sm:$0xff]  }
 0x626   :  { %v2071_v9 = vpop.f32.mrf.mxu0 }
 0x627   :  { %v2083_v11 = vmax.f32 %v2068_v5, 0.0  ;;  %v2088_v15 = vpack.c.bf16 %v2082_v8, %v2080_v12  ;;  %v2072_v19 = vadd.f32 %v2071_v9, %v1896_v62  ;;  %v4957_v5 = vld [vmem:[%s6527_s1 + $0xf0] ss:$8 sps:$4 sm:$0xff]   ;;  %v4962_v8 = vld [vmem:[%s6527_s1 + $0xe4] ss:$8 sps:$4 sm:$0xff]  }
 0x628   :  { %v2073_v13 = vpop.f32.mrf.mxu0  ;;  %v4978_v9 = vld [vmem:[%s6527_s1 + $0x200] ss:$8 sps:$4 sm:$0xff]   ;;  %v4965_v12 = vld [vmem:[%s6527_s1 + $0xd4] ss:$8 sps:$4 sm:$0xff]  }
 0x629   :  { %v2089_v14 = vpack.c.bf16 %v2083_v11, %v2081_v10  ;;  %v2074_v17 = vadd.f32 %v2073_v13, %v1900_v61  ;;  %v2084_v25 = vmax.f32 %v2072_v19, 0.0  ;;  %v4986_v10 = vld [vmem:[%s6527_s1 + $0x1f4] ss:$8 sps:$4 sm:$0xff]   ;;  %v4960_v11 = vld [vmem:[%s6527_s1 + $0xe0] ss:$8 sps:$4 sm:$0xff]  }
 0x62a   :  { %v2075_v16 = vpop.f32.mrf.mxu0  ;;  %v4984_v13 = vld [vmem:[%s6527_s1 + $0x1f0] ss:$8 sps:$4 sm:$0xff]   ;;  %v4966_v19 = vld [vmem:[%s6527_s1 + $0xc0] ss:$8 sps:$4 sm:$0xff]  }
 0x62b   :  { %v2076_v18 = vadd.f32 %v2075_v16, %v1896_v62  ;;  %4278 = vmatprep.mubr.msk.bf16.mxu1 %vm6573_vm8, %v2089_v14  ;;  %4291 = vmatprep.mubr.msk.bf16.mxu0 %vm6574_vm9, %v2089_v14  ;;  %v2085_v23 = vmax.f32 %v2074_v17, 0.0  ;;  %vm6577_vm8 = vcmask 1045504   ;;  %vm6578_vm9 = vcmask 228352   ;;  %v4953_v62 = vld [vmem:[%s6527_s1 + $0x114] ss:$8 sps:$4 sm:$0xff]  }
 0x62c   :  { %v2077_v20 = vpop.f32.mrf.mxu0  ;;  %2218 = vmatmul.mubr.bf16.vlgmr.msra.gmra.mxu1 %v2088_v15  ;;  %2354 = vmatmul.mubr.bf16.vlgmr.msra.gmra.mxu0 %v2088_v15  ;;  %v4992_v14 = vld [vmem:[%s6527_s1 + $0x1e4] ss:$8 sps:$4 sm:$0xff]   ;;  %v4963_v15 = vld [vmem:[%s6527_s1 + $0xd0] ss:$8 sps:$4 sm:$0xff]   ;;  %v4990_v17 = vld [vmem:[%s6527_s1 + $0x1e0] ss:$8 sps:$4 sm:$0xff]  }
 0x62d   :  { %v2078_v21 = vadd.f32 %v2077_v20, %v1900_v61  ;;  %v2086_v22 = vmax.f32 %v2076_v18, 0.0  ;;  %v4951_v61 = vld [vmem:[%s6527_s1 + $0x110] ss:$8 sps:$4 sm:$0xff]   ;;  %2979 = vmatpush1.bf16.msra.mxu0 %v4972_v2  ;;  %v4968_v16 = vld [vmem:[%s6527_s1 + $0xc4] ss:$8 sps:$4 sm:$0xff]  }
 0x62e   :  { %2980 = vmatprep.subr.bf16.mxu0 %v4980_v4  ;;  %v4998_v18 = vld [vmem:[%s6527_s1 + $0x1d4] ss:$8 sps:$4 sm:$0xff]  }
 0x62f   :  { %v2087_v24 = vmax.f32 %v2078_v21, 0.0  ;;  %v2090_v27 = vpack.c.bf16 %v2086_v22, %v2084_v25  ;;  %v4971_v20 = vld [vmem:[%s6527_s1 + $0xb4] ss:$8 sps:$4 sm:$0xff]   ;;  %v4996_v21 = vld [vmem:[%s6527_s1 + $0x1d0] ss:$8 sps:$4 sm:$0xff]  }
 0x630   :  { %v4969_v22 = vld [vmem:[%s6527_s1 + $0xb0] ss:$8 sps:$4 sm:$0xff]   ;;  %v4983_v25 = vld [vmem:[%s6527_s1 + $0x194] ss:$8 sps:$4 sm:$0xff]  }
 0x631   :  { %v2091_v26 = vpack.c.bf16 %v2087_v24, %v2085_v23  ;;  %2981 = vmatpush1.bf16.msra.mxu0 %v4978_v9  ;;  %v4977_v23 = vld [vmem:[%s6527_s1 + $0xa4] ss:$8 sps:$4 sm:$0xff]   ;;  %v4975_v24 = vld [vmem:[%s6527_s1 + $0xa0] ss:$8 sps:$4 sm:$0xff]   ;;  %v5017_v9 = vld [vmem:[%s6527_s1 + $0x130] ss:$8 sps:$4 sm:$0xff]  }
 0x632   :  { %2982 = vmatprep.subr.bf16.mxu0 %v4986_v10  ;;  %v5019_v10 = vld [vmem:[%s6527_s1 + $0x134] ss:$8 sps:$4 sm:$0xff]  }
 0x633   :  { %4279 = vmatprep.mubr.msk.bf16.mxu1 %vm6575_vm13, %v2091_v26  ;;  %4292 = vmatprep.mubr.msk.bf16.mxu0 %vm6576_vm1, %v2091_v26  ;;  %vm6579_vm13 = vmmov %vm6578_vm9  ;;  %v4981_v26 = vld [vmem:[%s6527_s1 + $0x190] ss:$8 sps:$4 sm:$0xff]   ;;  %vm6580_vm1 = vcmask 687104  }
 0x634   :  { %2226 = vmatmul.mubr.bf16.gmra.mxu1 %v2090_v27  ;;  %2362 = vmatmul.mubr.bf16.gmra.mxu0 %v2090_v27  ;;  %v4989_v27 = vld [vmem:[%s6527_s1 + $0x184] ss:$8 sps:$4 sm:$0xff]  }
 0x635   :  { %4596 = vmatprep.mubr.msk.bf16.mxu1 %vm5123_vm11, %v5122_v39  ;;  %2983 = vmatpush1.bf16.msra.mxu0 %v4984_v13 }
 0x636   :  { %2984 = vmatprep.subr.bf16.mxu0 %v4992_v14 }
 0x639   :  { %2985 = vmatpush1.bf16.msra.mxu0 %v4990_v17  ;;  %v5024_v17 = vld [vmem:[%s6527_s1 + $0x124] ss:$8 sps:$4 sm:$0xff]  }
 0x63a   :  { %2986 = vmatprep.subr.bf16.mxu0 %v4998_v18 }
 0x63d   :  { %2987 = vmatpush1.bf16.msra.mxu0 %v4996_v21 }
 0x6ec   :  { %v2219_v28 = vpop.f32.mrf.mxu1  ;;  %v2355_v29 = vpop.f32.mrf.mxu0 }
 0x6ed   :  { %v2370_v57 = vmax.f32 %v2219_v28, %v2355_v29  ;;  %v4987_v28 = vld [vmem:[%s6527_s1 + $0x180] ss:$8 sps:$4 sm:$0xff]   ;;  %v4995_v29 = vld [vmem:[%s6527_s1 + $0x174] ss:$8 sps:$4 sm:$0xff]  }
 0x6ee   :  { %v2221_v30 = vpop.f32.mrf.mxu1  ;;  %v2357_v31 = vpop.f32.mrf.mxu0 }
 0x6ef   :  { %v4993_v30 = vld [vmem:[%s6527_s1 + $0x170] ss:$8 sps:$4 sm:$0xff]  }
 0x6f0   :  { %v2222_v33 = vpop.f32.mrf.mxu1  ;;  %v2358_v34 = vpop.f32.mrf.mxu0 }
 0x6f1   :  { %v2371_v55 = vmax.f32 %v2222_v33, %v2358_v34 }
 0x6f2   :  { %v2224_v36 = vpop.f32.mrf.mxu1  ;;  %v2360_v37 = vpop.f32.mrf.mxu0 }
 0x6f3   :  { %v2374_v58 = vpack.c.bf16 %v2371_v55, %v2370_v57  ;;  %v5010_v55 = vld [vmem:[%s6527_s1 + $0x1b4] ss:$8 sps:$4 sm:$0xff]  }
 0x6f4   :  { %v2227_v38 = vpop.f32.mrf.mxu1  ;;  %v2363_v40 = vpop.f32.mrf.mxu0 }
 0x6f5   :  { %v2372_v47 = vmax.f32 %v2227_v38, %v2363_v40 }
 0x6f6   :  { %v2229_v41 = vpop.f32.mrf.mxu1  ;;  %v2365_v42 = vpop.f32.mrf.mxu0 }
 0x6f7   :  { %v5001_v41 = vld [vmem:[%s6527_s1 + $0x164] ss:$8 sps:$4 sm:$0xff]  }
 0x6f8   :  { %v2230_v45 = vpop.f32.mrf.mxu1  ;;  %v2366_v46 = vpop.f32.mrf.mxu0 }
 0x6f9   :  { %v2373_v48 = vmax.f32 %v2230_v45, %v2366_v46  ;;  %v4999_v45 = vld [vmem:[%s6527_s1 + $0x160] ss:$8 sps:$4 sm:$0xff]  }
 0x6fa   :  { %v2232_v50 = vpop.f32.mrf.mxu1  ;;  %v2368_v51 = vpop.f32.mrf.mxu0 }
 0x6fb   :  { %v2375_v52 = vpack.c.bf16 %v2373_v48, %v2372_v47  ;;  %v5004_v47 = vld [vmem:[%s6527_s1 + $0x1c4] ss:$8 sps:$4 sm:$0xff]   ;;  %v5002_v50 = vld [vmem:[%s6527_s1 + $0x1c0] ss:$8 sps:$4 sm:$0xff]   ;;  %v5007_v51 = vld [vmem:[%s6527_s1 + $0x154] ss:$8 sps:$4 sm:$0xff]  }
 0x6fc   :  { %2988 = vmatprep.subr.bf16.mxu0 %v5004_v47 }
 0x6fd   :  { %v2387_v56 = vsel %vm6577_vm8, %v2375_v52, 0  ;;  %vm6581_vm8 = vcmask 685056   ;;  %2989 = vmatpush1.bf16.msra.mxu0 %v5002_v50  ;;  %v5005_v52 = vld [vmem:[%s6527_s1 + $0x150] ss:$8 sps:$4 sm:$0xff]  }
 0x6fe   :  { %4593 = vmatpush3.bf16.msra.mxu1 %v2387_v56  ;;  %2990 = vmatprep.subr.bf16.mxu0 %v5010_v55 }
 0x6ff   :  { %4594 = vmatprep.subr.bf16.mxu1 %v5122_v39 }
 0x702   :  { %4595 = vmatpush3.bf16.msra.mxu1 %v2374_v58 }
 0x703   :  { %4600 = vmatprep.subr.bf16.mxu1 %v5122_v39 }
 0x705   :  { %4597 = vmatmul.mubr.msk.bf16.vlgmr.msra.gmra.mxu1 %vm6578_vm9, %v4949_v59  ;;  %v5013_v59 = vld [vmem:[%s6527_s1 + $0x144] ss:$8 sps:$4 sm:$0xff]   ;;  %vm6582_vm9 = vcmask 683008  }
 0x706   :  { %4601 = vmatpush3.bf16.msra.mxu1 %v2387_v56  ;;  %4604 = vmatprep.mubr.msk.bf16.mxu1 %vm5123_vm11, %v5122_v39  ;;  %v5008_v56 = vld [vmem:[%s6527_s1 + $0x1b0] ss:$8 sps:$4 sm:$0xff]  }
 0x707   :  { %4602 = vmatprep.subr.bf16.mxu1 %v5122_v39  ;;  %2991 = vmatpush1.bf16.msra.mxu0 %v5008_v56 }
 0x70a   :  { %4603 = vmatpush3.bf16.msra.mxu1 %v2374_v58 }
 0x70b   :  { %2935 = vmatprep.subr.bf16.mxu1 %v4953_v62  ;;  %v5016_v62 = vld [vmem:[%s6527_s1 + $0x1a4] ss:$8 sps:$4 sm:$0xff]  }
 0x70c   :  { %2992 = vmatprep.subr.bf16.mxu0 %v5016_v62  ;;  %v5044_v62 = vld [vmem:[%s6527_s1 + $0x498] ss:$8 sps:$4 sm:$0xff]  }
 0x70d   :  { %4605 = vmatmul.mubr.msk.bf16.vlgmr.msra.gmra.mxu1 %vm6579_vm13, %v4950_v60  ;;  %v5011_v60 = vld [vmem:[%s6527_s1 + $0x140] ss:$8 sps:$4 sm:$0xff]   ;;  %vm6583_vm13 = vcmask 679936  }
 0x70e   :  { %2936 = vmatpush1.bf16.msra.mxu1 %v4951_v61  ;;  %v5014_v61 = vld [vmem:[%s6527_s1 + $0x1a0] ss:$8 sps:$4 sm:$0xff]  }
 0x70f   :  { %2937 = vmatprep.subr.bf16.mxu1 %v4956_v63  ;;  %2993 = vmatpush1.bf16.msra.mxu0 %v5014_v61  ;;  %v5039_v61 = vld [vmem:[%s6527_s1 + $0x418] ss:$8 sps:$4 sm:$0xff]  }
 0x712   :  { %2938 = vmatpush1.bf16.msra.mxu1 %v4954_v0 }
 0x713   :  { %2939 = vmatprep.subr.bf16.mxu1 %v4959_v1 }
 0x716   :  { %2940 = vmatpush1.bf16.msra.mxu1 %v4957_v5 }
 0x717   :  { %2941 = vmatprep.subr.bf16.mxu1 %v4962_v8 }
 0x71a   :  { %2942 = vmatpush1.bf16.msra.mxu1 %v4960_v11  ;;  %v2629_v11 = vld [vmem:[%s6527_s1 + $0x240] sm:$0x33] }
 0x71b   :  { %2943 = vmatprep.subr.bf16.mxu1 %v4965_v12 }
 0x71e   :  { %2944 = vmatpush1.bf16.msra.mxu1 %v4963_v15  ;;  %v4365_v15 = vcombine.high %v2629_v11, %v2629_v11 }
 0x71f   :  { %2945 = vmatprep.subr.bf16.mxu1 %v4968_v16  ;;  %v4364_v16 = vcombine.low %v2629_v11, %v2629_v11  ;;  %v5053_v11 = vld [vmem:[%s6527_s1 + $0x448] ss:$8 sps:$4 sm:$0xff]  }
 0x722   :  { %2946 = vmatpush1.bf16.msra.mxu1 %v4966_v19  ;;  %v5022_v19 = vld [vmem:[%s6527_s1 + $0x120] ss:$8 sps:$4 sm:$0xff]  }
 0x723   :  { %2947 = vmatprep.subr.bf16.mxu1 %v4971_v20  ;;  %v5027_v20 = vld [vmem:[%s6527_s1 + $0x234] ss:$8 sps:$4 sm:$0xff]  }
 0x726   :  { %2948 = vmatpush1.bf16.msra.mxu1 %v4969_v22 }
 0x727   :  { %2949 = vmatprep.subr.bf16.mxu1 %v4977_v23 }
 0x72a   :  { %2950 = vmatpush1.bf16.msra.mxu1 %v4975_v24  ;;  %v5025_v24 = vld [vmem:[%s6527_s1 + $0x230] ss:$8 sps:$4 sm:$0xff]  }
 0x72b   :  { %2951 = vmatprep.subr.bf16.mxu1 %v4983_v25 }
 0x72e   :  { %2952 = vmatpush2.bf16.msra.mxu1 %v4981_v26 }
 0x72f   :  { %2953 = vmatprep.subr.bf16.mxu1 %v4989_v27  ;;  %v5033_v27 = vld [vmem:[%s6527_s1 + $0x224] ss:$8 sps:$4 sm:$0xff]  }
 0x732   :  { %2954 = vmatpush2.bf16.msra.mxu1 %v4987_v28 }
 0x733   :  { %2955 = vmatprep.subr.bf16.mxu1 %v4995_v29 }
 0x736   :  { %2956 = vmatpush2.bf16.msra.mxu1 %v4993_v30  ;;  %v5031_v30 = vld [vmem:[%s6527_s1 + $0x220] ss:$8 sps:$4 sm:$0xff]  }
 0x737   :  { %2957 = vmatprep.subr.bf16.mxu1 %v5001_v41 }
 0x73a   :  { %2958 = vmatpush2.bf16.msra.mxu1 %v4999_v45 }
 0x73b   :  { %2959 = vmatprep.subr.bf16.mxu1 %v5007_v51 }
 0x73e   :  { %2960 = vmatpush2.bf16.msra.mxu1 %v5005_v52 }
 0x73f   :  { %2961 = vmatprep.subr.bf16.mxu1 %v5013_v59 }
 0x742   :  { %2962 = vmatpush2.bf16.msra.mxu1 %v5011_v60  ;;  %v5042_v60 = vld [vmem:[%s6527_s1 + $0x4a8] ss:$8 sps:$4 sm:$0xff]  }
 0x743   :  { %2963 = vmatprep.subr.bf16.mxu1 %v5019_v10  ;;  %v5052_v10 = vld [vmem:[%s6527_s1 + $0x458] ss:$8 sps:$4 sm:$0xff]  }
 0x746   :  { %2964 = vmatpush2.bf16.msra.mxu1 %v5017_v9  ;;  %v5051_v9 = vld [vmem:[%s6527_s1 + $0x3b8] ss:$8 sps:$4 sm:$0xff]  }
 0x747   :  { %2965 = vmatprep.subr.bf16.mxu1 %v5024_v17 }
 0x74a   :  { %2966 = vmatpush2.bf16.msra.mxu1 %v5022_v19 }
 0x74b   :  { %3231 = vmatprep.subr.bf16.mxu1 %v5121_v53 }
 0x7c5   :  { %v2423_v31 = vpop.f32.mrf.mxu1 }
 0x7c7   :  { %v4598_v33 = vpop.f32.mrf.mxu1 }
 0x7c9   :  { %v2426_v34 = vpop.f32.mrf.mxu1 }
 0x7cb   :  { %v4599_v36 = vpop.f32.mrf.mxu1 }
 0x7cd   :  { %v2474_v37 = vpop.f32.mrf.mxu1 }
 0x7ce   :  { %v2481_v38 = vmax.f32 %v2423_v31, %v2474_v37 }
 0x7cf   :  { %v4606_v40 = vpop.f32.mrf.mxu1 }
 0x7d0   :  { %2483 = vst.msk [vmem:[#allocation4] sm:$0xff] %vm6580_vm1, %v2481_v38  ;;  %vm6584_vm1 = vcmask 1041408  }
 0x7d1   :  { %v2477_v42 = vpop.f32.mrf.mxu1  ;;  %v2930_v21 = vsel %vm6584_vm1, %v4364_v16, 0 }
 0x7d2   :  { %v2482_v46 = vmax.f32 %v2426_v34, %v2477_v42 }
 0x7d3   :  { %v4607_v48 = vpop.f32.mrf.mxu1 }
 0x7d4   :  { %2484 = vst.msk [vmem:[#allocation4 + $0x8] sm:$0x3f] %vm6581_vm8, %v2482_v46  ;;  %vm6585_vm8 = vmmov %vm6584_vm1  ;;  %vm6588_vm1 = vcmask 1014784  }
 0x7d5   :  { %4366 = vmatprep.subr.msk.bf16.mxu0 %vm6585_vm8, %v4365_v15  ;;  %vm6589_vm8 = vmmov %vm6588_vm1 }
 0x7d6   :  { %3005 = vmatpush2.bf16.msra.mxu0 %v2930_v21 }
 0x7d7   :  { %v2485_v57 = vld [vmem:[#allocation4] sm:$0xff]  ;;  %3006 = vmatprep.subr.bf16.mxu0 %v5027_v20 }
 0x7d8   :  { %v4488_v58 = vpack.c.bf16 %v2485_v57, %v2485_v57 }
 0x7da   :  { %2495 = vst.msk [vmem:[#allocation3] sm:$0xf] %vm6582_vm9, %v4488_v58  ;;  %3007 = vmatpush2.bf16.msra.mxu0 %v5025_v24  ;;  %vm6586_vm9 = vcmask 687104   ;;  %v5040_v58 = vld [vmem:[%s6527_s1 + $0x4b8] ss:$8 sps:$4 sm:$0xff]  }
 0x7db   :  { %v2498_v63 = vld [vmem:[#allocation4 + $0x9] sm:$0x3]  ;;  %v2497_v0 = vld [vmem:[#allocation4 + $0x1] sm:$0xff]  ;;  %v2534_v3 = vld [vmem:[#allocation4 + $0xb] sm:$0x3]  ;;  %3008 = vmatprep.subr.bf16.mxu0 %v5033_v27 }
 0x7dc   :  { %v4491_v1 = vpack.c.bf16 %v2498_v63, %v2498_v63  ;;  %v4490_v2 = vpack.c.bf16 %v2497_v0, %v2497_v0  ;;  %v2533_v4 = vld [vmem:[#allocation4 + $0x3] sm:$0xff]  ;;  %v4495_v12 = vpack.c.bf16 %v2534_v3, %v2534_v3  ;;  %v2554_v25 = vld [vmem:[#allocation4 + $0xc] sm:$0x3] }
 0x7dd   :  { %v2486_v5 = vld [vmem:[#allocation4 + $0x8] sm:$0x3]  ;;  %v4494_v13 = vpack.c.bf16 %v2533_v4, %v2533_v4  ;;  %v2518_v14 = vld [vmem:[#allocation4 + $0xa] sm:$0x3]  ;;  %v4497_v28 = vpack.c.bf16 %v2554_v25, %v2554_v25  ;;  %v5047_v3 = vld [vmem:[%s6527_s1 + $0x3d8] ss:$8 sps:$4 sm:$0xff]  }
 0x7de   :  { %2507 = vrot.lane.b32.xlu1 %v4491_v1, %s5124_s14  ;;  %2505 = vrot.lane.b32.xlu0 %v4490_v2, %s5124_s14  ;;  %v4489_v8 = vpack.c.bf16 %v2486_v5, %v2486_v5  ;;  %v2517_v18 = vld [vmem:[#allocation4 + $0x2] sm:$0xff]  ;;  %v4493_v22 = vpack.c.bf16 %v2518_v14, %v2518_v14 }
 0x7df   :  { %v4492_v23 = vpack.c.bf16 %v2517_v18, %v2517_v18  ;;  %v2553_v26 = vld [vmem:[#allocation4 + $0x4] sm:$0xff]  ;;  %3009 = vmatpush2.bf16.msra.mxu0 %v5031_v30  ;;  %v5043_v1 = vld [vmem:[%s6527_s1 + $0x3f8] ss:$8 sps:$4 sm:$0xff]  }
 0x7e0   :  { %2496 = vst.msk [vmem:[#allocation3 + $0x10] sm:$0x1] %vm6583_vm13, %v4489_v8  ;;  %v4496_v29 = vpack.c.bf16 %v2553_v26, %v2553_v26  ;;  %3110 = vmatprep.subr.bf16.mxu0 %v5121_v53  ;;  %vm6587_vm13 = vmmov %vm6586_vm9  ;;  %v5041_v63 = vld [vmem:[%s6527_s1 + $0x408] ss:$8 sps:$4 sm:$0xff]   ;;  %v5048_v4 = vld [vmem:[%s6527_s1 + $0x478] ss:$8 sps:$4 sm:$0xff]  }
 0x7e1   :  { %v5046_v0 = vld [vmem:[%s6527_s1 + $0x488] ss:$8 sps:$4 sm:$0xff]   ;;  %v5056_v14 = vld [vmem:[%s6527_s1 + $0x4d8] ss:$8 sps:$4 sm:$0xff]  }
 0x7e2   :  { %2543 = vrot.lane.b32.xlu1 %v4495_v12, %s5125_s27  ;;  %2541 = vrot.lane.b32.xlu0 %v4494_v13, %s5125_s27  ;;  %v5045_v2 = vld [vmem:[%s6527_s1 + $0x3e8] ss:$8 sps:$4 sm:$0xff]   ;;  %v5055_v13 = vld [vmem:[%s6527_s1 + $0x438] ss:$8 sps:$4 sm:$0xff]  }
 0x7e3   :  { %v5049_v5 = vld [vmem:[%s6527_s1 + $0x3c8] ss:$8 sps:$4 sm:$0xff]  }
 0x7e4   :  { %v5050_v8 = vld [vmem:[%s6527_s1 + $0x468] ss:$8 sps:$4 sm:$0xff]  }
 0x7e5   :  { %v5054_v12 = vld [vmem:[%s6527_s1 + $0x4e8] ss:$8 sps:$4 sm:$0xff]  }
 0x7e6   :  { %2527 = vrot.lane.b32.xlu1 %v4493_v22, %s5126_s7  ;;  %2525 = vrot.lane.b32.xlu0 %v4492_v23, %s5126_s7 }
 0x7ea   :  { %2563 = vrot.lane.b32.xlu1 %v4497_v28, %s5127_s12  ;;  %2561 = vrot.lane.b32.xlu0 %v4496_v29, %s5127_s12 }
 0x850   :  { %v2508_v31 = vpop.permute.xlu1 %2507  ;;  %v2506_v33 = vpop.permute.xlu0 %2505 }
 0x851   :  { %v2510_v34 = vrot.slane %v2508_v31, 4  ;;  %v2509_v36 = vrot.slane %v2506_v33, 4 }
 0x853   :  { %v2512_v37 = vsel %vm6586_vm9, %v2510_v34, %v2508_v31  ;;  %v2511_v38 = vsel %vm6587_vm13, %v2509_v36, %v2506_v33  ;;  %vm6591_vm9 = vcmask 1011008  }
 0x854   :  { %v2544_v40 = vpop.permute.xlu1 %2543  ;;  %v2542_v41 = vpop.permute.xlu0 %2541  ;;  %2516 = vst.msk [vmem:[#allocation3 + $0x10] sm:$0x11] %vm5645_vm12, %v2512_v37 }
 0x855   :  { %2515 = vst.msk [vmem:[#allocation3] sm:$0xff] %vm5649_vm10, %v2511_v38  ;;  %v2546_v42 = vrot.slane %v2544_v40, 4  ;;  %v2545_v45 = vrot.slane %v2542_v41, 4  ;;  %vm6592_vm10 = vcmask 654336  }
 0x856   :  { %vm6593_vm12 = vmmov %vm6592_vm10 }
 0x857   :  { %v2548_v48 = vsel %vm6588_vm1, %v2546_v42, %v2544_v40  ;;  %v2547_v50 = vsel %vm6589_vm8, %v2545_v45, %v2542_v41  ;;  %vm6605_vm8 = vcmask 1043456  }
 0x858   :  { %v2528_v46 = vpop.permute.xlu1 %2527  ;;  %v2526_v47 = vpop.permute.xlu0 %2525 }
 0x859   :  { %2532 = vst.msk [vmem:[#allocation3 + $0x14] sm:$0x1] %vm6590_vm0, %v2528_v46 }
 0x85a   :  { %2531 = vst.msk [vmem:[#allocation3 + $0x4] sm:$0xf] %vm6591_vm9, %v2526_v47  ;;  %vm3873_vm9 = vcmask 982016  }
 0x85b   :  { %2552 = vst.msk [vmem:[#allocation3 + $0x14] sm:$0x11] %vm5659_vm6, %v2548_v48 }
 0x85c   :  { %2551 = vst.msk [vmem:[#allocation3 + $0x4] sm:$0xff] %vm5663_vm5, %v2547_v50  ;;  %v2564_v32 = vpop.permute.xlu1 %2563  ;;  %v2562_v35 = vpop.permute.xlu0 %2561  ;;  %v5028_v57 = vld [vmem:[#allocation3] ss:$16 sps:$4 sm:$0x1f]   ;;  %vm6595_vm5 = vcmask 647168  }
 0x85d   :  { %v2566_v51 = vrot.slane %v2564_v32, 4  ;;  %v2565_v52 = vrot.slane %v2562_v35, 4  ;;  %vm6596_vm6 = vmmov %vm6595_vm5 }
 0x85f   :  { %v2568_v55 = vsel %vm6592_vm10, %v2566_v51, %v2564_v32  ;;  %v2567_v56 = vsel %vm6593_vm12, %v2565_v52, %v2562_v35  ;;  %vm4014_vm12 = vcmask 74752  }
 0x860   :  { %2572 = vst.msk [vmem:[#allocation3 + $0x18] sm:$0x11] %vm5675_vm3, %v2568_v55  ;;  %vm6594_vm3 = vcmask 293888   ;;  %v3275_v55 = vld [vmem:[%s6527_s1 + $0x4f8] sm:$0x7] }
 0x861   :  { %2571 = vst.msk [vmem:[#allocation3 + $0x8] sm:$0xff] %vm5679_vm15, %v2567_v56  ;;  %v3322_v56 = vld [vmem:[%s6527_s1 + $0x500] sm:$0x7]  ;;  %vm6598_vm15 = vmmov %vm6595_vm5 }
 0x863   :  { %v5030_v43 = vld [vmem:[#allocation3 + $0x4] ss:$16 sps:$4 sm:$0x1f]  }
 0x864   :  { %2967 = vmatprep.mubr.bf16.mxu1 %v5030_v43  ;;  %v5058_v43 = vld [vmem:[%s6527_s1 + $0x598] ss:$8 sps:$4 sm:$0xff]  }
 0x865   :  { %2968 = vmatmul.mubr.bf16.vlgmr.msra.gmra.mxu1 %v5028_v57  ;;  %v5057_v57 = vld [vmem:[%s6527_s1 + $0x548] ss:$8 sps:$4 sm:$0xff]  }
 0x866   :  { %3232 = vmatpush1.bf16.msra.mxu1 %v5038_v44  ;;  %v5059_v44 = vld [vmem:[%s6527_s1 + $0x538] ss:$8 sps:$4 sm:$0xff]  }
 0x867   :  { %3233 = vmatprep.subr.bf16.mxu1 %v5121_v53 }
 0x868   :  { %v5034_v59 = vld [vmem:[#allocation3 + $0x8] ss:$16 sps:$4 sm:$0x1f]   ;;  %v5036_v49 = vld [vmem:[#allocation3 + $0xc] ss:$16 sps:$4 sm:$0x1f]  }
 0x869   :  { %4367 = vmatprep.mubr.msk.bf16.mxu0 %vm6594_vm3, %v5036_v49  ;;  %v5062_v49 = vld [vmem:[%s6527_s1 + $0x578] ss:$8 sps:$4 sm:$0xff]  }
 0x86a   :  { %3234 = vmatpush1.bf16.msra.mxu1 %v5040_v58  ;;  %3011 = vmatmul.mubr.bf16.vlgmr.msra.gmra.mxu0 %v5034_v59  ;;  %v5060_v58 = vld [vmem:[%s6527_s1 + $0x588] ss:$8 sps:$4 sm:$0xff]  }
 0x86b   :  { %3235 = vmatprep.subr.bf16.mxu1 %v5121_v53  ;;  %3111 = vmatpush1.bf16.msra.mxu0 %v5037_v54  ;;  %v5061_v59 = vld [vmem:[%s6527_s1 + $0x528] ss:$8 sps:$4 sm:$0xff]   ;;  %v5063_v54 = vld [vmem:[%s6527_s1 + $0x518] ss:$8 sps:$4 sm:$0xff]  }
 0x86c   :  { %3112 = vmatprep.subr.bf16.mxu0 %v5121_v53 }
 0x86e   :  { %3236 = vmatpush1.bf16.msra.mxu1 %v5042_v60  ;;  %v5064_v60 = vld [vmem:[%s6527_s1 + $0x568] ss:$8 sps:$4 sm:$0xff]  }
 0x86f   :  { %3237 = vmatprep.subr.bf16.mxu1 %v5121_v53  ;;  %3113 = vmatpush1.bf16.msra.mxu0 %v5039_v61  ;;  %v5065_v61 = vld [vmem:[%s6527_s1 + $0x508] ss:$8 sps:$4 sm:$0xff]  }
 0x870   :  { %3114 = vmatprep.subr.bf16.mxu0 %v5121_v53 }
 0x872   :  { %3238 = vmatpush1.bf16.msra.mxu1 %v5044_v62  ;;  %v5066_v62 = vld [vmem:[%s6527_s1 + $0x558] ss:$8 sps:$4 sm:$0xff]  }
 0x873   :  { %3239 = vmatprep.subr.bf16.mxu1 %v5121_v53  ;;  %3115 = vmatpush1.bf16.msra.mxu0 %v5041_v63 }
 0x874   :  { %3116 = vmatprep.subr.bf16.mxu0 %v5121_v53 }
 0x876   :  { %3240 = vmatpush1.bf16.msra.mxu1 %v5046_v0 }
 0x877   :  { %3241 = vmatprep.subr.bf16.mxu1 %v5121_v53  ;;  %3117 = vmatpush1.bf16.msra.mxu0 %v5043_v1 }
 0x878   :  { %3118 = vmatprep.subr.bf16.mxu0 %v5121_v53 }
 0x87a   :  { %3242 = vmatpush1.bf16.msra.mxu1 %v5048_v4 }
 0x87b   :  { %3119 = vmatpush1.bf16.msra.mxu0 %v5045_v2  ;;  %3243 = vmatprep.subr.bf16.mxu1 %v5121_v53 }
 0x87c   :  { %3120 = vmatprep.subr.bf16.mxu0 %v5121_v53 }
 0x87e   :  { %3244 = vmatpush1.bf16.msra.mxu1 %v5050_v8 }
 0x87f   :  { %3121 = vmatpush1.bf16.msra.mxu0 %v5047_v3  ;;  %3245 = vmatprep.subr.bf16.mxu1 %v5121_v53 }
 0x880   :  { %3122 = vmatprep.subr.bf16.mxu0 %v5121_v53 }
 0x882   :  { %3246 = vmatpush1.bf16.msra.mxu1 %v5052_v10 }
 0x883   :  { %3123 = vmatpush1.bf16.msra.mxu0 %v5049_v5  ;;  %3259 = vmatprep.subr.bf16.mxu1 %v5121_v53 }
 0x884   :  { %3124 = vmatprep.subr.bf16.mxu0 %v5121_v53 }
 0x886   :  { %3260 = vmatpush2.bf16.msra.mxu1 %v5054_v12 }
 0x887   :  { %3125 = vmatpush1.bf16.msra.mxu0 %v5051_v9  ;;  %3261 = vmatprep.subr.bf16.mxu1 %v5121_v53 }
 0x888   :  { %3138 = vmatprep.subr.bf16.mxu0 %v5121_v53 }
 0x88a   :  { %3262 = vmatpush2.bf16.msra.mxu1 %v5056_v14 }
 0x88b   :  { %3139 = vmatpush2.bf16.msra.mxu0 %v5053_v11  ;;  %4620 = vmatprep.subr.bf16.mxu1 %v5122_v39 }
 0x88c   :  { %3140 = vmatprep.subr.bf16.mxu0 %v5121_v53  ;;  %v4307_v53 = vld [vmem:[%s6528_s2 + $0x10] ss:$8 sm:$0x3] }
 0x88d   :  { %v2639_v18 = vrot.slane %v4307_v53, %v5440_v6  ;;  %v2635_v19 = vrot.slane %v4307_v53, %v5442_v7 }
 0x88f   :  { %3141 = vmatpush2.bf16.msra.mxu0 %v5055_v13 }
 0x890   :  { %4608 = vmatprep.subr.bf16.mxu0 %v5122_v39 }
 0x925   :  { %v2969_v15 = vpop.f32.mrf.mxu1 }
 0x926   :  { %v2970_v25 = vadd.f32 %v2969_v15, %v2635_v19  ;;  %v5067_v15 = vld [vmem:[%s6527_s1 + $0x5e8] ss:$8 sps:$4 sm:$0xff]  }
 0x927   :  { %v2971_v16 = vpop.f32.mrf.mxu1 }
 0x928   :  { %v2972_v23 = vadd.f32 %v2971_v16, %v2639_v18 }
 0x929   :  { %v2973_v17 = vpop.f32.mrf.mxu1 }
 0x92a   :  { %v3012_v20 = vpop.f32.mrf.mxu0  ;;  %v2974_v24 = vadd.f32 %v2973_v17, %v2635_v19  ;;  %v5068_v17 = vld [vmem:[%s6527_s1 + $0x638] ss:$8 sps:$4 sm:$0xff]  }
 0x92b   :  { %v2975_v21 = vpop.f32.mrf.mxu1  ;;  %v3013_v30 = vadd.f32 %v3012_v20, %v2970_v25  ;;  %v5069_v20 = vld [vmem:[%s6527_s1 + $0x5d8] ss:$8 sps:$4 sm:$0xff]   ;;  %v5074_v25 = vld [vmem:[%s6527_s1 + $0x608] ss:$8 sps:$4 sm:$0xff]  }
 0x92c   :  { %v3014_v22 = vpop.f32.mrf.mxu0  ;;  %v2976_v27 = vadd.f32 %v2975_v21, %v2639_v18  ;;  %v5070_v21 = vld [vmem:[%s6527_s1 + $0x628] ss:$8 sps:$4 sm:$0xff]  }
 0x92d   :  { %v3015_v28 = vadd.f32 %v3014_v22, %v2972_v23  ;;  %v3021_v38 = vmax.f32 %v3013_v30, 0.0  ;;  %v5071_v22 = vld [vmem:[%s6527_s1 + $0x5c8] ss:$8 sps:$4 sm:$0xff]   ;;  %v5072_v23 = vld [vmem:[%s6527_s1 + $0x618] ss:$8 sps:$4 sm:$0xff]  }
 0x92e   :  { %v3016_v26 = vpop.f32.mrf.mxu0  ;;  %v5077_v30 = vld [vmem:[%s6527_s1 + $0x688] ss:$8 sps:$4 sm:$0xff]  }
 0x92f   :  { %v3017_v29 = vadd.f32 %v3016_v26, %v2974_v24  ;;  %v3022_v36 = vmax.f32 %v3015_v28, 0.0  ;;  %v5073_v24 = vld [vmem:[%s6527_s1 + $0x5b8] ss:$8 sps:$4 sm:$0xff]   ;;  %v5075_v26 = vld [vmem:[%s6527_s1 + $0x5a8] ss:$8 sps:$4 sm:$0xff]  }
 0x930   :  { %v3018_v31 = vpop.f32.mrf.mxu0 }
 0x931   :  { %v3019_v33 = vadd.f32 %v3018_v31, %v2976_v27  ;;  %v3023_v34 = vmax.f32 %v3017_v29, 0.0  ;;  %v5076_v27 = vld [vmem:[%s6527_s1 + $0x5f8] ss:$8 sps:$4 sm:$0xff]  }
 0x933   :  { %v3024_v37 = vmax.f32 %v3019_v33, 0.0  ;;  %v3025_v40 = vpack.c.bf16 %v3023_v34, %v3021_v38  ;;  %v5078_v34 = vld [vmem:[%s6527_s1 + $0x678] ss:$8 sps:$4 sm:$0xff]   ;;  %v5081_v38 = vld [vmem:[%s6527_s1 + $0x648] ss:$8 sps:$4 sm:$0xff]  }
 0x935   :  { %v3026_v6 = vpack.c.bf16 %v3024_v37, %v3022_v36  ;;  %v5079_v36 = vld [vmem:[%s6527_s1 + $0x668] ss:$8 sps:$4 sm:$0xff]   ;;  %v5080_v37 = vld [vmem:[%s6527_s1 + $0x658] ss:$8 sps:$4 sm:$0xff]  }
 0x937   :  { %4378 = vmatprep.mubr.msk.bf16.mxu0 %vm322_vm7, %v3026_v6  ;;  %4389 = vmatprep.mubr.msk.bf16.mxu1 %vm322_vm7, %v3026_v6  ;;  %vm6597_vm7 = vmmov %vm6595_vm5 }
 0x938   :  { %3143 = vmatmul.mubr.bf16.vlgmr.msra.gmra.mxu0 %v3025_v40  ;;  %3264 = vmatmul.mubr.bf16.vlgmr.msra.gmra.mxu1 %v3025_v40 }
 0x939   :  { %4610 = vmatprep.mubr.msk.bf16.mxu0 %vm5123_vm11, %v5122_v39  ;;  %4630 = vmatprep.mubr.msk.bf16.mxu1 %vm5123_vm11, %v5122_v39 }
 0x93a   :  { %4621 = vmatpush3.bf16.msra.mxu1 %v5057_v57 }
 0x93b   :  { %4622 = vmatprep.subr.bf16.mxu1 %v5122_v39 }
 0x93e   :  { %4623 = vmatpush3.bf16.msra.mxu1 %v5059_v44 }
 0x93f   :  { %4624 = vmatprep.subr.bf16.mxu1 %v5122_v39 }
 0x942   :  { %4625 = vmatpush3.bf16.msra.mxu1 %v5061_v59 }
 0x943   :  { %4626 = vmatprep.subr.bf16.mxu1 %v5122_v39 }
 0x946   :  { %4627 = vmatpush3.bf16.msra.mxu1 %v5063_v54 }
 0x947   :  { %4628 = vmatprep.subr.bf16.mxu1 %v5122_v39 }
 0x94a   :  { %4629 = vmatpush3.bf16.msra.mxu1 %v5065_v61 }
 0x94b   :  { %4648 = vmatprep.subr.bf16.mxu1 %v5122_v39 }
 0x9f8   :  { %v3144_v7 = vpop.f32.mrf.mxu0  ;;  %v3265_v41 = vpop.f32.mrf.mxu1 }
 0x9f9   :  { %v3272_v48 = vmax.f32 %v3144_v7, %v3265_v41  ;;  %v5082_v7 = vld [vmem:[%s6527_s1 + $0x708] ss:$0 sps:$4 sm:$0xff]  }
 0x9fa   :  { %v3146_v42 = vpop.f32.mrf.mxu0  ;;  %v3267_v45 = vpop.f32.mrf.mxu1  ;;  %v3878_v41 = vsel %vm6605_vm8, %v5082_v7, 0 }
 0x9fb   :  { %v5083_v42 = vld [vmem:[%s6527_s1 + $0x6f8] ss:$8 sps:$4 sm:$0xff]   ;;  %v5084_v45 = vld [vmem:[%s6527_s1 + $0x6e8] ss:$8 sps:$4 sm:$0xff]  }
 0x9fc   :  { %v3147_v46 = vpop.f32.mrf.mxu0  ;;  %v3268_v47 = vpop.f32.mrf.mxu1 }
 0x9fd   :  { %v3273_v50 = vmax.f32 %v3147_v46, %v3268_v47  ;;  %v5085_v46 = vld [vmem:[%s6527_s1 + $0x6d8] ss:$8 sps:$4 sm:$0xff]   ;;  %v5086_v47 = vld [vmem:[%s6527_s1 + $0x6c8] ss:$8 sps:$4 sm:$0xff]  }
 0x9fe   :  { %v3149_v32 = vpop.f32.mrf.mxu0  ;;  %v3270_v35 = vpop.f32.mrf.mxu1 }
 0x9ff   :  { %v3274_v51 = vpack.c.bf16 %v3273_v50, %v3272_v48  ;;  %v5087_v48 = vld [vmem:[%s6527_s1 + $0x6b8] ss:$8 sps:$4 sm:$0xff]   ;;  %v5088_v50 = vld [vmem:[%s6527_s1 + $0x6a8] ss:$8 sps:$4 sm:$0xff]  }
 0xa00   :  { %v5089_v32 = vld [vmem:[%s6527_s1 + $0x698] ss:$8 sps:$4 sm:$0xff]  }
 0xa01   :  { %v3280_v52 = vsel %vm1616_vm2, %v3274_v51, 0  ;;  %vm6599_vm2 = vmmov %vm6595_vm5  ;;  %v5090_v35 = vld [vmem:[%s6527_s1 + $0x760] ss:$0 sps:$4 sm:$0x33]  }
 0xa02   :  { %4609 = vmatpush3.bf16.msra.mxu0 %v3280_v52 }
 0xa03   :  { %4614 = vmatprep.subr.bf16.mxu0 %v5122_v39 }
 0xa05   :  { %4611 = vmatmul.mubr.msk.bf16.vlgmr.msra.gmra.mxu0 %vm1612_vm14, %v3275_v55  ;;  %v5092_v55 = vld [vmem:[%s6527_s1 + $0x740] ss:$8 sps:$4 sm:$0xff]  }
 0xa06   :  { %4615 = vmatpush3.bf16.msra.mxu0 %v3280_v52  ;;  %4616 = vmatprep.mubr.msk.bf16.mxu0 %vm5123_vm11, %v5122_v39  ;;  %v5091_v52 = vld [vmem:[%s6527_s1 + $0x750] ss:$8 sps:$4 sm:$0xff]  }
 0xa07   :  { %4634 = vmatprep.subr.bf16.mxu0 %v5122_v39 }
 0xa0d   :  { %4617 = vmatmul.mubr.msk.bf16.vlgmr.msra.gmra.mxu0 %vm1612_vm14, %v3322_v56  ;;  %vm6600_vm14 = vmmov %vm6592_vm10  ;;  %v5093_v56 = vld [vmem:[%s6527_s1 + $0x730] ss:$8 sps:$4 sm:$0xff]  }
 0xa0e   :  { %4644 = vmatprep.mubr.msk.bf16.mxu0 %vm5123_vm11, %v5122_v39  ;;  %4635 = vmatpush3.bf16.msra.mxu0 %v5058_v43 }
 0xa0f   :  { %4636 = vmatprep.subr.bf16.mxu0 %v5122_v39 }
 0xa12   :  { %4637 = vmatpush3.bf16.msra.mxu0 %v5060_v58 }
 0xa13   :  { %4638 = vmatprep.subr.bf16.mxu0 %v5122_v39 }
 0xa16   :  { %4639 = vmatpush3.bf16.msra.mxu0 %v5062_v49 }
 0xa17   :  { %4640 = vmatprep.subr.bf16.mxu0 %v5122_v39 }
 0xa1a   :  { %4641 = vmatpush3.bf16.msra.mxu0 %v5064_v60 }
 0xa1b   :  { %4642 = vmatprep.subr.bf16.mxu0 %v5122_v39 }
 0xa1e   :  { %4643 = vmatpush3.bf16.msra.mxu0 %v5066_v62 }
 0xa1f   :  { %4662 = vmatprep.subr.bf16.mxu0 %v5122_v39 }
 0xac5   :  { %v3316_v63 = vpop.f32.mrf.mxu0 }
 0xac7   :  { %v4612_v0 = vpop.f32.mrf.mxu0 }
 0xac9   :  { %v3319_v1 = vpop.f32.mrf.mxu0 }
 0xacb   :  { %v4613_v2 = vpop.f32.mrf.mxu0 }
 0xacd   :  { %v3360_v3 = vpop.f32.mrf.mxu0 }
 0xace   :  { %v3366_v4 = vmax.f32 %v3316_v63, %v3360_v3  ;;  %v3378_v3 = vld [vmem:[%s6528_s2 + $0x20] ss:$0 sm:$0xff] }
 0xacf   :  { %v4618_v5 = vpop.f32.mrf.mxu0 }
 0xad0   :  { %3367 = vst.msk [vmem:[#allocation5] sm:$0x1f] %vm1705_vm4, %v3366_v4  ;;  %vm6601_vm4 = vmmov %vm6592_vm10  ;;  %vm6607_vm10 = vcmask 687104  }
 0xad1   :  { %v3363_v8 = vpop.f32.mrf.mxu0  ;;  %vm6602_vm0 = vmmov %vm6601_vm4 }
 0xad2   :  { %vm6603_vm13 = vmmov %vm6602_vm0 }
 0xad3   :  { %v4619_v9 = vpop.f32.mrf.mxu0  ;;  %vm6604_vm1 = vmmov %vm6602_vm0 }
 0xad7   :  { %v3368_v10 = vld [vmem:[#allocation5] sm:$0x1]  ;;  %v3370_v11 = vld [vmem:[#allocation5 + $0x1] sm:$0x1]  ;;  %v3372_v12 = vld [vmem:[#allocation5 + $0x2] sm:$0x1] }
 0xad8   :  { %3369 = vst.msk [vmem:[#allocation6 + $0x1] sm:$0x1] %vm6595_vm5, %v3368_v10  ;;  %v3374_v13 = vld [vmem:[#allocation5 + $0x3] sm:$0x1]  ;;  %v3376_v14 = vld [vmem:[#allocation5 + $0x4] sm:$0x1] }
 0xad9   :  { %3371 = vst.msk [vmem:[#allocation6 + $0x3] sm:$0x1] %vm6596_vm6, %v3370_v11 }
 0xada   :  { %3373 = vst.msk [vmem:[#allocation6 + $0x5] sm:$0x1] %vm6597_vm7, %v3372_v12 }
 0xadb   :  { %3375 = vst.msk [vmem:[#allocation6 + $0x7] sm:$0x1] %vm6598_vm15, %v3374_v13 }
 0xadc   :  { %3377 = vst.msk [vmem:[#allocation6 + $0x9] sm:$0x1] %vm6599_vm2, %v3376_v14 }
 0xadf   :  { %v3389_v16 = vld [vmem:[#allocation6] sm:$0x3] }
 0xae0   :  { %v3476_v53 = vld [vmem:[#allocation6 + $0x2] sm:$0x3]  ;;  %v3390_v18 = vpack.c.bf16 %v3389_v16, %v3389_v16 }
 0xae1   :  { %v3477_v19 = vpack.c.bf16 %v3476_v53, %v3476_v53  ;;  %v3562_v28 = vld [vmem:[#allocation6 + $0x4] sm:$0x3] }
 0xae2   :  { %4631 = vmatmul.mubr.msk.bf16.vlgmr.msra.gmra.mxu1 %vm6600_vm14, %v3390_v18  ;;  %v3648_v29 = vld [vmem:[#allocation6 + $0x6] sm:$0x3]  ;;  %v3563_v31 = vpack.c.bf16 %v3562_v28, %v3562_v28  ;;  %v5094_v18 = vld [vmem:[%s6527_s1 + $0x720] ss:$8 sps:$4 sm:$0xff]  }
 0xae3   :  { %4645 = vmatmul.mubr.msk.bf16.vlgmr.msra.gmra.mxu0 %vm6601_vm4, %v3477_v19  ;;  %4649 = vmatpush3.bf16.msra.mxu1 %v5067_v15  ;;  %v3649_v33 = vpack.c.bf16 %v3648_v29, %v3648_v29  ;;  %v3734_v6 = vld [vmem:[#allocation6 + $0x8] sm:$0x3]  ;;  %v5095_v19 = vld [vmem:[%s6527_s1 + $0x710] ss:$8 sps:$4 sm:$0xff]   ;;  %s5128_s1 = smov [#allocation7]  }
 0xae4   :  { %4663 = vmatpush3.bf16.msra.mxu0 %v5068_v17  ;;  %4650 = vmatprep.subr.bf16.mxu1 %v5122_v39  ;;  %v3735_v40 = vpack.c.bf16 %v3734_v6, %v3734_v6  ;;  %s4022_s18 = sshll.u32 %s5128_s1, 4  ;;  %s4023_s18 = int_to_ptr.vmem [resolvable:$true] %s4022_s18 }
 0xae5   :  { %4664 = vmatprep.subr.bf16.mxu0 %v5122_v39  ;;  %4658 = vmatprep.mubr.msk.bf16.mxu1 %vm5123_vm11, %v5122_v39  ;;  %s5096_s21 = scalar_lea.vmem %s4023_s18, 32  ;;  %p5101_p1 = scmp.lt.s32.totalorder %s4023_s18, %s4023_s18 }
 0xae6   :  { %4672 = vmatprep.mubr.msk.bf16.mxu0 %vm5123_vm11, %v5122_v39  ;;  %p5097_p0 = scmp.ne.s32.totalorder %s4023_s18, %s5096_s21  ;;  %p5102_p2 = scmp.lt.s32.totalorder %s5096_s21, %s5096_s21 }
 0xae7   :  { %4651 = vmatpush3.bf16.msra.mxu1 %v5069_v20  ;;  %v3827_v20 = vld [vmem:[%s6528_s2 + $0x30] ss:$0 sm:$0xff] }
 0xae8   :  { %4665 = vmatpush3.bf16.msra.mxu0 %v5070_v21  ;;  %4652 = vmatprep.subr.bf16.mxu1 %v5122_v39  ;;  %p5103_p3 = por %p5102_p2, %p5101_p1 }
 0xae9   :  { %4666 = vmatprep.subr.bf16.mxu0 %v5122_v39 }
 0xaea   :  { %p5104_p4 = pnand %p5103_p3, %p5097_p0 }
 0xaeb   :  { %4653 = vmatpush3.bf16.msra.mxu1 %v5071_v22 }
 0xaec   :  { %4667 = vmatpush3.bf16.msra.mxu0 %v5072_v23  ;;  %4654 = vmatprep.subr.bf16.mxu1 %v5122_v39 }
 0xaed   :  { %4668 = vmatprep.subr.bf16.mxu0 %v5122_v39 }
 0xaef   :  { %4655 = vmatpush3.bf16.msra.mxu1 %v5073_v24 }
 0xaf0   :  { %4669 = vmatpush3.bf16.msra.mxu0 %v5074_v25  ;;  %4656 = vmatprep.subr.bf16.mxu1 %v5122_v39 }
 0xaf1   :  { %4670 = vmatprep.subr.bf16.mxu0 %v5122_v39 }
 0xaf3   :  { %4657 = vmatpush3.bf16.msra.mxu1 %v5075_v26 }
 0xaf4   :  { %4671 = vmatpush3.bf16.msra.mxu0 %v5076_v27  ;;  %4676 = vmatprep.subr.bf16.mxu1 %v5122_v39 }
 0xaf5   :  { %4690 = vmatprep.subr.bf16.mxu0 %v5122_v39 }
 0xaf6   :  { %4659 = vmatmul.mubr.msk.bf16.vlgmr.msra.gmra.mxu1 %vm6602_vm0, %v3563_v31 }
 0xaf7   :  { %4673 = vmatmul.mubr.msk.bf16.vlgmr.msra.gmra.mxu0 %vm6603_vm13, %v3649_v33  ;;  %4677 = vmatpush3.bf16.msra.mxu1 %v5077_v30 }
 0xaf8   :  { %4686 = vmatprep.mubr.msk.bf16.mxu1 %vm5123_vm11, %v5122_v39  ;;  %4678 = vmatprep.subr.bf16.mxu1 %v5122_v39 }
 0xaf9   :  { %4706 = vmatprep.mubr.msk.bf16.mxu0 %vm5123_vm11, %v5122_v39  ;;  %4691 = vmatpush3.bf16.msra.mxu0 %v3878_v41 }
 0xafa   :  { %4692 = vmatprep.subr.bf16.mxu0 %v5122_v39 }
 0xafb   :  { %4679 = vmatpush3.bf16.msra.mxu1 %v5078_v34 }
 0xafc   :  { %4680 = vmatprep.subr.bf16.mxu1 %v5122_v39 }
 0xafd   :  { %4693 = vmatpush3.bf16.msra.mxu0 %v5083_v42 }
 0xafe   :  { %4694 = vmatprep.subr.bf16.mxu0 %v5122_v39 }
 0xaff   :  { %4681 = vmatpush3.bf16.msra.mxu1 %v5079_v36 }
 0xb00   :  { %4682 = vmatprep.subr.bf16.mxu1 %v5122_v39 }
 0xb01   :  { %4695 = vmatpush3.bf16.msra.mxu0 %v5084_v45 }
 0xb02   :  { %4696 = vmatprep.subr.bf16.mxu0 %v5122_v39 }
 0xb03   :  { %4683 = vmatpush3.bf16.msra.mxu1 %v5080_v37 }
 0xb04   :  { %4684 = vmatprep.subr.bf16.mxu1 %v5122_v39 }
 0xb05   :  { %4697 = vmatpush3.bf16.msra.mxu0 %v5085_v46 }
 0xb06   :  { %4698 = vmatprep.subr.bf16.mxu0 %v5122_v39 }
 0xb07   :  { %4685 = vmatpush3.bf16.msra.mxu1 %v5081_v38 }
 0xb08   :  { %4710 = vmatprep.subr.bf16.mxu1 %v5122_v39 }
 0xb09   :  { %4699 = vmatpush3.bf16.msra.mxu0 %v5086_v47 }
 0xb0a   :  { %4687 = vmatmul.mubr.msk.bf16.vlgmr.msra.gmra.mxu1 %vm6604_vm1, %v3735_v40  ;;  %4700 = vmatprep.subr.bf16.mxu0 %v5122_v39 }
 0xb0b   :  { %4722 = vmatprep.mubr.msk.bf16.mxu1 %vm5123_vm11, %v5122_v39  ;;  %vm6606_vm11 = vcmask 1041408  }
 0xb0c   :  { %v3971_v51 = vsel %vm6606_vm11, %v5090_v35, 0 }
 0xb0d   :  { %4701 = vmatpush3.bf16.msra.mxu0 %v5087_v48  ;;  %4711 = vmatpush3.bf16.msra.mxu1 %v3971_v51 }
 0xb0e   :  { %4702 = vmatprep.subr.bf16.mxu0 %v5122_v39  ;;  %4712 = vmatprep.subr.bf16.mxu1 %v5122_v39 }
 0xb11   :  { %4703 = vmatpush3.bf16.msra.mxu0 %v5088_v50  ;;  %4713 = vmatpush3.bf16.msra.mxu1 %v5091_v52 }
 0xb12   :  { %4704 = vmatprep.subr.bf16.mxu0 %v5122_v39  ;;  %4714 = vmatprep.subr.bf16.mxu1 %v5122_v39 }
 0xb15   :  { %4705 = vmatpush3.bf16.msra.mxu0 %v5089_v32  ;;  %4715 = vmatpush3.bf16.msra.mxu1 %v5092_v55 }
 0xb16   :  { %4716 = vmatprep.subr.bf16.mxu1 %v5122_v39 }
 0xb19   :  { %4717 = vmatpush3.bf16.msra.mxu1 %v5093_v56 }
 0xb1a   :  { %4718 = vmatprep.subr.bf16.mxu1 %v5122_v39 }
 0xb1d   :  { %4719 = vmatpush3.bf16.msra.mxu1 %v5094_v18 }
 0xb1e   :  { %4720 = vmatprep.subr.bf16.mxu1 %v5122_v39  ;;  %v3933_v39 = vld [vmem:[%s6528_s2 + $0x40] ss:$0 sm:$0xff] }
 0xb21   :  { %4721 = vmatpush3.bf16.msra.mxu1 %v5095_v19 }
 0xba2   :  { %v3459_v57 = vpop.f32.mrf.mxu1 }
 0xba3   :  { %v3545_v43 = vpop.f32.mrf.mxu0  ;;  %v3465_v8 = vadd.f32 %v3459_v57, %v3378_v3 }
 0xba4   :  { %v4632_v44 = vpop.f32.mrf.mxu1 }
 0xba5   :  { %v4646_v58 = vpop.f32.mrf.mxu0  ;;  %v3551_v9 = vadd.f32 %v3545_v43, %v3465_v8 }
 0xba6   :  { %v3462_v59 = vpop.f32.mrf.mxu1 }
 0xba7   :  { %v3548_v49 = vpop.f32.mrf.mxu0 }
 0xba8   :  { %v4633_v54 = vpop.f32.mrf.mxu1 }
 0xba9   :  { %v4647_v60 = vpop.f32.mrf.mxu0 }
 0xbb6   :  { %v3631_v61 = vpop.f32.mrf.mxu1 }
 0xbb7   :  { %v3717_v62 = vpop.f32.mrf.mxu0  ;;  %v3637_v10 = vadd.f32 %v3631_v61, %v3551_v9 }
 0xbb8   :  { %v4660_v63 = vpop.f32.mrf.mxu1 }
 0xbb9   :  { %v4674_v0 = vpop.f32.mrf.mxu0  ;;  %v3723_v11 = vadd.f32 %v3717_v62, %v3637_v10 }
 0xbba   :  { %v3634_v1 = vpop.f32.mrf.mxu1 }
 0xbbb   :  { %v3720_v2 = vpop.f32.mrf.mxu0 }
 0xbbc   :  { %v4661_v4 = vpop.f32.mrf.mxu1 }
 0xbbd   :  { %v4675_v5 = vpop.f32.mrf.mxu0 }
 0xbca   :  { %v3803_v12 = vpop.f32.mrf.mxu1 }
 0xbcb   :  { %v3809_v13 = vadd.f32 %v3803_v12, %v3723_v11 }
 0xbcc   :  { %v4688_v14 = vpop.f32.mrf.mxu1 }
 0xbcd   :  { %v3810_v15 = vmax.f32 %v3809_v13, 0.0 }
 0xbce   :  { %v3806_v16 = vpop.f32.mrf.mxu1 }
 0xbcf   :  { %v3811_v53 = vpack.c.bf16 %v3810_v15, %v3810_v15 }
 0xbd0   :  { %v4689_v17 = vpop.f32.mrf.mxu1 }
 0xbd1   :  { %4707 = vmatmul.mubr.msk.bf16.vlgmr.msra.gmra.mxu0 %vm3873_vm9, %v3811_v53 }
 0xc91   :  { %v3914_v21 = vpop.f32.mrf.mxu0 }
 0xc92   :  { %v3915_v22 = vadd.f32 %v3914_v21, %v3827_v20 }
 0xc93   :  { %v4708_v23 = vpop.f32.mrf.mxu0 }
 0xc94   :  { %v3920_v24 = vmax.f32 %v3915_v22, 0.0 }
 0xc95   :  { %v3917_v25 = vpop.f32.mrf.mxu0 }
 0xc96   :  { %v3921_v26 = vpack.c.bf16 %v3920_v24, %v3920_v24 }
 0xc97   :  { %v4709_v27 = vpop.f32.mrf.mxu0 }
 0xc98   :  { %4723 = vmatmul.mubr.msk.bf16.vlgmr.msra.gmra.mxu1 %vm6607_vm10, %v3921_v26 }
 0xd58   :  { %v4007_v28 = vpop.f32.mrf.mxu1 }
 0xd59   :  { %v4008_v29 = vadd.f32 %v4007_v28, %v3933_v39 }
 0xd5a   :  { %v4724_v30 = vpop.f32.mrf.mxu1 }
 0xd5b   :  { %v4013_v31 = vmax.f32 %v4008_v29, 0.0 }
 0xd5c   :  { %v4010_v33 = vpop.f32.mrf.mxu1 }
 0xd5d   :  { %4015 = vst.msk [vmem:[#allocation7] sm:$0x3] %vm4014_vm12, %v4013_v31 }
 0xd5e   :  { %v4725_v34 = vpop.f32.mrf.mxu1 }
 0xd5f   :  { %5107 = shalt.err (!%p5104_p4)
}
 0xd60   :  { %4025 = dma.vmem_to_hbm [thread:$0]  %s4023_s18, 32, %s6529_s3, [#allocation8]  }
 0xd61   :  { %5116 = dma.done.wait [#allocation8], 32  }
 0xd62   :  { %5117 = vsyncadd [#allocation8], 4294967264 }
 0xd63   :  { %4029 = vsyncpa [#allocation8], 1 }

</bundles_post_ra>
